<compile_context>
chip_gen: v6e
topology: v6e:2x2x1
jax: 0.10.0
libtpu: 0.0.40
codegen_flags: <defaults>
</compile_context>

<pallas_src>
import jax
import jax.numpy as jnp
from jax import lax
from jax.experimental import pallas as pl
from jax.experimental.pallas import tpu as pltpu  # noqa: F401

# ---- module hyper-parameters (from the PyTorch spec) ----
DROPOUT = 0.2          # identity in eval mode
N_EMBED = 32
BLOCK_SIZE = 8
N_HEAD = 4
N_LAYER = 4
VOCAB_SIZE = 65        # chars of a small text corpus (e.g. tiny-shakespeare charset)
# MultiHeadAttention does head_size = head_size * n_head, so each head's dim is:
HEAD_DIM = (N_EMBED // N_HEAD) * N_HEAD          # == 32 == N_EMBED
LN_EPS = 1e-5
NEG_INF = -1e30


def _layer_norm(x, w, b):
    """LayerNorm over the last dim. x: (R, C), w/b: (1, C)."""
    mu = jnp.mean(x, axis=-1, keepdims=True)
    xc = x - mu
    var = jnp.mean(xc * xc, axis=-1, keepdims=True)
    return xc * lax.rsqrt(var + LN_EPS) * w + b


def _model_kernel(ids_ref, tok_ref, pos_ref,
                  wqkv_ref, wproj_ref, bproj_ref,
                  ln1w_ref, ln1b_ref, ln2w_ref, ln2b_ref,
                  wff1_ref, bff1_ref, wff2_ref, bff2_ref,
                  lnfw_ref, lnfb_ref, wlm_ref, blm_ref,
                  o_ref):
    BT = ids_ref.shape[0]            # B * T
    T = pos_ref.shape[0]             # block_size
    C = tok_ref.shape[1]             # n_embed
    V = tok_ref.shape[0]             # vocab_size
    B = BT // T
    H = N_HEAD
    D = HEAD_DIM
    n_layer = wqkv_ref.shape[0]

    # ---- embeddings: one-hot(ids) @ token_table (gather-free), + position ----
    ids = ids_ref[...]                                               # (BT, 1) int32
    vocab_iota = lax.broadcasted_iota(jnp.int32, (BT, V), 1)
    onehot = (ids == vocab_iota).astype(jnp.float32)                 # (BT, V)
    tok = jnp.dot(onehot, tok_ref[...],
                  preferred_element_type=jnp.float32)                # (BT, C)
    pos = pos_ref[...]                                               # (T, C)
    x = tok + jnp.concatenate([pos] * B, axis=0)                     # (BT, C)

    # ---- block-diagonal causal additive bias, built in-kernel from iotas ----
    # keep(i, j) <=> same batch block AND causal within the block.
    assert (T & (T - 1)) == 0, "block_size must be a power of two"
    shift = T.bit_length() - 1
    row = lax.broadcasted_iota(jnp.int32, (BT, BT), 0)
    col = lax.broadcasted_iota(jnp.int32, (BT, BT), 1)
    same_batch = (row >> shift) == (col >> shift)
    causal = (row & (T - 1)) >= (col & (T - 1))
    attn_bias = jnp.where(same_batch & causal, 0.0, NEG_INF).astype(jnp.float32)

    # NOTE: PyTorch Head scales by C == n_embed (not head_size) -- intentional.
    scale = C ** (-0.5)

    for l in range(n_layer):
        # ---------------- multi-head attention ----------------
        xn = _layer_norm(x, ln1w_ref[l], ln1b_ref[l])
        # fused q/k/v for all heads: one (BT,C) @ (C, 3*H*D) matmul
        qkv = jnp.dot(xn, wqkv_ref[l],
                      preferred_element_type=jnp.float32)            # (BT, 3*H*D)
        mha = jnp.zeros((BT, C), jnp.float32)
        for h in range(H):
            q = qkv[:, h * D:(h + 1) * D]                            # (BT, D)
            k = qkv[:, H * D + h * D:H * D + (h + 1) * D]            # (BT, D)
            v = qkv[:, 2 * H * D + h * D:2 * H * D + (h + 1) * D]    # (BT, D)
            # q @ k^T without materializing the transpose (contract on head dim)
            s = lax.dot_general(q, k, (((1,), (1,)), ((), ())),
                                preferred_element_type=jnp.float32)  # (BT, BT)
            s = s * scale + attn_bias
            s = s - jnp.max(s, axis=-1, keepdims=True)
            p = jnp.exp(s)
            p = p * pl.reciprocal(jnp.sum(p, axis=-1, keepdims=True), approx=True)
            # attention dropout == identity in eval mode
            # heads are SUMMED (stack + sum over head axis in the PyTorch module)
            mha = mha + jnp.dot(p, v, preferred_element_type=jnp.float32)
        x = x + jnp.dot(mha, wproj_ref[l],
                        preferred_element_type=jnp.float32) + bproj_ref[l]

        # ---------------- feed-forward ----------------
        xn2 = _layer_norm(x, ln2w_ref[l], ln2b_ref[l])
        hdn = jnp.dot(xn2, wff1_ref[l],
                      preferred_element_type=jnp.float32) + bff1_ref[l]
        hdn = jnp.maximum(hdn, 0.0)                                  # ReLU
        x = x + jnp.dot(hdn, wff2_ref[l],
                        preferred_element_type=jnp.float32) + bff2_ref[l]
        # FF dropout == identity in eval mode

    # ---- final LayerNorm + lm_head ----
    xf = _layer_norm(x, lnfw_ref[...], lnfb_ref[...])
    logits = jnp.dot(xf, wlm_ref[...],
                     preferred_element_type=jnp.float32) + blm_ref[...]
    o_ref[...] = logits.astype(o_ref.dtype)


@jax.jit
def bigram_lm_forward(input_ints, params):
    """input_ints: (B, T) int32 token ids -> logits (B, T, vocab_size) float32."""
    B, T = input_ints.shape
    V = params["tok_table"].shape[0]
    out2d = pl.pallas_call(
        _model_kernel,
        out_shape=jax.ShapeDtypeStruct((B * T, V), jnp.float32),
        # no grid / no BlockSpecs: single invocation, every operand is a
        # whole-array VMEM block (total ~400 KB << VMEM on v5e/v6e/v7x).
    )(
        input_ints.reshape(B * T, 1).astype(jnp.int32),
        params["tok_table"], params["pos_table"],
        params["w_qkv"], params["w_proj"], params["b_proj"],
        params["ln1_w"], params["ln1_b"], params["ln2_w"], params["ln2_b"],
        params["w_ff1"], params["b_ff1"], params["w_ff2"], params["b_ff2"],
        params["lnf_w"], params["lnf_b"], params["w_lm"], params["b_lm"],
    )
    return out2d.reshape(B, T, V)


# ----------------------------- parameters -----------------------------
def init_params(key):
    C, V, T, H, D, L = N_EMBED, VOCAB_SIZE, BLOCK_SIZE, N_HEAD, HEAD_DIM, N_LAYER
    ks = jax.random.split(key, 16)

    def unif(k, shape, fan_in):
        s = 1.0 / jnp.sqrt(fan_in)
        return jax.random.uniform(k, shape, jnp.float32, -s, s)

    return {
        "tok_table": 0.02 * jax.random.normal(ks[0], (V, C), jnp.float32),
        "pos_table": 0.02 * jax.random.normal(ks[1], (T, C), jnp.float32),
        # fused per-layer QKV for all heads, columns = [Q(H*D) | K(H*D) | V(H*D)],
        # head h at offset h*D within each 128-wide block.
        "w_qkv": unif(ks[2], (L, C, 3 * H * D), C),
        "w_proj": unif(ks[3], (L, C, C), C),
        "b_proj": unif(ks[4], (L, 1, C), C),
        "ln1_w": 1.0 + 0.1 * jax.random.normal(ks[5], (L, 1, C), jnp.float32),
        "ln1_b": 0.1 * jax.random.normal(ks[6], (L, 1, C), jnp.float32),
        "ln2_w": 1.0 + 0.1 * jax.random.normal(ks[7], (L, 1, C), jnp.float32),
        "ln2_b": 0.1 * jax.random.normal(ks[8], (L, 1, C), jnp.float32),
        "w_ff1": unif(ks[9], (L, C, 4 * C), C),
        "b_ff1": unif(ks[10], (L, 1, 4 * C), C),
        "w_ff2": unif(ks[11], (L, 4 * C, C), 4 * C),
        "b_ff2": unif(ks[12], (L, 1, C), 4 * C),
        "lnf_w": 1.0 + 0.1 * jax.random.normal(ks[13], (1, C), jnp.float32),
        "lnf_b": 0.1 * jax.random.normal(ks[14], (1, C), jnp.float32),
        "w_lm": unif(ks[15], (C, V), C),
        "b_lm": jnp.zeros((1, V), jnp.float32),
    }


# ------------------------- pure-JAX reference -------------------------
def _layer_norm_ref(x, w, b):
    mu = jnp.mean(x, axis=-1, keepdims=True)
    var = jnp.mean((x - mu) ** 2, axis=-1, keepdims=True)
    return (x - mu) / jnp.sqrt(var + LN_EPS) * w + b


def reference_forward(ids, p):
    B, T = ids.shape
    C, H, D = N_EMBED, N_HEAD, HEAD_DIM
    x = p["tok_table"][ids] + p["pos_table"][None, :T]            # (B, T, C)
    tril = jnp.tril(jnp.ones((T, T), dtype=bool))
    for l in range(N_LAYER):
        xn = _layer_norm_ref(x, p["ln1_w"][l, 0], p["ln1_b"][l, 0])
        mha = jnp.zeros_like(x)
        for h in range(H):
            wq = p["w_qkv"][l][:, h * D:(h + 1) * D]
            wk = p["w_qkv"][l][:, H * D + h * D:H * D + (h + 1) * D]
            wv = p["w_qkv"][l][:, 2 * H * D + h * D:2 * H * D + (h + 1) * D]
            q, k, v = xn @ wq, xn @ wk, xn @ wv
            wei = jnp.einsum("btd,bsd->bts", q, k) * (C ** -0.5)  # scale by n_embed
            wei = jnp.where(tril[None], wei, -jnp.inf)
            wei = jax.nn.softmax(wei, axis=-1)
            mha = mha + jnp.einsum("bts,bsd->btd", wei, v)        # heads summed
        x = x + mha @ p["w_proj"][l] + p["b_proj"][l, 0]
        xn2 = _layer_norm_ref(x, p["ln2_w"][l, 0], p["ln2_b"][l, 0])
        hdn = jax.nn.relu(xn2 @ p["w_ff1"][l] + p["b_ff1"][l, 0])
        x = x + hdn @ p["w_ff2"][l] + p["b_ff2"][l, 0]
    x = _layer_norm_ref(x, p["lnf_w"][0], p["lnf_b"][0])
    return x @ p["w_lm"] + p["b_lm"][0]


if __name__ == "__main__":
    key = jax.random.PRNGKey(0)
    kp, ki = jax.random.split(key)
    params = init_params(kp)

    B, T = 2, BLOCK_SIZE
    input_ints = jax.random.randint(ki, (B, T), 0, VOCAB_SIZE, dtype=jnp.int32)

    logits = bigram_lm_forward(input_ints, params)
    logits = jax.block_until_ready(logits)

    ref = reference_forward(input_ints, params)
    assert logits.shape == (B, T, VOCAB_SIZE)
    # tolerance accounts for the approximate (EUP) softmax reciprocal
    assert jnp.allclose(logits, ref, atol=5e-3, rtol=5e-3), (
        f"mismatch vs reference: max abs err = {jnp.max(jnp.abs(logits - ref))}")

    print("KERNEL_OK")
</pallas_src>

<mosaic_0001>
module attributes {stable_mosaic.version = 11 : i64} {
  func.func @_model_kernel(%arg0: memref<16x1xi32, #tpu.memory_space<vmem>>, %arg1: memref<65x32xf32, #tpu.memory_space<vmem>>, %arg2: memref<8x32xf32, #tpu.memory_space<vmem>>, %arg3: memref<4x32x384xf32, #tpu.memory_space<vmem>>, %arg4: memref<4x32x32xf32, #tpu.memory_space<vmem>>, %arg5: memref<4x1x32xf32, #tpu.memory_space<vmem>>, %arg6: memref<4x1x32xf32, #tpu.memory_space<vmem>>, %arg7: memref<4x1x32xf32, #tpu.memory_space<vmem>>, %arg8: memref<4x1x32xf32, #tpu.memory_space<vmem>>, %arg9: memref<4x1x32xf32, #tpu.memory_space<vmem>>, %arg10: memref<4x32x128xf32, #tpu.memory_space<vmem>>, %arg11: memref<4x1x128xf32, #tpu.memory_space<vmem>>, %arg12: memref<4x128x32xf32, #tpu.memory_space<vmem>>, %arg13: memref<4x1x32xf32, #tpu.memory_space<vmem>>, %arg14: memref<1x32xf32, #tpu.memory_space<vmem>>, %arg15: memref<1x32xf32, #tpu.memory_space<vmem>>, %arg16: memref<32x65xf32, #tpu.memory_space<vmem>>, %arg17: memref<1x65xf32, #tpu.memory_space<vmem>>, %arg18: memref<16x65xf32, #tpu.memory_space<vmem>>) attributes {dimension_semantics = [], scalar_prefetch = 0 : i64, scratch_operands = 0 : i64, tpu.core_type = #tpu.core_type<tc>} {
    %c0 = arith.constant 0 : index
    %c0_0 = arith.constant 0 : index
    %0 = vector.load %arg0[%c0, %c0_0] : memref<16x1xi32, #tpu.memory_space<vmem>>, vector<16x1xi32>
    %1 = tpu.iota {dimensions = array<i32: 1>} : vector<16x65xi32>
    %2 = vector.broadcast %0 : vector<16x1xi32> to vector<16x65xi32>
    %3 = arith.cmpi eq, %2, %1 : vector<16x65xi32>
    %4 = arith.extui %3 : vector<16x65xi1> to vector<16x65xi32>
    %5 = arith.sitofp %4 : vector<16x65xi32> to vector<16x65xf32>
    %c0_1 = arith.constant 0 : index
    %c0_2 = arith.constant 0 : index
    %6 = vector.load %arg1[%c0_1, %c0_2] : memref<65x32xf32, #tpu.memory_space<vmem>>, vector<65x32xf32>
    %cst = arith.constant dense<0.000000e+00> : vector<16x32xf32>
    %7 = tpu.matmul %5, %6, %cst {dimension_numbers = #tpu.dot_dimension_numbers<[1], [0], [0], [1], [0, 0, 1, 1], [], []>} : vector<16x65xf32>, vector<65x32xf32>, vector<16x32xf32> -> vector<16x32xf32>
    %c0_3 = arith.constant 0 : index
    %c0_4 = arith.constant 0 : index
    %8 = vector.load %arg2[%c0_3, %c0_4] : memref<8x32xf32, #tpu.memory_space<vmem>>, vector<8x32xf32>
    %9 = tpu.concatenate %8, %8 in 0 : vector<8x32xf32>, vector<8x32xf32> -> vector<16x32xf32>
    %10 = arith.addf %7, %9 : vector<16x32xf32>
    %11 = tpu.iota {dimensions = array<i32: 0>} : vector<16x16xi32>
    %12 = tpu.iota {dimensions = array<i32: 1>} : vector<16x16xi32>
    %c3_i32 = arith.constant 3 : i32
    %13 = vector.broadcast %c3_i32 : i32 to vector<16x16xi32>
    %14 = arith.shrsi %11, %13 : vector<16x16xi32>
    %c3_i32_5 = arith.constant 3 : i32
    %15 = vector.broadcast %c3_i32_5 : i32 to vector<16x16xi32>
    %16 = arith.shrsi %12, %15 : vector<16x16xi32>
    %17 = arith.cmpi eq, %14, %16 : vector<16x16xi32>
    %c7_i32 = arith.constant 7 : i32
    %18 = vector.broadcast %c7_i32 : i32 to vector<16x16xi32>
    %19 = arith.andi %11, %18 : vector<16x16xi32>
    %c7_i32_6 = arith.constant 7 : i32
    %20 = vector.broadcast %c7_i32_6 : i32 to vector<16x16xi32>
    %21 = arith.andi %12, %20 : vector<16x16xi32>
    %22 = arith.cmpi sge, %19, %21 : vector<16x16xi32>
    %23 = arith.andi %17, %22 : vector<16x16xi1>
    %cst_7 = arith.constant 0.000000e+00 : f32
    %cst_8 = arith.constant -1.000000e+30 : f32
    %24 = vector.broadcast %cst_7 : f32 to vector<16x16xf32>
    %25 = vector.broadcast %cst_8 : f32 to vector<16x16xf32>
    %26 = arith.select %23, %24, %25 : vector<16x16xi1>, vector<16x16xf32>
    %c0_9 = arith.constant 0 : index
    %c0_10 = arith.constant 0 : index
    %c0_11 = arith.constant 0 : index
    %27 = vector.load %arg6[%c0_9, %c0_10, %c0_11] : memref<4x1x32xf32, #tpu.memory_space<vmem>>, vector<1x1x32xf32>
    %28 = vector.shape_cast %27 : vector<1x1x32xf32> to vector<1x32xf32>
    %c0_12 = arith.constant 0 : index
    %c0_13 = arith.constant 0 : index
    %c0_14 = arith.constant 0 : index
    %29 = vector.load %arg7[%c0_12, %c0_13, %c0_14] : memref<4x1x32xf32, #tpu.memory_space<vmem>>, vector<1x1x32xf32>
    %30 = vector.shape_cast %29 : vector<1x1x32xf32> to vector<1x32xf32>
    %cst_15 = arith.constant dense<0.000000e+00> : vector<16xf32>
    %31 = vector.multi_reduction <add>, %10, %cst_15 [1] : vector<16x32xf32> to vector<16xf32>
    %32 = vector.shape_cast %31 : vector<16xf32> to vector<16x1xf32>
    %cst_16 = arith.constant 3.200000e+01 : f32
    %33 = vector.broadcast %cst_16 : f32 to vector<16x1xf32>
    %34 = arith.divf %32, %33 : vector<16x1xf32>
    %35 = vector.broadcast %34 : vector<16x1xf32> to vector<16x32xf32>
    %36 = arith.subf %10, %35 : vector<16x32xf32>
    %37 = arith.mulf %36, %36 : vector<16x32xf32>
    %cst_17 = arith.constant dense<0.000000e+00> : vector<16xf32>
    %38 = vector.multi_reduction <add>, %37, %cst_17 [1] : vector<16x32xf32> to vector<16xf32>
    %39 = vector.shape_cast %38 : vector<16xf32> to vector<16x1xf32>
    %cst_18 = arith.constant 3.200000e+01 : f32
    %40 = vector.broadcast %cst_18 : f32 to vector<16x1xf32>
    %41 = arith.divf %39, %40 : vector<16x1xf32>
    %cst_19 = arith.constant 9.99999974E-6 : f32
    %42 = vector.broadcast %cst_19 : f32 to vector<16x1xf32>
    %43 = arith.addf %41, %42 : vector<16x1xf32>
    %44 = math.rsqrt %43 : vector<16x1xf32>
    %45 = vector.broadcast %44 : vector<16x1xf32> to vector<16x32xf32>
    %46 = arith.mulf %36, %45 : vector<16x32xf32>
    %47 = vector.broadcast %28 : vector<1x32xf32> to vector<16x32xf32>
    %48 = arith.mulf %46, %47 : vector<16x32xf32>
    %49 = vector.broadcast %30 : vector<1x32xf32> to vector<16x32xf32>
    %50 = arith.addf %48, %49 : vector<16x32xf32>
    %c0_20 = arith.constant 0 : index
    %c0_21 = arith.constant 0 : index
    %c0_22 = arith.constant 0 : index
    %51 = vector.load %arg3[%c0_20, %c0_21, %c0_22] : memref<4x32x384xf32, #tpu.memory_space<vmem>>, vector<1x32x384xf32>
    %52 = vector.shape_cast %51 : vector<1x32x384xf32> to vector<32x384xf32>
    %cst_23 = arith.constant dense<0.000000e+00> : vector<16x384xf32>
    %53 = tpu.matmul %50, %52, %cst_23 {dimension_numbers = #tpu.dot_dimension_numbers<[1], [0], [0], [1], [0, 0, 1, 1], [], []>} : vector<16x32xf32>, vector<32x384xf32>, vector<16x384xf32> -> vector<16x384xf32>
    %cst_24 = arith.constant 0.000000e+00 : f32
    %54 = vector.broadcast %cst_24 : f32 to vector<16x32xf32>
    %55 = vector.extract_strided_slice %53 {offsets = [0, 0], sizes = [16, 32], strides = [1, 1]} : vector<16x384xf32> to vector<16x32xf32>
    %56 = vector.extract_strided_slice %53 {offsets = [0, 128], sizes = [16, 32], strides = [1, 1]} : vector<16x384xf32> to vector<16x32xf32>
    %57 = vector.extract_strided_slice %53 {offsets = [0, 256], sizes = [16, 32], strides = [1, 1]} : vector<16x384xf32> to vector<16x32xf32>
    %cst_25 = arith.constant dense<0.000000e+00> : vector<16x16xf32>
    %58 = tpu.matmul %55, %56, %cst_25 {dimension_numbers = #tpu.dot_dimension_numbers<[1], [1], [0], [0], [0, 0, 1, 0], [], []>} : vector<16x32xf32>, vector<16x32xf32>, vector<16x16xf32> -> vector<16x16xf32>
    %cst_26 = arith.constant 0.176776692 : f32
    %59 = vector.broadcast %cst_26 : f32 to vector<16x16xf32>
    %60 = arith.mulf %58, %59 : vector<16x16xf32>
    %61 = arith.addf %60, %26 : vector<16x16xf32>
    %cst_27 = arith.constant dense<0xFF800000> : vector<16xf32>
    %62 = vector.multi_reduction <maximumf>, %61, %cst_27 [1] : vector<16x16xf32> to vector<16xf32>
    %63 = vector.shape_cast %62 : vector<16xf32> to vector<16x1xf32>
    %64 = vector.broadcast %63 : vector<16x1xf32> to vector<16x16xf32>
    %65 = arith.subf %61, %64 : vector<16x16xf32>
    %66 = math.exp %65 : vector<16x16xf32>
    %cst_28 = arith.constant dense<0.000000e+00> : vector<16xf32>
    %67 = vector.multi_reduction <add>, %66, %cst_28 [1] : vector<16x16xf32> to vector<16xf32>
    %68 = vector.shape_cast %67 : vector<16xf32> to vector<16x1xf32>
    %69 = tpu.reciprocal %68 {approx = true} : vector<16x1xf32> -> vector<16x1xf32>
    %70 = vector.broadcast %69 : vector<16x1xf32> to vector<16x16xf32>
    %71 = arith.mulf %66, %70 : vector<16x16xf32>
    %cst_29 = arith.constant dense<0.000000e+00> : vector<16x32xf32>
    %72 = tpu.matmul %71, %57, %cst_29 {dimension_numbers = #tpu.dot_dimension_numbers<[1], [0], [0], [1], [0, 0, 1, 1], [], []>} : vector<16x16xf32>, vector<16x32xf32>, vector<16x32xf32> -> vector<16x32xf32>
    %73 = arith.addf %54, %72 : vector<16x32xf32>
    %74 = vector.extract_strided_slice %53 {offsets = [0, 32], sizes = [16, 32], strides = [1, 1]} : vector<16x384xf32> to vector<16x32xf32>
    %75 = vector.extract_strided_slice %53 {offsets = [0, 160], sizes = [16, 32], strides = [1, 1]} : vector<16x384xf32> to vector<16x32xf32>
    %76 = vector.extract_strided_slice %53 {offsets = [0, 288], sizes = [16, 32], strides = [1, 1]} : vector<16x384xf32> to vector<16x32xf32>
    %cst_30 = arith.constant dense<0.000000e+00> : vector<16x16xf32>
    %77 = tpu.matmul %74, %75, %cst_30 {dimension_numbers = #tpu.dot_dimension_numbers<[1], [1], [0], [0], [0, 0, 1, 0], [], []>} : vector<16x32xf32>, vector<16x32xf32>, vector<16x16xf32> -> vector<16x16xf32>
    %cst_31 = arith.constant 0.176776692 : f32
    %78 = vector.broadcast %cst_31 : f32 to vector<16x16xf32>
    %79 = arith.mulf %77, %78 : vector<16x16xf32>
    %80 = arith.addf %79, %26 : vector<16x16xf32>
    %cst_32 = arith.constant dense<0xFF800000> : vector<16xf32>
    %81 = vector.multi_reduction <maximumf>, %80, %cst_32 [1] : vector<16x16xf32> to vector<16xf32>
    %82 = vector.shape_cast %81 : vector<16xf32> to vector<16x1xf32>
    %83 = vector.broadcast %82 : vector<16x1xf32> to vector<16x16xf32>
    %84 = arith.subf %80, %83 : vector<16x16xf32>
    %85 = math.exp %84 : vector<16x16xf32>
    %cst_33 = arith.constant dense<0.000000e+00> : vector<16xf32>
    %86 = vector.multi_reduction <add>, %85, %cst_33 [1] : vector<16x16xf32> to vector<16xf32>
    %87 = vector.shape_cast %86 : vector<16xf32> to vector<16x1xf32>
    %88 = tpu.reciprocal %87 {approx = true} : vector<16x1xf32> -> vector<16x1xf32>
    %89 = vector.broadcast %88 : vector<16x1xf32> to vector<16x16xf32>
    %90 = arith.mulf %85, %89 : vector<16x16xf32>
    %cst_34 = arith.constant dense<0.000000e+00> : vector<16x32xf32>
    %91 = tpu.matmul %90, %76, %cst_34 {dimension_numbers = #tpu.dot_dimension_numbers<[1], [0], [0], [1], [0, 0, 1, 1], [], []>} : vector<16x16xf32>, vector<16x32xf32>, vector<16x32xf32> -> vector<16x32xf32>
    %92 = arith.addf %73, %91 : vector<16x32xf32>
    %93 = vector.extract_strided_slice %53 {offsets = [0, 64], sizes = [16, 32], strides = [1, 1]} : vector<16x384xf32> to vector<16x32xf32>
    %94 = vector.extract_strided_slice %53 {offsets = [0, 192], sizes = [16, 32], strides = [1, 1]} : vector<16x384xf32> to vector<16x32xf32>
    %95 = vector.extract_strided_slice %53 {offsets = [0, 320], sizes = [16, 32], strides = [1, 1]} : vector<16x384xf32> to vector<16x32xf32>
    %cst_35 = arith.constant dense<0.000000e+00> : vector<16x16xf32>
    %96 = tpu.matmul %93, %94, %cst_35 {dimension_numbers = #tpu.dot_dimension_numbers<[1], [1], [0], [0], [0, 0, 1, 0], [], []>} : vector<16x32xf32>, vector<16x32xf32>, vector<16x16xf32> -> vector<16x16xf32>
    %cst_36 = arith.constant 0.176776692 : f32
    %97 = vector.broadcast %cst_36 : f32 to vector<16x16xf32>
    %98 = arith.mulf %96, %97 : vector<16x16xf32>
    %99 = arith.addf %98, %26 : vector<16x16xf32>
    %cst_37 = arith.constant dense<0xFF800000> : vector<16xf32>
    %100 = vector.multi_reduction <maximumf>, %99, %cst_37 [1] : vector<16x16xf32> to vector<16xf32>
    %101 = vector.shape_cast %100 : vector<16xf32> to vector<16x1xf32>
    %102 = vector.broadcast %101 : vector<16x1xf32> to vector<16x16xf32>
    %103 = arith.subf %99, %102 : vector<16x16xf32>
    %104 = math.exp %103 : vector<16x16xf32>
    %cst_38 = arith.constant dense<0.000000e+00> : vector<16xf32>
    %105 = vector.multi_reduction <add>, %104, %cst_38 [1] : vector<16x16xf32> to vector<16xf32>
    %106 = vector.shape_cast %105 : vector<16xf32> to vector<16x1xf32>
    %107 = tpu.reciprocal %106 {approx = true} : vector<16x1xf32> -> vector<16x1xf32>
    %108 = vector.broadcast %107 : vector<16x1xf32> to vector<16x16xf32>
    %109 = arith.mulf %104, %108 : vector<16x16xf32>
    %cst_39 = arith.constant dense<0.000000e+00> : vector<16x32xf32>
    %110 = tpu.matmul %109, %95, %cst_39 {dimension_numbers = #tpu.dot_dimension_numbers<[1], [0], [0], [1], [0, 0, 1, 1], [], []>} : vector<16x16xf32>, vector<16x32xf32>, vector<16x32xf32> -> vector<16x32xf32>
    %111 = arith.addf %92, %110 : vector<16x32xf32>
    %112 = vector.extract_strided_slice %53 {offsets = [0, 96], sizes = [16, 32], strides = [1, 1]} : vector<16x384xf32> to vector<16x32xf32>
    %113 = vector.extract_strided_slice %53 {offsets = [0, 224], sizes = [16, 32], strides = [1, 1]} : vector<16x384xf32> to vector<16x32xf32>
    %114 = vector.extract_strided_slice %53 {offsets = [0, 352], sizes = [16, 32], strides = [1, 1]} : vector<16x384xf32> to vector<16x32xf32>
    %cst_40 = arith.constant dense<0.000000e+00> : vector<16x16xf32>
    %115 = tpu.matmul %112, %113, %cst_40 {dimension_numbers = #tpu.dot_dimension_numbers<[1], [1], [0], [0], [0, 0, 1, 0], [], []>} : vector<16x32xf32>, vector<16x32xf32>, vector<16x16xf32> -> vector<16x16xf32>
    %cst_41 = arith.constant 0.176776692 : f32
    %116 = vector.broadcast %cst_41 : f32 to vector<16x16xf32>
    %117 = arith.mulf %115, %116 : vector<16x16xf32>
    %118 = arith.addf %117, %26 : vector<16x16xf32>
    %cst_42 = arith.constant dense<0xFF800000> : vector<16xf32>
    %119 = vector.multi_reduction <maximumf>, %118, %cst_42 [1] : vector<16x16xf32> to vector<16xf32>
    %120 = vector.shape_cast %119 : vector<16xf32> to vector<16x1xf32>
    %121 = vector.broadcast %120 : vector<16x1xf32> to vector<16x16xf32>
    %122 = arith.subf %118, %121 : vector<16x16xf32>
    %123 = math.exp %122 : vector<16x16xf32>
    %cst_43 = arith.constant dense<0.000000e+00> : vector<16xf32>
    %124 = vector.multi_reduction <add>, %123, %cst_43 [1] : vector<16x16xf32> to vector<16xf32>
    %125 = vector.shape_cast %124 : vector<16xf32> to vector<16x1xf32>
    %126 = tpu.reciprocal %125 {approx = true} : vector<16x1xf32> -> vector<16x1xf32>
    %127 = vector.broadcast %126 : vector<16x1xf32> to vector<16x16xf32>
    %128 = arith.mulf %123, %127 : vector<16x16xf32>
    %cst_44 = arith.constant dense<0.000000e+00> : vector<16x32xf32>
    %129 = tpu.matmul %128, %114, %cst_44 {dimension_numbers = #tpu.dot_dimension_numbers<[1], [0], [0], [1], [0, 0, 1, 1], [], []>} : vector<16x16xf32>, vector<16x32xf32>, vector<16x32xf32> -> vector<16x32xf32>
    %130 = arith.addf %111, %129 : vector<16x32xf32>
    %c0_45 = arith.constant 0 : index
    %c0_46 = arith.constant 0 : index
    %c0_47 = arith.constant 0 : index
    %131 = vector.load %arg4[%c0_45, %c0_46, %c0_47] : memref<4x32x32xf32, #tpu.memory_space<vmem>>, vector<1x32x32xf32>
    %132 = vector.shape_cast %131 : vector<1x32x32xf32> to vector<32x32xf32>
    %cst_48 = arith.constant dense<0.000000e+00> : vector<16x32xf32>
    %133 = tpu.matmul %130, %132, %cst_48 {dimension_numbers = #tpu.dot_dimension_numbers<[1], [0], [0], [1], [0, 0, 1, 1], [], []>} : vector<16x32xf32>, vector<32x32xf32>, vector<16x32xf32> -> vector<16x32xf32>
    %134 = arith.addf %10, %133 : vector<16x32xf32>
    %c0_49 = arith.constant 0 : index
    %c0_50 = arith.constant 0 : index
    %c0_51 = arith.constant 0 : index
    %135 = vector.load %arg5[%c0_49, %c0_50, %c0_51] : memref<4x1x32xf32, #tpu.memory_space<vmem>>, vector<1x1x32xf32>
    %136 = vector.shape_cast %135 : vector<1x1x32xf32> to vector<1x32xf32>
    %137 = vector.broadcast %136 : vector<1x32xf32> to vector<16x32xf32>
    %138 = arith.addf %134, %137 : vector<16x32xf32>
    %c0_52 = arith.constant 0 : index
    %c0_53 = arith.constant 0 : index
    %c0_54 = arith.constant 0 : index
    %139 = vector.load %arg8[%c0_52, %c0_53, %c0_54] : memref<4x1x32xf32, #tpu.memory_space<vmem>>, vector<1x1x32xf32>
    %140 = vector.shape_cast %139 : vector<1x1x32xf32> to vector<1x32xf32>
    %c0_55 = arith.constant 0 : index
    %c0_56 = arith.constant 0 : index
    %c0_57 = arith.constant 0 : index
    %141 = vector.load %arg9[%c0_55, %c0_56, %c0_57] : memref<4x1x32xf32, #tpu.memory_space<vmem>>, vector<1x1x32xf32>
    %142 = vector.shape_cast %141 : vector<1x1x32xf32> to vector<1x32xf32>
    %cst_58 = arith.constant dense<0.000000e+00> : vector<16xf32>
    %143 = vector.multi_reduction <add>, %138, %cst_58 [1] : vector<16x32xf32> to vector<16xf32>
    %144 = vector.shape_cast %143 : vector<16xf32> to vector<16x1xf32>
    %cst_59 = arith.constant 3.200000e+01 : f32
    %145 = vector.broadcast %cst_59 : f32 to vector<16x1xf32>
    %146 = arith.divf %144, %145 : vector<16x1xf32>
    %147 = vector.broadcast %146 : vector<16x1xf32> to vector<16x32xf32>
    %148 = arith.subf %138, %147 : vector<16x32xf32>
    %149 = arith.mulf %148, %148 : vector<16x32xf32>
    %cst_60 = arith.constant dense<0.000000e+00> : vector<16xf32>
    %150 = vector.multi_reduction <add>, %149, %cst_60 [1] : vector<16x32xf32> to vector<16xf32>
    %151 = vector.shape_cast %150 : vector<16xf32> to vector<16x1xf32>
    %cst_61 = arith.constant 3.200000e+01 : f32
    %152 = vector.broadcast %cst_61 : f32 to vector<16x1xf32>
    %153 = arith.divf %151, %152 : vector<16x1xf32>
    %cst_62 = arith.constant 9.99999974E-6 : f32
    %154 = vector.broadcast %cst_62 : f32 to vector<16x1xf32>
    %155 = arith.addf %153, %154 : vector<16x1xf32>
    %156 = math.rsqrt %155 : vector<16x1xf32>
    %157 = vector.broadcast %156 : vector<16x1xf32> to vector<16x32xf32>
    %158 = arith.mulf %148, %157 : vector<16x32xf32>
    %159 = vector.broadcast %140 : vector<1x32xf32> to vector<16x32xf32>
    %160 = arith.mulf %158, %159 : vector<16x32xf32>
    %161 = vector.broadcast %142 : vector<1x32xf32> to vector<16x32xf32>
    %162 = arith.addf %160, %161 : vector<16x32xf32>
    %c0_63 = arith.constant 0 : index
    %c0_64 = arith.constant 0 : index
    %c0_65 = arith.constant 0 : index
    %163 = vector.load %arg10[%c0_63, %c0_64, %c0_65] : memref<4x32x128xf32, #tpu.memory_space<vmem>>, vector<1x32x128xf32>
    %164 = vector.shape_cast %163 : vector<1x32x128xf32> to vector<32x128xf32>
    %cst_66 = arith.constant dense<0.000000e+00> : vector<16x128xf32>
    %165 = tpu.matmul %162, %164, %cst_66 {dimension_numbers = #tpu.dot_dimension_numbers<[1], [0], [0], [1], [0, 0, 1, 1], [], []>} : vector<16x32xf32>, vector<32x128xf32>, vector<16x128xf32> -> vector<16x128xf32>
    %c0_67 = arith.constant 0 : index
    %c0_68 = arith.constant 0 : index
    %c0_69 = arith.constant 0 : index
    %166 = vector.load %arg11[%c0_67, %c0_68, %c0_69] : memref<4x1x128xf32, #tpu.memory_space<vmem>>, vector<1x1x128xf32>
    %167 = vector.shape_cast %166 : vector<1x1x128xf32> to vector<1x128xf32>
    %168 = vector.broadcast %167 : vector<1x128xf32> to vector<16x128xf32>
    %169 = arith.addf %165, %168 : vector<16x128xf32>
    %cst_70 = arith.constant 0.000000e+00 : f32
    %170 = vector.broadcast %cst_70 : f32 to vector<16x128xf32>
    %171 = arith.maximumf %169, %170 : vector<16x128xf32>
    %c0_71 = arith.constant 0 : index
    %c0_72 = arith.constant 0 : index
    %c0_73 = arith.constant 0 : index
    %172 = vector.load %arg12[%c0_71, %c0_72, %c0_73] : memref<4x128x32xf32, #tpu.memory_space<vmem>>, vector<1x128x32xf32>
    %173 = vector.shape_cast %172 : vector<1x128x32xf32> to vector<128x32xf32>
    %cst_74 = arith.constant dense<0.000000e+00> : vector<16x32xf32>
    %174 = tpu.matmul %171, %173, %cst_74 {dimension_numbers = #tpu.dot_dimension_numbers<[1], [0], [0], [1], [0, 0, 1, 1], [], []>} : vector<16x128xf32>, vector<128x32xf32>, vector<16x32xf32> -> vector<16x32xf32>
    %175 = arith.addf %138, %174 : vector<16x32xf32>
    %c0_75 = arith.constant 0 : index
    %c0_76 = arith.constant 0 : index
    %c0_77 = arith.constant 0 : index
    %176 = vector.load %arg13[%c0_75, %c0_76, %c0_77] : memref<4x1x32xf32, #tpu.memory_space<vmem>>, vector<1x1x32xf32>
    %177 = vector.shape_cast %176 : vector<1x1x32xf32> to vector<1x32xf32>
    %178 = vector.broadcast %177 : vector<1x32xf32> to vector<16x32xf32>
    %179 = arith.addf %175, %178 : vector<16x32xf32>
    %c1 = arith.constant 1 : index
    %c0_78 = arith.constant 0 : index
    %c0_79 = arith.constant 0 : index
    %180 = vector.load %arg6[%c1, %c0_78, %c0_79] : memref<4x1x32xf32, #tpu.memory_space<vmem>>, vector<1x1x32xf32>
    %181 = vector.shape_cast %180 : vector<1x1x32xf32> to vector<1x32xf32>
    %c1_80 = arith.constant 1 : index
    %c0_81 = arith.constant 0 : index
    %c0_82 = arith.constant 0 : index
    %182 = vector.load %arg7[%c1_80, %c0_81, %c0_82] : memref<4x1x32xf32, #tpu.memory_space<vmem>>, vector<1x1x32xf32>
    %183 = vector.shape_cast %182 : vector<1x1x32xf32> to vector<1x32xf32>
    %cst_83 = arith.constant dense<0.000000e+00> : vector<16xf32>
    %184 = vector.multi_reduction <add>, %179, %cst_83 [1] : vector<16x32xf32> to vector<16xf32>
    %185 = vector.shape_cast %184 : vector<16xf32> to vector<16x1xf32>
    %cst_84 = arith.constant 3.200000e+01 : f32
    %186 = vector.broadcast %cst_84 : f32 to vector<16x1xf32>
    %187 = arith.divf %185, %186 : vector<16x1xf32>
    %188 = vector.broadcast %187 : vector<16x1xf32> to vector<16x32xf32>
    %189 = arith.subf %179, %188 : vector<16x32xf32>
    %190 = arith.mulf %189, %189 : vector<16x32xf32>
    %cst_85 = arith.constant dense<0.000000e+00> : vector<16xf32>
    %191 = vector.multi_reduction <add>, %190, %cst_85 [1] : vector<16x32xf32> to vector<16xf32>
    %192 = vector.shape_cast %191 : vector<16xf32> to vector<16x1xf32>
    %cst_86 = arith.constant 3.200000e+01 : f32
    %193 = vector.broadcast %cst_86 : f32 to vector<16x1xf32>
    %194 = arith.divf %192, %193 : vector<16x1xf32>
    %cst_87 = arith.constant 9.99999974E-6 : f32
    %195 = vector.broadcast %cst_87 : f32 to vector<16x1xf32>
    %196 = arith.addf %194, %195 : vector<16x1xf32>
    %197 = math.rsqrt %196 : vector<16x1xf32>
    %198 = vector.broadcast %197 : vector<16x1xf32> to vector<16x32xf32>
    %199 = arith.mulf %189, %198 : vector<16x32xf32>
    %200 = vector.broadcast %181 : vector<1x32xf32> to vector<16x32xf32>
    %201 = arith.mulf %199, %200 : vector<16x32xf32>
    %202 = vector.broadcast %183 : vector<1x32xf32> to vector<16x32xf32>
    %203 = arith.addf %201, %202 : vector<16x32xf32>
    %c1_88 = arith.constant 1 : index
    %c0_89 = arith.constant 0 : index
    %c0_90 = arith.constant 0 : index
    %204 = vector.load %arg3[%c1_88, %c0_89, %c0_90] : memref<4x32x384xf32, #tpu.memory_space<vmem>>, vector<1x32x384xf32>
    %205 = vector.shape_cast %204 : vector<1x32x384xf32> to vector<32x384xf32>
    %cst_91 = arith.constant dense<0.000000e+00> : vector<16x384xf32>
    %206 = tpu.matmul %203, %205, %cst_91 {dimension_numbers = #tpu.dot_dimension_numbers<[1], [0], [0], [1], [0, 0, 1, 1], [], []>} : vector<16x32xf32>, vector<32x384xf32>, vector<16x384xf32> -> vector<16x384xf32>
    %cst_92 = arith.constant 0.000000e+00 : f32
    %207 = vector.broadcast %cst_92 : f32 to vector<16x32xf32>
    %208 = vector.extract_strided_slice %206 {offsets = [0, 0], sizes = [16, 32], strides = [1, 1]} : vector<16x384xf32> to vector<16x32xf32>
    %209 = vector.extract_strided_slice %206 {offsets = [0, 128], sizes = [16, 32], strides = [1, 1]} : vector<16x384xf32> to vector<16x32xf32>
    %210 = vector.extract_strided_slice %206 {offsets = [0, 256], sizes = [16, 32], strides = [1, 1]} : vector<16x384xf32> to vector<16x32xf32>
    %cst_93 = arith.constant dense<0.000000e+00> : vector<16x16xf32>
    %211 = tpu.matmul %208, %209, %cst_93 {dimension_numbers = #tpu.dot_dimension_numbers<[1], [1], [0], [0], [0, 0, 1, 0], [], []>} : vector<16x32xf32>, vector<16x32xf32>, vector<16x16xf32> -> vector<16x16xf32>
    %cst_94 = arith.constant 0.176776692 : f32
    %212 = vector.broadcast %cst_94 : f32 to vector<16x16xf32>
    %213 = arith.mulf %211, %212 : vector<16x16xf32>
    %214 = arith.addf %213, %26 : vector<16x16xf32>
    %cst_95 = arith.constant dense<0xFF800000> : vector<16xf32>
    %215 = vector.multi_reduction <maximumf>, %214, %cst_95 [1] : vector<16x16xf32> to vector<16xf32>
    %216 = vector.shape_cast %215 : vector<16xf32> to vector<16x1xf32>
    %217 = vector.broadcast %216 : vector<16x1xf32> to vector<16x16xf32>
    %218 = arith.subf %214, %217 : vector<16x16xf32>
    %219 = math.exp %218 : vector<16x16xf32>
    %cst_96 = arith.constant dense<0.000000e+00> : vector<16xf32>
    %220 = vector.multi_reduction <add>, %219, %cst_96 [1] : vector<16x16xf32> to vector<16xf32>
    %221 = vector.shape_cast %220 : vector<16xf32> to vector<16x1xf32>
    %222 = tpu.reciprocal %221 {approx = true} : vector<16x1xf32> -> vector<16x1xf32>
    %223 = vector.broadcast %222 : vector<16x1xf32> to vector<16x16xf32>
    %224 = arith.mulf %219, %223 : vector<16x16xf32>
    %cst_97 = arith.constant dense<0.000000e+00> : vector<16x32xf32>
    %225 = tpu.matmul %224, %210, %cst_97 {dimension_numbers = #tpu.dot_dimension_numbers<[1], [0], [0], [1], [0, 0, 1, 1], [], []>} : vector<16x16xf32>, vector<16x32xf32>, vector<16x32xf32> -> vector<16x32xf32>
    %226 = arith.addf %207, %225 : vector<16x32xf32>
    %227 = vector.extract_strided_slice %206 {offsets = [0, 32], sizes = [16, 32], strides = [1, 1]} : vector<16x384xf32> to vector<16x32xf32>
    %228 = vector.extract_strided_slice %206 {offsets = [0, 160], sizes = [16, 32], strides = [1, 1]} : vector<16x384xf32> to vector<16x32xf32>
    %229 = vector.extract_strided_slice %206 {offsets = [0, 288], sizes = [16, 32], strides = [1, 1]} : vector<16x384xf32> to vector<16x32xf32>
    %cst_98 = arith.constant dense<0.000000e+00> : vector<16x16xf32>
    %230 = tpu.matmul %227, %228, %cst_98 {dimension_numbers = #tpu.dot_dimension_numbers<[1], [1], [0], [0], [0, 0, 1, 0], [], []>} : vector<16x32xf32>, vector<16x32xf32>, vector<16x16xf32> -> vector<16x16xf32>
    %cst_99 = arith.constant 0.176776692 : f32
    %231 = vector.broadcast %cst_99 : f32 to vector<16x16xf32>
    %232 = arith.mulf %230, %231 : vector<16x16xf32>
    %233 = arith.addf %232, %26 : vector<16x16xf32>
    %cst_100 = arith.constant dense<0xFF800000> : vector<16xf32>
    %234 = vector.multi_reduction <maximumf>, %233, %cst_100 [1] : vector<16x16xf32> to vector<16xf32>
    %235 = vector.shape_cast %234 : vector<16xf32> to vector<16x1xf32>
    %236 = vector.broadcast %235 : vector<16x1xf32> to vector<16x16xf32>
    %237 = arith.subf %233, %236 : vector<16x16xf32>
    %238 = math.exp %237 : vector<16x16xf32>
    %cst_101 = arith.constant dense<0.000000e+00> : vector<16xf32>
    %239 = vector.multi_reduction <add>, %238, %cst_101 [1] : vector<16x16xf32> to vector<16xf32>
    %240 = vector.shape_cast %239 : vector<16xf32> to vector<16x1xf32>
    %241 = tpu.reciprocal %240 {approx = true} : vector<16x1xf32> -> vector<16x1xf32>
    %242 = vector.broadcast %241 : vector<16x1xf32> to vector<16x16xf32>
    %243 = arith.mulf %238, %242 : vector<16x16xf32>
    %cst_102 = arith.constant dense<0.000000e+00> : vector<16x32xf32>
    %244 = tpu.matmul %243, %229, %cst_102 {dimension_numbers = #tpu.dot_dimension_numbers<[1], [0], [0], [1], [0, 0, 1, 1], [], []>} : vector<16x16xf32>, vector<16x32xf32>, vector<16x32xf32> -> vector<16x32xf32>
    %245 = arith.addf %226, %244 : vector<16x32xf32>
    %246 = vector.extract_strided_slice %206 {offsets = [0, 64], sizes = [16, 32], strides = [1, 1]} : vector<16x384xf32> to vector<16x32xf32>
    %247 = vector.extract_strided_slice %206 {offsets = [0, 192], sizes = [16, 32], strides = [1, 1]} : vector<16x384xf32> to vector<16x32xf32>
    %248 = vector.extract_strided_slice %206 {offsets = [0, 320], sizes = [16, 32], strides = [1, 1]} : vector<16x384xf32> to vector<16x32xf32>
    %cst_103 = arith.constant dense<0.000000e+00> : vector<16x16xf32>
    %249 = tpu.matmul %246, %247, %cst_103 {dimension_numbers = #tpu.dot_dimension_numbers<[1], [1], [0], [0], [0, 0, 1, 0], [], []>} : vector<16x32xf32>, vector<16x32xf32>, vector<16x16xf32> -> vector<16x16xf32>
    %cst_104 = arith.constant 0.176776692 : f32
    %250 = vector.broadcast %cst_104 : f32 to vector<16x16xf32>
    %251 = arith.mulf %249, %250 : vector<16x16xf32>
    %252 = arith.addf %251, %26 : vector<16x16xf32>
    %cst_105 = arith.constant dense<0xFF800000> : vector<16xf32>
    %253 = vector.multi_reduction <maximumf>, %252, %cst_105 [1] : vector<16x16xf32> to vector<16xf32>
    %254 = vector.shape_cast %253 : vector<16xf32> to vector<16x1xf32>
    %255 = vector.broadcast %254 : vector<16x1xf32> to vector<16x16xf32>
    %256 = arith.subf %252, %255 : vector<16x16xf32>
    %257 = math.exp %256 : vector<16x16xf32>
    %cst_106 = arith.constant dense<0.000000e+00> : vector<16xf32>
    %258 = vector.multi_reduction <add>, %257, %cst_106 [1] : vector<16x16xf32> to vector<16xf32>
    %259 = vector.shape_cast %258 : vector<16xf32> to vector<16x1xf32>
    %260 = tpu.reciprocal %259 {approx = true} : vector<16x1xf32> -> vector<16x1xf32>
    %261 = vector.broadcast %260 : vector<16x1xf32> to vector<16x16xf32>
    %262 = arith.mulf %257, %261 : vector<16x16xf32>
    %cst_107 = arith.constant dense<0.000000e+00> : vector<16x32xf32>
    %263 = tpu.matmul %262, %248, %cst_107 {dimension_numbers = #tpu.dot_dimension_numbers<[1], [0], [0], [1], [0, 0, 1, 1], [], []>} : vector<16x16xf32>, vector<16x32xf32>, vector<16x32xf32> -> vector<16x32xf32>
    %264 = arith.addf %245, %263 : vector<16x32xf32>
    %265 = vector.extract_strided_slice %206 {offsets = [0, 96], sizes = [16, 32], strides = [1, 1]} : vector<16x384xf32> to vector<16x32xf32>
    %266 = vector.extract_strided_slice %206 {offsets = [0, 224], sizes = [16, 32], strides = [1, 1]} : vector<16x384xf32> to vector<16x32xf32>
    %267 = vector.extract_strided_slice %206 {offsets = [0, 352], sizes = [16, 32], strides = [1, 1]} : vector<16x384xf32> to vector<16x32xf32>
    %cst_108 = arith.constant dense<0.000000e+00> : vector<16x16xf32>
    %268 = tpu.matmul %265, %266, %cst_108 {dimension_numbers = #tpu.dot_dimension_numbers<[1], [1], [0], [0], [0, 0, 1, 0], [], []>} : vector<16x32xf32>, vector<16x32xf32>, vector<16x16xf32> -> vector<16x16xf32>
    %cst_109 = arith.constant 0.176776692 : f32
    %269 = vector.broadcast %cst_109 : f32 to vector<16x16xf32>
    %270 = arith.mulf %268, %269 : vector<16x16xf32>
    %271 = arith.addf %270, %26 : vector<16x16xf32>
    %cst_110 = arith.constant dense<0xFF800000> : vector<16xf32>
    %272 = vector.multi_reduction <maximumf>, %271, %cst_110 [1] : vector<16x16xf32> to vector<16xf32>
    %273 = vector.shape_cast %272 : vector<16xf32> to vector<16x1xf32>
    %274 = vector.broadcast %273 : vector<16x1xf32> to vector<16x16xf32>
    %275 = arith.subf %271, %274 : vector<16x16xf32>
    %276 = math.exp %275 : vector<16x16xf32>
    %cst_111 = arith.constant dense<0.000000e+00> : vector<16xf32>
    %277 = vector.multi_reduction <add>, %276, %cst_111 [1] : vector<16x16xf32> to vector<16xf32>
    %278 = vector.shape_cast %277 : vector<16xf32> to vector<16x1xf32>
    %279 = tpu.reciprocal %278 {approx = true} : vector<16x1xf32> -> vector<16x1xf32>
    %280 = vector.broadcast %279 : vector<16x1xf32> to vector<16x16xf32>
    %281 = arith.mulf %276, %280 : vector<16x16xf32>
    %cst_112 = arith.constant dense<0.000000e+00> : vector<16x32xf32>
    %282 = tpu.matmul %281, %267, %cst_112 {dimension_numbers = #tpu.dot_dimension_numbers<[1], [0], [0], [1], [0, 0, 1, 1], [], []>} : vector<16x16xf32>, vector<16x32xf32>, vector<16x32xf32> -> vector<16x32xf32>
    %283 = arith.addf %264, %282 : vector<16x32xf32>
    %c1_113 = arith.constant 1 : index
    %c0_114 = arith.constant 0 : index
    %c0_115 = arith.constant 0 : index
    %284 = vector.load %arg4[%c1_113, %c0_114, %c0_115] : memref<4x32x32xf32, #tpu.memory_space<vmem>>, vector<1x32x32xf32>
    %285 = vector.shape_cast %284 : vector<1x32x32xf32> to vector<32x32xf32>
    %cst_116 = arith.constant dense<0.000000e+00> : vector<16x32xf32>
    %286 = tpu.matmul %283, %285, %cst_116 {dimension_numbers = #tpu.dot_dimension_numbers<[1], [0], [0], [1], [0, 0, 1, 1], [], []>} : vector<16x32xf32>, vector<32x32xf32>, vector<16x32xf32> -> vector<16x32xf32>
    %287 = arith.addf %179, %286 : vector<16x32xf32>
    %c1_117 = arith.constant 1 : index
    %c0_118 = arith.constant 0 : index
    %c0_119 = arith.constant 0 : index
    %288 = vector.load %arg5[%c1_117, %c0_118, %c0_119] : memref<4x1x32xf32, #tpu.memory_space<vmem>>, vector<1x1x32xf32>
    %289 = vector.shape_cast %288 : vector<1x1x32xf32> to vector<1x32xf32>
    %290 = vector.broadcast %289 : vector<1x32xf32> to vector<16x32xf32>
    %291 = arith.addf %287, %290 : vector<16x32xf32>
    %c1_120 = arith.constant 1 : index
    %c0_121 = arith.constant 0 : index
    %c0_122 = arith.constant 0 : index
    %292 = vector.load %arg8[%c1_120, %c0_121, %c0_122] : memref<4x1x32xf32, #tpu.memory_space<vmem>>, vector<1x1x32xf32>
    %293 = vector.shape_cast %292 : vector<1x1x32xf32> to vector<1x32xf32>
    %c1_123 = arith.constant 1 : index
    %c0_124 = arith.constant 0 : index
    %c0_125 = arith.constant 0 : index
    %294 = vector.load %arg9[%c1_123, %c0_124, %c0_125] : memref<4x1x32xf32, #tpu.memory_space<vmem>>, vector<1x1x32xf32>
    %295 = vector.shape_cast %294 : vector<1x1x32xf32> to vector<1x32xf32>
    %cst_126 = arith.constant dense<0.000000e+00> : vector<16xf32>
    %296 = vector.multi_reduction <add>, %291, %cst_126 [1] : vector<16x32xf32> to vector<16xf32>
    %297 = vector.shape_cast %296 : vector<16xf32> to vector<16x1xf32>
    %cst_127 = arith.constant 3.200000e+01 : f32
    %298 = vector.broadcast %cst_127 : f32 to vector<16x1xf32>
    %299 = arith.divf %297, %298 : vector<16x1xf32>
    %300 = vector.broadcast %299 : vector<16x1xf32> to vector<16x32xf32>
    %301 = arith.subf %291, %300 : vector<16x32xf32>
    %302 = arith.mulf %301, %301 : vector<16x32xf32>
    %cst_128 = arith.constant dense<0.000000e+00> : vector<16xf32>
    %303 = vector.multi_reduction <add>, %302, %cst_128 [1] : vector<16x32xf32> to vector<16xf32>
    %304 = vector.shape_cast %303 : vector<16xf32> to vector<16x1xf32>
    %cst_129 = arith.constant 3.200000e+01 : f32
    %305 = vector.broadcast %cst_129 : f32 to vector<16x1xf32>
    %306 = arith.divf %304, %305 : vector<16x1xf32>
    %cst_130 = arith.constant 9.99999974E-6 : f32
    %307 = vector.broadcast %cst_130 : f32 to vector<16x1xf32>
    %308 = arith.addf %306, %307 : vector<16x1xf32>
    %309 = math.rsqrt %308 : vector<16x1xf32>
    %310 = vector.broadcast %309 : vector<16x1xf32> to vector<16x32xf32>
    %311 = arith.mulf %301, %310 : vector<16x32xf32>
    %312 = vector.broadcast %293 : vector<1x32xf32> to vector<16x32xf32>
    %313 = arith.mulf %311, %312 : vector<16x32xf32>
    %314 = vector.broadcast %295 : vector<1x32xf32> to vector<16x32xf32>
    %315 = arith.addf %313, %314 : vector<16x32xf32>
    %c1_131 = arith.constant 1 : index
    %c0_132 = arith.constant 0 : index
    %c0_133 = arith.constant 0 : index
    %316 = vector.load %arg10[%c1_131, %c0_132, %c0_133] : memref<4x32x128xf32, #tpu.memory_space<vmem>>, vector<1x32x128xf32>
    %317 = vector.shape_cast %316 : vector<1x32x128xf32> to vector<32x128xf32>
    %cst_134 = arith.constant dense<0.000000e+00> : vector<16x128xf32>
    %318 = tpu.matmul %315, %317, %cst_134 {dimension_numbers = #tpu.dot_dimension_numbers<[1], [0], [0], [1], [0, 0, 1, 1], [], []>} : vector<16x32xf32>, vector<32x128xf32>, vector<16x128xf32> -> vector<16x128xf32>
    %c1_135 = arith.constant 1 : index
    %c0_136 = arith.constant 0 : index
    %c0_137 = arith.constant 0 : index
    %319 = vector.load %arg11[%c1_135, %c0_136, %c0_137] : memref<4x1x128xf32, #tpu.memory_space<vmem>>, vector<1x1x128xf32>
    %320 = vector.shape_cast %319 : vector<1x1x128xf32> to vector<1x128xf32>
    %321 = vector.broadcast %320 : vector<1x128xf32> to vector<16x128xf32>
    %322 = arith.addf %318, %321 : vector<16x128xf32>
    %cst_138 = arith.constant 0.000000e+00 : f32
    %323 = vector.broadcast %cst_138 : f32 to vector<16x128xf32>
    %324 = arith.maximumf %322, %323 : vector<16x128xf32>
    %c1_139 = arith.constant 1 : index
    %c0_140 = arith.constant 0 : index
    %c0_141 = arith.constant 0 : index
    %325 = vector.load %arg12[%c1_139, %c0_140, %c0_141] : memref<4x128x32xf32, #tpu.memory_space<vmem>>, vector<1x128x32xf32>
    %326 = vector.shape_cast %325 : vector<1x128x32xf32> to vector<128x32xf32>
    %cst_142 = arith.constant dense<0.000000e+00> : vector<16x32xf32>
    %327 = tpu.matmul %324, %326, %cst_142 {dimension_numbers = #tpu.dot_dimension_numbers<[1], [0], [0], [1], [0, 0, 1, 1], [], []>} : vector<16x128xf32>, vector<128x32xf32>, vector<16x32xf32> -> vector<16x32xf32>
    %328 = arith.addf %291, %327 : vector<16x32xf32>
    %c1_143 = arith.constant 1 : index
    %c0_144 = arith.constant 0 : index
    %c0_145 = arith.constant 0 : index
    %329 = vector.load %arg13[%c1_143, %c0_144, %c0_145] : memref<4x1x32xf32, #tpu.memory_space<vmem>>, vector<1x1x32xf32>
    %330 = vector.shape_cast %329 : vector<1x1x32xf32> to vector<1x32xf32>
    %331 = vector.broadcast %330 : vector<1x32xf32> to vector<16x32xf32>
    %332 = arith.addf %328, %331 : vector<16x32xf32>
    %c2 = arith.constant 2 : index
    %c0_146 = arith.constant 0 : index
    %c0_147 = arith.constant 0 : index
    %333 = vector.load %arg6[%c2, %c0_146, %c0_147] : memref<4x1x32xf32, #tpu.memory_space<vmem>>, vector<1x1x32xf32>
    %334 = vector.shape_cast %333 : vector<1x1x32xf32> to vector<1x32xf32>
    %c2_148 = arith.constant 2 : index
    %c0_149 = arith.constant 0 : index
    %c0_150 = arith.constant 0 : index
    %335 = vector.load %arg7[%c2_148, %c0_149, %c0_150] : memref<4x1x32xf32, #tpu.memory_space<vmem>>, vector<1x1x32xf32>
    %336 = vector.shape_cast %335 : vector<1x1x32xf32> to vector<1x32xf32>
    %cst_151 = arith.constant dense<0.000000e+00> : vector<16xf32>
    %337 = vector.multi_reduction <add>, %332, %cst_151 [1] : vector<16x32xf32> to vector<16xf32>
    %338 = vector.shape_cast %337 : vector<16xf32> to vector<16x1xf32>
    %cst_152 = arith.constant 3.200000e+01 : f32
    %339 = vector.broadcast %cst_152 : f32 to vector<16x1xf32>
    %340 = arith.divf %338, %339 : vector<16x1xf32>
    %341 = vector.broadcast %340 : vector<16x1xf32> to vector<16x32xf32>
    %342 = arith.subf %332, %341 : vector<16x32xf32>
    %343 = arith.mulf %342, %342 : vector<16x32xf32>
    %cst_153 = arith.constant dense<0.000000e+00> : vector<16xf32>
    %344 = vector.multi_reduction <add>, %343, %cst_153 [1] : vector<16x32xf32> to vector<16xf32>
    %345 = vector.shape_cast %344 : vector<16xf32> to vector<16x1xf32>
    %cst_154 = arith.constant 3.200000e+01 : f32
    %346 = vector.broadcast %cst_154 : f32 to vector<16x1xf32>
    %347 = arith.divf %345, %346 : vector<16x1xf32>
    %cst_155 = arith.constant 9.99999974E-6 : f32
    %348 = vector.broadcast %cst_155 : f32 to vector<16x1xf32>
    %349 = arith.addf %347, %348 : vector<16x1xf32>
    %350 = math.rsqrt %349 : vector<16x1xf32>
    %351 = vector.broadcast %350 : vector<16x1xf32> to vector<16x32xf32>
    %352 = arith.mulf %342, %351 : vector<16x32xf32>
    %353 = vector.broadcast %334 : vector<1x32xf32> to vector<16x32xf32>
    %354 = arith.mulf %352, %353 : vector<16x32xf32>
    %355 = vector.broadcast %336 : vector<1x32xf32> to vector<16x32xf32>
    %356 = arith.addf %354, %355 : vector<16x32xf32>
    %c2_156 = arith.constant 2 : index
    %c0_157 = arith.constant 0 : index
    %c0_158 = arith.constant 0 : index
    %357 = vector.load %arg3[%c2_156, %c0_157, %c0_158] : memref<4x32x384xf32, #tpu.memory_space<vmem>>, vector<1x32x384xf32>
    %358 = vector.shape_cast %357 : vector<1x32x384xf32> to vector<32x384xf32>
    %cst_159 = arith.constant dense<0.000000e+00> : vector<16x384xf32>
    %359 = tpu.matmul %356, %358, %cst_159 {dimension_numbers = #tpu.dot_dimension_numbers<[1], [0], [0], [1], [0, 0, 1, 1], [], []>} : vector<16x32xf32>, vector<32x384xf32>, vector<16x384xf32> -> vector<16x384xf32>
    %cst_160 = arith.constant 0.000000e+00 : f32
    %360 = vector.broadcast %cst_160 : f32 to vector<16x32xf32>
    %361 = vector.extract_strided_slice %359 {offsets = [0, 0], sizes = [16, 32], strides = [1, 1]} : vector<16x384xf32> to vector<16x32xf32>
    %362 = vector.extract_strided_slice %359 {offsets = [0, 128], sizes = [16, 32], strides = [1, 1]} : vector<16x384xf32> to vector<16x32xf32>
    %363 = vector.extract_strided_slice %359 {offsets = [0, 256], sizes = [16, 32], strides = [1, 1]} : vector<16x384xf32> to vector<16x32xf32>
    %cst_161 = arith.constant dense<0.000000e+00> : vector<16x16xf32>
    %364 = tpu.matmul %361, %362, %cst_161 {dimension_numbers = #tpu.dot_dimension_numbers<[1], [1], [0], [0], [0, 0, 1, 0], [], []>} : vector<16x32xf32>, vector<16x32xf32>, vector<16x16xf32> -> vector<16x16xf32>
    %cst_162 = arith.constant 0.176776692 : f32
    %365 = vector.broadcast %cst_162 : f32 to vector<16x16xf32>
    %366 = arith.mulf %364, %365 : vector<16x16xf32>
    %367 = arith.addf %366, %26 : vector<16x16xf32>
    %cst_163 = arith.constant dense<0xFF800000> : vector<16xf32>
    %368 = vector.multi_reduction <maximumf>, %367, %cst_163 [1] : vector<16x16xf32> to vector<16xf32>
    %369 = vector.shape_cast %368 : vector<16xf32> to vector<16x1xf32>
    %370 = vector.broadcast %369 : vector<16x1xf32> to vector<16x16xf32>
    %371 = arith.subf %367, %370 : vector<16x16xf32>
    %372 = math.exp %371 : vector<16x16xf32>
    %cst_164 = arith.constant dense<0.000000e+00> : vector<16xf32>
    %373 = vector.multi_reduction <add>, %372, %cst_164 [1] : vector<16x16xf32> to vector<16xf32>
    %374 = vector.shape_cast %373 : vector<16xf32> to vector<16x1xf32>
    %375 = tpu.reciprocal %374 {approx = true} : vector<16x1xf32> -> vector<16x1xf32>
    %376 = vector.broadcast %375 : vector<16x1xf32> to vector<16x16xf32>
    %377 = arith.mulf %372, %376 : vector<16x16xf32>
    %cst_165 = arith.constant dense<0.000000e+00> : vector<16x32xf32>
    %378 = tpu.matmul %377, %363, %cst_165 {dimension_numbers = #tpu.dot_dimension_numbers<[1], [0], [0], [1], [0, 0, 1, 1], [], []>} : vector<16x16xf32>, vector<16x32xf32>, vector<16x32xf32> -> vector<16x32xf32>
    %379 = arith.addf %360, %378 : vector<16x32xf32>
    %380 = vector.extract_strided_slice %359 {offsets = [0, 32], sizes = [16, 32], strides = [1, 1]} : vector<16x384xf32> to vector<16x32xf32>
    %381 = vector.extract_strided_slice %359 {offsets = [0, 160], sizes = [16, 32], strides = [1, 1]} : vector<16x384xf32> to vector<16x32xf32>
    %382 = vector.extract_strided_slice %359 {offsets = [0, 288], sizes = [16, 32], strides = [1, 1]} : vector<16x384xf32> to vector<16x32xf32>
    %cst_166 = arith.constant dense<0.000000e+00> : vector<16x16xf32>
    %383 = tpu.matmul %380, %381, %cst_166 {dimension_numbers = #tpu.dot_dimension_numbers<[1], [1], [0], [0], [0, 0, 1, 0], [], []>} : vector<16x32xf32>, vector<16x32xf32>, vector<16x16xf32> -> vector<16x16xf32>
    %cst_167 = arith.constant 0.176776692 : f32
    %384 = vector.broadcast %cst_167 : f32 to vector<16x16xf32>
    %385 = arith.mulf %383, %384 : vector<16x16xf32>
    %386 = arith.addf %385, %26 : vector<16x16xf32>
    %cst_168 = arith.constant dense<0xFF800000> : vector<16xf32>
    %387 = vector.multi_reduction <maximumf>, %386, %cst_168 [1] : vector<16x16xf32> to vector<16xf32>
    %388 = vector.shape_cast %387 : vector<16xf32> to vector<16x1xf32>
    %389 = vector.broadcast %388 : vector<16x1xf32> to vector<16x16xf32>
    %390 = arith.subf %386, %389 : vector<16x16xf32>
    %391 = math.exp %390 : vector<16x16xf32>
    %cst_169 = arith.constant dense<0.000000e+00> : vector<16xf32>
    %392 = vector.multi_reduction <add>, %391, %cst_169 [1] : vector<16x16xf32> to vector<16xf32>
    %393 = vector.shape_cast %392 : vector<16xf32> to vector<16x1xf32>
    %394 = tpu.reciprocal %393 {approx = true} : vector<16x1xf32> -> vector<16x1xf32>
    %395 = vector.broadcast %394 : vector<16x1xf32> to vector<16x16xf32>
    %396 = arith.mulf %391, %395 : vector<16x16xf32>
    %cst_170 = arith.constant dense<0.000000e+00> : vector<16x32xf32>
    %397 = tpu.matmul %396, %382, %cst_170 {dimension_numbers = #tpu.dot_dimension_numbers<[1], [0], [0], [1], [0, 0, 1, 1], [], []>} : vector<16x16xf32>, vector<16x32xf32>, vector<16x32xf32> -> vector<16x32xf32>
    %398 = arith.addf %379, %397 : vector<16x32xf32>
    %399 = vector.extract_strided_slice %359 {offsets = [0, 64], sizes = [16, 32], strides = [1, 1]} : vector<16x384xf32> to vector<16x32xf32>
    %400 = vector.extract_strided_slice %359 {offsets = [0, 192], sizes = [16, 32], strides = [1, 1]} : vector<16x384xf32> to vector<16x32xf32>
    %401 = vector.extract_strided_slice %359 {offsets = [0, 320], sizes = [16, 32], strides = [1, 1]} : vector<16x384xf32> to vector<16x32xf32>
    %cst_171 = arith.constant dense<0.000000e+00> : vector<16x16xf32>
    %402 = tpu.matmul %399, %400, %cst_171 {dimension_numbers = #tpu.dot_dimension_numbers<[1], [1], [0], [0], [0, 0, 1, 0], [], []>} : vector<16x32xf32>, vector<16x32xf32>, vector<16x16xf32> -> vector<16x16xf32>
    %cst_172 = arith.constant 0.176776692 : f32
    %403 = vector.broadcast %cst_172 : f32 to vector<16x16xf32>
    %404 = arith.mulf %402, %403 : vector<16x16xf32>
    %405 = arith.addf %404, %26 : vector<16x16xf32>
    %cst_173 = arith.constant dense<0xFF800000> : vector<16xf32>
    %406 = vector.multi_reduction <maximumf>, %405, %cst_173 [1] : vector<16x16xf32> to vector<16xf32>
    %407 = vector.shape_cast %406 : vector<16xf32> to vector<16x1xf32>
    %408 = vector.broadcast %407 : vector<16x1xf32> to vector<16x16xf32>
    %409 = arith.subf %405, %408 : vector<16x16xf32>
    %410 = math.exp %409 : vector<16x16xf32>
    %cst_174 = arith.constant dense<0.000000e+00> : vector<16xf32>
    %411 = vector.multi_reduction <add>, %410, %cst_174 [1] : vector<16x16xf32> to vector<16xf32>
    %412 = vector.shape_cast %411 : vector<16xf32> to vector<16x1xf32>
    %413 = tpu.reciprocal %412 {approx = true} : vector<16x1xf32> -> vector<16x1xf32>
    %414 = vector.broadcast %413 : vector<16x1xf32> to vector<16x16xf32>
    %415 = arith.mulf %410, %414 : vector<16x16xf32>
    %cst_175 = arith.constant dense<0.000000e+00> : vector<16x32xf32>
    %416 = tpu.matmul %415, %401, %cst_175 {dimension_numbers = #tpu.dot_dimension_numbers<[1], [0], [0], [1], [0, 0, 1, 1], [], []>} : vector<16x16xf32>, vector<16x32xf32>, vector<16x32xf32> -> vector<16x32xf32>
    %417 = arith.addf %398, %416 : vector<16x32xf32>
    %418 = vector.extract_strided_slice %359 {offsets = [0, 96], sizes = [16, 32], strides = [1, 1]} : vector<16x384xf32> to vector<16x32xf32>
    %419 = vector.extract_strided_slice %359 {offsets = [0, 224], sizes = [16, 32], strides = [1, 1]} : vector<16x384xf32> to vector<16x32xf32>
    %420 = vector.extract_strided_slice %359 {offsets = [0, 352], sizes = [16, 32], strides = [1, 1]} : vector<16x384xf32> to vector<16x32xf32>
    %cst_176 = arith.constant dense<0.000000e+00> : vector<16x16xf32>
    %421 = tpu.matmul %418, %419, %cst_176 {dimension_numbers = #tpu.dot_dimension_numbers<[1], [1], [0], [0], [0, 0, 1, 0], [], []>} : vector<16x32xf32>, vector<16x32xf32>, vector<16x16xf32> -> vector<16x16xf32>
    %cst_177 = arith.constant 0.176776692 : f32
    %422 = vector.broadcast %cst_177 : f32 to vector<16x16xf32>
    %423 = arith.mulf %421, %422 : vector<16x16xf32>
    %424 = arith.addf %423, %26 : vector<16x16xf32>
    %cst_178 = arith.constant dense<0xFF800000> : vector<16xf32>
    %425 = vector.multi_reduction <maximumf>, %424, %cst_178 [1] : vector<16x16xf32> to vector<16xf32>
    %426 = vector.shape_cast %425 : vector<16xf32> to vector<16x1xf32>
    %427 = vector.broadcast %426 : vector<16x1xf32> to vector<16x16xf32>
    %428 = arith.subf %424, %427 : vector<16x16xf32>
    %429 = math.exp %428 : vector<16x16xf32>
    %cst_179 = arith.constant dense<0.000000e+00> : vector<16xf32>
    %430 = vector.multi_reduction <add>, %429, %cst_179 [1] : vector<16x16xf32> to vector<16xf32>
    %431 = vector.shape_cast %430 : vector<16xf32> to vector<16x1xf32>
    %432 = tpu.reciprocal %431 {approx = true} : vector<16x1xf32> -> vector<16x1xf32>
    %433 = vector.broadcast %432 : vector<16x1xf32> to vector<16x16xf32>
    %434 = arith.mulf %429, %433 : vector<16x16xf32>
    %cst_180 = arith.constant dense<0.000000e+00> : vector<16x32xf32>
    %435 = tpu.matmul %434, %420, %cst_180 {dimension_numbers = #tpu.dot_dimension_numbers<[1], [0], [0], [1], [0, 0, 1, 1], [], []>} : vector<16x16xf32>, vector<16x32xf32>, vector<16x32xf32> -> vector<16x32xf32>
    %436 = arith.addf %417, %435 : vector<16x32xf32>
    %c2_181 = arith.constant 2 : index
    %c0_182 = arith.constant 0 : index
    %c0_183 = arith.constant 0 : index
    %437 = vector.load %arg4[%c2_181, %c0_182, %c0_183] : memref<4x32x32xf32, #tpu.memory_space<vmem>>, vector<1x32x32xf32>
    %438 = vector.shape_cast %437 : vector<1x32x32xf32> to vector<32x32xf32>
    %cst_184 = arith.constant dense<0.000000e+00> : vector<16x32xf32>
    %439 = tpu.matmul %436, %438, %cst_184 {dimension_numbers = #tpu.dot_dimension_numbers<[1], [0], [0], [1], [0, 0, 1, 1], [], []>} : vector<16x32xf32>, vector<32x32xf32>, vector<16x32xf32> -> vector<16x32xf32>
    %440 = arith.addf %332, %439 : vector<16x32xf32>
    %c2_185 = arith.constant 2 : index
    %c0_186 = arith.constant 0 : index
    %c0_187 = arith.constant 0 : index
    %441 = vector.load %arg5[%c2_185, %c0_186, %c0_187] : memref<4x1x32xf32, #tpu.memory_space<vmem>>, vector<1x1x32xf32>
    %442 = vector.shape_cast %441 : vector<1x1x32xf32> to vector<1x32xf32>
    %443 = vector.broadcast %442 : vector<1x32xf32> to vector<16x32xf32>
    %444 = arith.addf %440, %443 : vector<16x32xf32>
    %c2_188 = arith.constant 2 : index
    %c0_189 = arith.constant 0 : index
    %c0_190 = arith.constant 0 : index
    %445 = vector.load %arg8[%c2_188, %c0_189, %c0_190] : memref<4x1x32xf32, #tpu.memory_space<vmem>>, vector<1x1x32xf32>
    %446 = vector.shape_cast %445 : vector<1x1x32xf32> to vector<1x32xf32>
    %c2_191 = arith.constant 2 : index
    %c0_192 = arith.constant 0 : index
    %c0_193 = arith.constant 0 : index
    %447 = vector.load %arg9[%c2_191, %c0_192, %c0_193] : memref<4x1x32xf32, #tpu.memory_space<vmem>>, vector<1x1x32xf32>
    %448 = vector.shape_cast %447 : vector<1x1x32xf32> to vector<1x32xf32>
    %cst_194 = arith.constant dense<0.000000e+00> : vector<16xf32>
    %449 = vector.multi_reduction <add>, %444, %cst_194 [1] : vector<16x32xf32> to vector<16xf32>
    %450 = vector.shape_cast %449 : vector<16xf32> to vector<16x1xf32>
    %cst_195 = arith.constant 3.200000e+01 : f32
    %451 = vector.broadcast %cst_195 : f32 to vector<16x1xf32>
    %452 = arith.divf %450, %451 : vector<16x1xf32>
    %453 = vector.broadcast %452 : vector<16x1xf32> to vector<16x32xf32>
    %454 = arith.subf %444, %453 : vector<16x32xf32>
    %455 = arith.mulf %454, %454 : vector<16x32xf32>
    %cst_196 = arith.constant dense<0.000000e+00> : vector<16xf32>
    %456 = vector.multi_reduction <add>, %455, %cst_196 [1] : vector<16x32xf32> to vector<16xf32>
    %457 = vector.shape_cast %456 : vector<16xf32> to vector<16x1xf32>
    %cst_197 = arith.constant 3.200000e+01 : f32
    %458 = vector.broadcast %cst_197 : f32 to vector<16x1xf32>
    %459 = arith.divf %457, %458 : vector<16x1xf32>
    %cst_198 = arith.constant 9.99999974E-6 : f32
    %460 = vector.broadcast %cst_198 : f32 to vector<16x1xf32>
    %461 = arith.addf %459, %460 : vector<16x1xf32>
    %462 = math.rsqrt %461 : vector<16x1xf32>
    %463 = vector.broadcast %462 : vector<16x1xf32> to vector<16x32xf32>
    %464 = arith.mulf %454, %463 : vector<16x32xf32>
    %465 = vector.broadcast %446 : vector<1x32xf32> to vector<16x32xf32>
    %466 = arith.mulf %464, %465 : vector<16x32xf32>
    %467 = vector.broadcast %448 : vector<1x32xf32> to vector<16x32xf32>
    %468 = arith.addf %466, %467 : vector<16x32xf32>
    %c2_199 = arith.constant 2 : index
    %c0_200 = arith.constant 0 : index
    %c0_201 = arith.constant 0 : index
    %469 = vector.load %arg10[%c2_199, %c0_200, %c0_201] : memref<4x32x128xf32, #tpu.memory_space<vmem>>, vector<1x32x128xf32>
    %470 = vector.shape_cast %469 : vector<1x32x128xf32> to vector<32x128xf32>
    %cst_202 = arith.constant dense<0.000000e+00> : vector<16x128xf32>
    %471 = tpu.matmul %468, %470, %cst_202 {dimension_numbers = #tpu.dot_dimension_numbers<[1], [0], [0], [1], [0, 0, 1, 1], [], []>} : vector<16x32xf32>, vector<32x128xf32>, vector<16x128xf32> -> vector<16x128xf32>
    %c2_203 = arith.constant 2 : index
    %c0_204 = arith.constant 0 : index
    %c0_205 = arith.constant 0 : index
    %472 = vector.load %arg11[%c2_203, %c0_204, %c0_205] : memref<4x1x128xf32, #tpu.memory_space<vmem>>, vector<1x1x128xf32>
    %473 = vector.shape_cast %472 : vector<1x1x128xf32> to vector<1x128xf32>
    %474 = vector.broadcast %473 : vector<1x128xf32> to vector<16x128xf32>
    %475 = arith.addf %471, %474 : vector<16x128xf32>
    %cst_206 = arith.constant 0.000000e+00 : f32
    %476 = vector.broadcast %cst_206 : f32 to vector<16x128xf32>
    %477 = arith.maximumf %475, %476 : vector<16x128xf32>
    %c2_207 = arith.constant 2 : index
    %c0_208 = arith.constant 0 : index
    %c0_209 = arith.constant 0 : index
    %478 = vector.load %arg12[%c2_207, %c0_208, %c0_209] : memref<4x128x32xf32, #tpu.memory_space<vmem>>, vector<1x128x32xf32>
    %479 = vector.shape_cast %478 : vector<1x128x32xf32> to vector<128x32xf32>
    %cst_210 = arith.constant dense<0.000000e+00> : vector<16x32xf32>
    %480 = tpu.matmul %477, %479, %cst_210 {dimension_numbers = #tpu.dot_dimension_numbers<[1], [0], [0], [1], [0, 0, 1, 1], [], []>} : vector<16x128xf32>, vector<128x32xf32>, vector<16x32xf32> -> vector<16x32xf32>
    %481 = arith.addf %444, %480 : vector<16x32xf32>
    %c2_211 = arith.constant 2 : index
    %c0_212 = arith.constant 0 : index
    %c0_213 = arith.constant 0 : index
    %482 = vector.load %arg13[%c2_211, %c0_212, %c0_213] : memref<4x1x32xf32, #tpu.memory_space<vmem>>, vector<1x1x32xf32>
    %483 = vector.shape_cast %482 : vector<1x1x32xf32> to vector<1x32xf32>
    %484 = vector.broadcast %483 : vector<1x32xf32> to vector<16x32xf32>
    %485 = arith.addf %481, %484 : vector<16x32xf32>
    %c3 = arith.constant 3 : index
    %c0_214 = arith.constant 0 : index
    %c0_215 = arith.constant 0 : index
    %486 = vector.load %arg6[%c3, %c0_214, %c0_215] : memref<4x1x32xf32, #tpu.memory_space<vmem>>, vector<1x1x32xf32>
    %487 = vector.shape_cast %486 : vector<1x1x32xf32> to vector<1x32xf32>
    %c3_216 = arith.constant 3 : index
    %c0_217 = arith.constant 0 : index
    %c0_218 = arith.constant 0 : index
    %488 = vector.load %arg7[%c3_216, %c0_217, %c0_218] : memref<4x1x32xf32, #tpu.memory_space<vmem>>, vector<1x1x32xf32>
    %489 = vector.shape_cast %488 : vector<1x1x32xf32> to vector<1x32xf32>
    %cst_219 = arith.constant dense<0.000000e+00> : vector<16xf32>
    %490 = vector.multi_reduction <add>, %485, %cst_219 [1] : vector<16x32xf32> to vector<16xf32>
    %491 = vector.shape_cast %490 : vector<16xf32> to vector<16x1xf32>
    %cst_220 = arith.constant 3.200000e+01 : f32
    %492 = vector.broadcast %cst_220 : f32 to vector<16x1xf32>
    %493 = arith.divf %491, %492 : vector<16x1xf32>
    %494 = vector.broadcast %493 : vector<16x1xf32> to vector<16x32xf32>
    %495 = arith.subf %485, %494 : vector<16x32xf32>
    %496 = arith.mulf %495, %495 : vector<16x32xf32>
    %cst_221 = arith.constant dense<0.000000e+00> : vector<16xf32>
    %497 = vector.multi_reduction <add>, %496, %cst_221 [1] : vector<16x32xf32> to vector<16xf32>
    %498 = vector.shape_cast %497 : vector<16xf32> to vector<16x1xf32>
    %cst_222 = arith.constant 3.200000e+01 : f32
    %499 = vector.broadcast %cst_222 : f32 to vector<16x1xf32>
    %500 = arith.divf %498, %499 : vector<16x1xf32>
    %cst_223 = arith.constant 9.99999974E-6 : f32
    %501 = vector.broadcast %cst_223 : f32 to vector<16x1xf32>
    %502 = arith.addf %500, %501 : vector<16x1xf32>
    %503 = math.rsqrt %502 : vector<16x1xf32>
    %504 = vector.broadcast %503 : vector<16x1xf32> to vector<16x32xf32>
    %505 = arith.mulf %495, %504 : vector<16x32xf32>
    %506 = vector.broadcast %487 : vector<1x32xf32> to vector<16x32xf32>
    %507 = arith.mulf %505, %506 : vector<16x32xf32>
    %508 = vector.broadcast %489 : vector<1x32xf32> to vector<16x32xf32>
    %509 = arith.addf %507, %508 : vector<16x32xf32>
    %c3_224 = arith.constant 3 : index
    %c0_225 = arith.constant 0 : index
    %c0_226 = arith.constant 0 : index
    %510 = vector.load %arg3[%c3_224, %c0_225, %c0_226] : memref<4x32x384xf32, #tpu.memory_space<vmem>>, vector<1x32x384xf32>
    %511 = vector.shape_cast %510 : vector<1x32x384xf32> to vector<32x384xf32>
    %cst_227 = arith.constant dense<0.000000e+00> : vector<16x384xf32>
    %512 = tpu.matmul %509, %511, %cst_227 {dimension_numbers = #tpu.dot_dimension_numbers<[1], [0], [0], [1], [0, 0, 1, 1], [], []>} : vector<16x32xf32>, vector<32x384xf32>, vector<16x384xf32> -> vector<16x384xf32>
    %cst_228 = arith.constant 0.000000e+00 : f32
    %513 = vector.broadcast %cst_228 : f32 to vector<16x32xf32>
    %514 = vector.extract_strided_slice %512 {offsets = [0, 0], sizes = [16, 32], strides = [1, 1]} : vector<16x384xf32> to vector<16x32xf32>
    %515 = vector.extract_strided_slice %512 {offsets = [0, 128], sizes = [16, 32], strides = [1, 1]} : vector<16x384xf32> to vector<16x32xf32>
    %516 = vector.extract_strided_slice %512 {offsets = [0, 256], sizes = [16, 32], strides = [1, 1]} : vector<16x384xf32> to vector<16x32xf32>
    %cst_229 = arith.constant dense<0.000000e+00> : vector<16x16xf32>
    %517 = tpu.matmul %514, %515, %cst_229 {dimension_numbers = #tpu.dot_dimension_numbers<[1], [1], [0], [0], [0, 0, 1, 0], [], []>} : vector<16x32xf32>, vector<16x32xf32>, vector<16x16xf32> -> vector<16x16xf32>
    %cst_230 = arith.constant 0.176776692 : f32
    %518 = vector.broadcast %cst_230 : f32 to vector<16x16xf32>
    %519 = arith.mulf %517, %518 : vector<16x16xf32>
    %520 = arith.addf %519, %26 : vector<16x16xf32>
    %cst_231 = arith.constant dense<0xFF800000> : vector<16xf32>
    %521 = vector.multi_reduction <maximumf>, %520, %cst_231 [1] : vector<16x16xf32> to vector<16xf32>
    %522 = vector.shape_cast %521 : vector<16xf32> to vector<16x1xf32>
    %523 = vector.broadcast %522 : vector<16x1xf32> to vector<16x16xf32>
    %524 = arith.subf %520, %523 : vector<16x16xf32>
    %525 = math.exp %524 : vector<16x16xf32>
    %cst_232 = arith.constant dense<0.000000e+00> : vector<16xf32>
    %526 = vector.multi_reduction <add>, %525, %cst_232 [1] : vector<16x16xf32> to vector<16xf32>
    %527 = vector.shape_cast %526 : vector<16xf32> to vector<16x1xf32>
    %528 = tpu.reciprocal %527 {approx = true} : vector<16x1xf32> -> vector<16x1xf32>
    %529 = vector.broadcast %528 : vector<16x1xf32> to vector<16x16xf32>
    %530 = arith.mulf %525, %529 : vector<16x16xf32>
    %cst_233 = arith.constant dense<0.000000e+00> : vector<16x32xf32>
    %531 = tpu.matmul %530, %516, %cst_233 {dimension_numbers = #tpu.dot_dimension_numbers<[1], [0], [0], [1], [0, 0, 1, 1], [], []>} : vector<16x16xf32>, vector<16x32xf32>, vector<16x32xf32> -> vector<16x32xf32>
    %532 = arith.addf %513, %531 : vector<16x32xf32>
    %533 = vector.extract_strided_slice %512 {offsets = [0, 32], sizes = [16, 32], strides = [1, 1]} : vector<16x384xf32> to vector<16x32xf32>
    %534 = vector.extract_strided_slice %512 {offsets = [0, 160], sizes = [16, 32], strides = [1, 1]} : vector<16x384xf32> to vector<16x32xf32>
    %535 = vector.extract_strided_slice %512 {offsets = [0, 288], sizes = [16, 32], strides = [1, 1]} : vector<16x384xf32> to vector<16x32xf32>
    %cst_234 = arith.constant dense<0.000000e+00> : vector<16x16xf32>
    %536 = tpu.matmul %533, %534, %cst_234 {dimension_numbers = #tpu.dot_dimension_numbers<[1], [1], [0], [0], [0, 0, 1, 0], [], []>} : vector<16x32xf32>, vector<16x32xf32>, vector<16x16xf32> -> vector<16x16xf32>
    %cst_235 = arith.constant 0.176776692 : f32
    %537 = vector.broadcast %cst_235 : f32 to vector<16x16xf32>
    %538 = arith.mulf %536, %537 : vector<16x16xf32>
    %539 = arith.addf %538, %26 : vector<16x16xf32>
    %cst_236 = arith.constant dense<0xFF800000> : vector<16xf32>
    %540 = vector.multi_reduction <maximumf>, %539, %cst_236 [1] : vector<16x16xf32> to vector<16xf32>
    %541 = vector.shape_cast %540 : vector<16xf32> to vector<16x1xf32>
    %542 = vector.broadcast %541 : vector<16x1xf32> to vector<16x16xf32>
    %543 = arith.subf %539, %542 : vector<16x16xf32>
    %544 = math.exp %543 : vector<16x16xf32>
    %cst_237 = arith.constant dense<0.000000e+00> : vector<16xf32>
    %545 = vector.multi_reduction <add>, %544, %cst_237 [1] : vector<16x16xf32> to vector<16xf32>
    %546 = vector.shape_cast %545 : vector<16xf32> to vector<16x1xf32>
    %547 = tpu.reciprocal %546 {approx = true} : vector<16x1xf32> -> vector<16x1xf32>
    %548 = vector.broadcast %547 : vector<16x1xf32> to vector<16x16xf32>
    %549 = arith.mulf %544, %548 : vector<16x16xf32>
    %cst_238 = arith.constant dense<0.000000e+00> : vector<16x32xf32>
    %550 = tpu.matmul %549, %535, %cst_238 {dimension_numbers = #tpu.dot_dimension_numbers<[1], [0], [0], [1], [0, 0, 1, 1], [], []>} : vector<16x16xf32>, vector<16x32xf32>, vector<16x32xf32> -> vector<16x32xf32>
    %551 = arith.addf %532, %550 : vector<16x32xf32>
    %552 = vector.extract_strided_slice %512 {offsets = [0, 64], sizes = [16, 32], strides = [1, 1]} : vector<16x384xf32> to vector<16x32xf32>
    %553 = vector.extract_strided_slice %512 {offsets = [0, 192], sizes = [16, 32], strides = [1, 1]} : vector<16x384xf32> to vector<16x32xf32>
    %554 = vector.extract_strided_slice %512 {offsets = [0, 320], sizes = [16, 32], strides = [1, 1]} : vector<16x384xf32> to vector<16x32xf32>
    %cst_239 = arith.constant dense<0.000000e+00> : vector<16x16xf32>
    %555 = tpu.matmul %552, %553, %cst_239 {dimension_numbers = #tpu.dot_dimension_numbers<[1], [1], [0], [0], [0, 0, 1, 0], [], []>} : vector<16x32xf32>, vector<16x32xf32>, vector<16x16xf32> -> vector<16x16xf32>
    %cst_240 = arith.constant 0.176776692 : f32
    %556 = vector.broadcast %cst_240 : f32 to vector<16x16xf32>
    %557 = arith.mulf %555, %556 : vector<16x16xf32>
    %558 = arith.addf %557, %26 : vector<16x16xf32>
    %cst_241 = arith.constant dense<0xFF800000> : vector<16xf32>
    %559 = vector.multi_reduction <maximumf>, %558, %cst_241 [1] : vector<16x16xf32> to vector<16xf32>
    %560 = vector.shape_cast %559 : vector<16xf32> to vector<16x1xf32>
    %561 = vector.broadcast %560 : vector<16x1xf32> to vector<16x16xf32>
    %562 = arith.subf %558, %561 : vector<16x16xf32>
    %563 = math.exp %562 : vector<16x16xf32>
    %cst_242 = arith.constant dense<0.000000e+00> : vector<16xf32>
    %564 = vector.multi_reduction <add>, %563, %cst_242 [1] : vector<16x16xf32> to vector<16xf32>
    %565 = vector.shape_cast %564 : vector<16xf32> to vector<16x1xf32>
    %566 = tpu.reciprocal %565 {approx = true} : vector<16x1xf32> -> vector<16x1xf32>
    %567 = vector.broadcast %566 : vector<16x1xf32> to vector<16x16xf32>
    %568 = arith.mulf %563, %567 : vector<16x16xf32>
    %cst_243 = arith.constant dense<0.000000e+00> : vector<16x32xf32>
    %569 = tpu.matmul %568, %554, %cst_243 {dimension_numbers = #tpu.dot_dimension_numbers<[1], [0], [0], [1], [0, 0, 1, 1], [], []>} : vector<16x16xf32>, vector<16x32xf32>, vector<16x32xf32> -> vector<16x32xf32>
    %570 = arith.addf %551, %569 : vector<16x32xf32>
    %571 = vector.extract_strided_slice %512 {offsets = [0, 96], sizes = [16, 32], strides = [1, 1]} : vector<16x384xf32> to vector<16x32xf32>
    %572 = vector.extract_strided_slice %512 {offsets = [0, 224], sizes = [16, 32], strides = [1, 1]} : vector<16x384xf32> to vector<16x32xf32>
    %573 = vector.extract_strided_slice %512 {offsets = [0, 352], sizes = [16, 32], strides = [1, 1]} : vector<16x384xf32> to vector<16x32xf32>
    %cst_244 = arith.constant dense<0.000000e+00> : vector<16x16xf32>
    %574 = tpu.matmul %571, %572, %cst_244 {dimension_numbers = #tpu.dot_dimension_numbers<[1], [1], [0], [0], [0, 0, 1, 0], [], []>} : vector<16x32xf32>, vector<16x32xf32>, vector<16x16xf32> -> vector<16x16xf32>
    %cst_245 = arith.constant 0.176776692 : f32
    %575 = vector.broadcast %cst_245 : f32 to vector<16x16xf32>
    %576 = arith.mulf %574, %575 : vector<16x16xf32>
    %577 = arith.addf %576, %26 : vector<16x16xf32>
    %cst_246 = arith.constant dense<0xFF800000> : vector<16xf32>
    %578 = vector.multi_reduction <maximumf>, %577, %cst_246 [1] : vector<16x16xf32> to vector<16xf32>
    %579 = vector.shape_cast %578 : vector<16xf32> to vector<16x1xf32>
    %580 = vector.broadcast %579 : vector<16x1xf32> to vector<16x16xf32>
    %581 = arith.subf %577, %580 : vector<16x16xf32>
    %582 = math.exp %581 : vector<16x16xf32>
    %cst_247 = arith.constant dense<0.000000e+00> : vector<16xf32>
    %583 = vector.multi_reduction <add>, %582, %cst_247 [1] : vector<16x16xf32> to vector<16xf32>
    %584 = vector.shape_cast %583 : vector<16xf32> to vector<16x1xf32>
    %585 = tpu.reciprocal %584 {approx = true} : vector<16x1xf32> -> vector<16x1xf32>
    %586 = vector.broadcast %585 : vector<16x1xf32> to vector<16x16xf32>
    %587 = arith.mulf %582, %586 : vector<16x16xf32>
    %cst_248 = arith.constant dense<0.000000e+00> : vector<16x32xf32>
    %588 = tpu.matmul %587, %573, %cst_248 {dimension_numbers = #tpu.dot_dimension_numbers<[1], [0], [0], [1], [0, 0, 1, 1], [], []>} : vector<16x16xf32>, vector<16x32xf32>, vector<16x32xf32> -> vector<16x32xf32>
    %589 = arith.addf %570, %588 : vector<16x32xf32>
    %c3_249 = arith.constant 3 : index
    %c0_250 = arith.constant 0 : index
    %c0_251 = arith.constant 0 : index
    %590 = vector.load %arg4[%c3_249, %c0_250, %c0_251] : memref<4x32x32xf32, #tpu.memory_space<vmem>>, vector<1x32x32xf32>
    %591 = vector.shape_cast %590 : vector<1x32x32xf32> to vector<32x32xf32>
    %cst_252 = arith.constant dense<0.000000e+00> : vector<16x32xf32>
    %592 = tpu.matmul %589, %591, %cst_252 {dimension_numbers = #tpu.dot_dimension_numbers<[1], [0], [0], [1], [0, 0, 1, 1], [], []>} : vector<16x32xf32>, vector<32x32xf32>, vector<16x32xf32> -> vector<16x32xf32>
    %593 = arith.addf %485, %592 : vector<16x32xf32>
    %c3_253 = arith.constant 3 : index
    %c0_254 = arith.constant 0 : index
    %c0_255 = arith.constant 0 : index
    %594 = vector.load %arg5[%c3_253, %c0_254, %c0_255] : memref<4x1x32xf32, #tpu.memory_space<vmem>>, vector<1x1x32xf32>
    %595 = vector.shape_cast %594 : vector<1x1x32xf32> to vector<1x32xf32>
    %596 = vector.broadcast %595 : vector<1x32xf32> to vector<16x32xf32>
    %597 = arith.addf %593, %596 : vector<16x32xf32>
    %c3_256 = arith.constant 3 : index
    %c0_257 = arith.constant 0 : index
    %c0_258 = arith.constant 0 : index
    %598 = vector.load %arg8[%c3_256, %c0_257, %c0_258] : memref<4x1x32xf32, #tpu.memory_space<vmem>>, vector<1x1x32xf32>
    %599 = vector.shape_cast %598 : vector<1x1x32xf32> to vector<1x32xf32>
    %c3_259 = arith.constant 3 : index
    %c0_260 = arith.constant 0 : index
    %c0_261 = arith.constant 0 : index
    %600 = vector.load %arg9[%c3_259, %c0_260, %c0_261] : memref<4x1x32xf32, #tpu.memory_space<vmem>>, vector<1x1x32xf32>
    %601 = vector.shape_cast %600 : vector<1x1x32xf32> to vector<1x32xf32>
    %cst_262 = arith.constant dense<0.000000e+00> : vector<16xf32>
    %602 = vector.multi_reduction <add>, %597, %cst_262 [1] : vector<16x32xf32> to vector<16xf32>
    %603 = vector.shape_cast %602 : vector<16xf32> to vector<16x1xf32>
    %cst_263 = arith.constant 3.200000e+01 : f32
    %604 = vector.broadcast %cst_263 : f32 to vector<16x1xf32>
    %605 = arith.divf %603, %604 : vector<16x1xf32>
    %606 = vector.broadcast %605 : vector<16x1xf32> to vector<16x32xf32>
    %607 = arith.subf %597, %606 : vector<16x32xf32>
    %608 = arith.mulf %607, %607 : vector<16x32xf32>
    %cst_264 = arith.constant dense<0.000000e+00> : vector<16xf32>
    %609 = vector.multi_reduction <add>, %608, %cst_264 [1] : vector<16x32xf32> to vector<16xf32>
    %610 = vector.shape_cast %609 : vector<16xf32> to vector<16x1xf32>
    %cst_265 = arith.constant 3.200000e+01 : f32
    %611 = vector.broadcast %cst_265 : f32 to vector<16x1xf32>
    %612 = arith.divf %610, %611 : vector<16x1xf32>
    %cst_266 = arith.constant 9.99999974E-6 : f32
    %613 = vector.broadcast %cst_266 : f32 to vector<16x1xf32>
    %614 = arith.addf %612, %613 : vector<16x1xf32>
    %615 = math.rsqrt %614 : vector<16x1xf32>
    %616 = vector.broadcast %615 : vector<16x1xf32> to vector<16x32xf32>
    %617 = arith.mulf %607, %616 : vector<16x32xf32>
    %618 = vector.broadcast %599 : vector<1x32xf32> to vector<16x32xf32>
    %619 = arith.mulf %617, %618 : vector<16x32xf32>
    %620 = vector.broadcast %601 : vector<1x32xf32> to vector<16x32xf32>
    %621 = arith.addf %619, %620 : vector<16x32xf32>
    %c3_267 = arith.constant 3 : index
    %c0_268 = arith.constant 0 : index
    %c0_269 = arith.constant 0 : index
    %622 = vector.load %arg10[%c3_267, %c0_268, %c0_269] : memref<4x32x128xf32, #tpu.memory_space<vmem>>, vector<1x32x128xf32>
    %623 = vector.shape_cast %622 : vector<1x32x128xf32> to vector<32x128xf32>
    %cst_270 = arith.constant dense<0.000000e+00> : vector<16x128xf32>
    %624 = tpu.matmul %621, %623, %cst_270 {dimension_numbers = #tpu.dot_dimension_numbers<[1], [0], [0], [1], [0, 0, 1, 1], [], []>} : vector<16x32xf32>, vector<32x128xf32>, vector<16x128xf32> -> vector<16x128xf32>
    %c3_271 = arith.constant 3 : index
    %c0_272 = arith.constant 0 : index
    %c0_273 = arith.constant 0 : index
    %625 = vector.load %arg11[%c3_271, %c0_272, %c0_273] : memref<4x1x128xf32, #tpu.memory_space<vmem>>, vector<1x1x128xf32>
    %626 = vector.shape_cast %625 : vector<1x1x128xf32> to vector<1x128xf32>
    %627 = vector.broadcast %626 : vector<1x128xf32> to vector<16x128xf32>
    %628 = arith.addf %624, %627 : vector<16x128xf32>
    %cst_274 = arith.constant 0.000000e+00 : f32
    %629 = vector.broadcast %cst_274 : f32 to vector<16x128xf32>
    %630 = arith.maximumf %628, %629 : vector<16x128xf32>
    %c3_275 = arith.constant 3 : index
    %c0_276 = arith.constant 0 : index
    %c0_277 = arith.constant 0 : index
    %631 = vector.load %arg12[%c3_275, %c0_276, %c0_277] : memref<4x128x32xf32, #tpu.memory_space<vmem>>, vector<1x128x32xf32>
    %632 = vector.shape_cast %631 : vector<1x128x32xf32> to vector<128x32xf32>
    %cst_278 = arith.constant dense<0.000000e+00> : vector<16x32xf32>
    %633 = tpu.matmul %630, %632, %cst_278 {dimension_numbers = #tpu.dot_dimension_numbers<[1], [0], [0], [1], [0, 0, 1, 1], [], []>} : vector<16x128xf32>, vector<128x32xf32>, vector<16x32xf32> -> vector<16x32xf32>
    %634 = arith.addf %597, %633 : vector<16x32xf32>
    %c3_279 = arith.constant 3 : index
    %c0_280 = arith.constant 0 : index
    %c0_281 = arith.constant 0 : index
    %635 = vector.load %arg13[%c3_279, %c0_280, %c0_281] : memref<4x1x32xf32, #tpu.memory_space<vmem>>, vector<1x1x32xf32>
    %636 = vector.shape_cast %635 : vector<1x1x32xf32> to vector<1x32xf32>
    %637 = vector.broadcast %636 : vector<1x32xf32> to vector<16x32xf32>
    %638 = arith.addf %634, %637 : vector<16x32xf32>
    %c0_282 = arith.constant 0 : index
    %c0_283 = arith.constant 0 : index
    %639 = vector.load %arg14[%c0_282, %c0_283] : memref<1x32xf32, #tpu.memory_space<vmem>>, vector<1x32xf32>
    %c0_284 = arith.constant 0 : index
    %c0_285 = arith.constant 0 : index
    %640 = vector.load %arg15[%c0_284, %c0_285] : memref<1x32xf32, #tpu.memory_space<vmem>>, vector<1x32xf32>
    %cst_286 = arith.constant dense<0.000000e+00> : vector<16xf32>
    %641 = vector.multi_reduction <add>, %638, %cst_286 [1] : vector<16x32xf32> to vector<16xf32>
    %642 = vector.shape_cast %641 : vector<16xf32> to vector<16x1xf32>
    %cst_287 = arith.constant 3.200000e+01 : f32
    %643 = vector.broadcast %cst_287 : f32 to vector<16x1xf32>
    %644 = arith.divf %642, %643 : vector<16x1xf32>
    %645 = vector.broadcast %644 : vector<16x1xf32> to vector<16x32xf32>
    %646 = arith.subf %638, %645 : vector<16x32xf32>
    %647 = arith.mulf %646, %646 : vector<16x32xf32>
    %cst_288 = arith.constant dense<0.000000e+00> : vector<16xf32>
    %648 = vector.multi_reduction <add>, %647, %cst_288 [1] : vector<16x32xf32> to vector<16xf32>
    %649 = vector.shape_cast %648 : vector<16xf32> to vector<16x1xf32>
    %cst_289 = arith.constant 3.200000e+01 : f32
    %650 = vector.broadcast %cst_289 : f32 to vector<16x1xf32>
    %651 = arith.divf %649, %650 : vector<16x1xf32>
    %cst_290 = arith.constant 9.99999974E-6 : f32
    %652 = vector.broadcast %cst_290 : f32 to vector<16x1xf32>
    %653 = arith.addf %651, %652 : vector<16x1xf32>
    %654 = math.rsqrt %653 : vector<16x1xf32>
    %655 = vector.broadcast %654 : vector<16x1xf32> to vector<16x32xf32>
    %656 = arith.mulf %646, %655 : vector<16x32xf32>
    %657 = vector.broadcast %639 : vector<1x32xf32> to vector<16x32xf32>
    %658 = arith.mulf %656, %657 : vector<16x32xf32>
    %659 = vector.broadcast %640 : vector<1x32xf32> to vector<16x32xf32>
    %660 = arith.addf %658, %659 : vector<16x32xf32>
    %c0_291 = arith.constant 0 : index
    %c0_292 = arith.constant 0 : index
    %661 = vector.load %arg16[%c0_291, %c0_292] : memref<32x65xf32, #tpu.memory_space<vmem>>, vector<32x65xf32>
    %cst_293 = arith.constant dense<0.000000e+00> : vector<16x65xf32>
    %662 = tpu.matmul %660, %661, %cst_293 {dimension_numbers = #tpu.dot_dimension_numbers<[1], [0], [0], [1], [0, 0, 1, 1], [], []>} : vector<16x32xf32>, vector<32x65xf32>, vector<16x65xf32> -> vector<16x65xf32>
    %c0_294 = arith.constant 0 : index
    %c0_295 = arith.constant 0 : index
    %663 = vector.load %arg17[%c0_294, %c0_295] : memref<1x65xf32, #tpu.memory_space<vmem>>, vector<1x65xf32>
    %664 = vector.broadcast %663 : vector<1x65xf32> to vector<16x65xf32>
    %665 = arith.addf %662, %664 : vector<16x65xf32>
    %c0_296 = arith.constant 0 : index
    %c0_297 = arith.constant 0 : index
    %666 = vector.load %arg18[%c0_296, %c0_297] : memref<16x65xf32, #tpu.memory_space<vmem>>, vector<16x65xf32>
    tpu.vector_store %arg18[%c0_296, %c0_297], %665 {strides = array<i32>} : memref<16x65xf32, #tpu.memory_space<vmem>>, vector<16x65xf32>,
    return
  }
}

</mosaic_0001>

<bundles_post_ra>
// kernel: bigram_lm_forward.1
= control target key start
LH: loop header
LB: loop body
LE: loop exit
PB: predicated region body
PF: predicated region fallthrough
CT: control target
= control target key end

     0   :  { %s8708_s0 = inlined_call_operand.vmem [shape: s32[16,1], index: 0, kind: input, shape index: {}]   ;;  %s8709_s1 = inlined_call_operand.vmem [shape: f32[65,32], index: 1, kind: input, shape index: {}]   ;;  %s8710_s2 = inlined_call_operand.vmem [shape: f32[8,32], index: 2, kind: input, shape index: {}]   ;;  %s8711_s3 = inlined_call_operand.vmem [shape: f32[4,32,384], index: 3, kind: input, shape index: {}]   ;;  %s8712_s4 = inlined_call_operand.vmem [shape: f32[4,32,32], index: 4, kind: input, shape index: {}]   ;;  %s8713_s5 = inlined_call_operand.vmem [shape: f32[4,1,32], index: 5, kind: input, shape index: {}]   ;;  %s8714_s6 = inlined_call_operand.vmem [shape: f32[4,1,32], index: 6, kind: input, shape index: {}]   ;;  %s8715_s7 = inlined_call_operand.hbm [shape: f32[4,1,32], index: 7, kind: input, shape index: {}]   ;;  %s8716_s8 = inlined_call_operand.hbm [shape: f32[4,1,32], index: 8, kind: input, shape index: {}]   ;;  %s8717_s9 = inlined_call_operand.hbm [shape: f32[4,1,32], index: 9, kind: input, shape index: {}]   ;;  %s8718_s10 = inlined_call_operand.vmem [shape: f32[4,32,128], index: 10, kind: input, shape index: {}]   ;;  %s8719_s11 = inlined_call_operand.hbm [shape: f32[4,1,128], index: 11, kind: input, shape index: {}]   ;;  %s8720_s12 = inlined_call_operand.vmem [shape: f32[4,128,32], index: 12, kind: input, shape index: {}]   ;;  %s8721_s13 = inlined_call_operand.hbm [shape: f32[4,1,32], index: 13, kind: input, shape index: {}]   ;;  %s8722_s14 = inlined_call_operand.vmem [shape: f32[1,32], index: 14, kind: input, shape index: {}]   ;;  %s8723_s15 = inlined_call_operand.vmem [shape: f32[1,32], index: 15, kind: input, shape index: {}]   ;;  %s8724_s16 = inlined_call_operand.hbm [shape: f32[32,65], index: 16, kind: input, shape index: {}]   ;;  %s8725_s17 = inlined_call_operand.vmem [shape: f32[1,65], index: 17, kind: input, shape index: {}]   ;;  %s8726_s18 = inlined_call_operand.hbm [shape: f32[16,65], index: 18, kind: output, shape index: {}]  }
   0x1   :  { %8729 = sst [smem:[#allocation19_spill]] %s8708_s0 }
   0x2   :  { %8730 = sst [smem:[#allocation20_spill]] %s8709_s1 }
   0x3   :  { %8731 = sst [smem:[#allocation21_spill]] %s8710_s2 }
   0x4   :  { %23 = vsyncpa [#allocation3], 0 }
   0x5   :  { %24 = vsyncpa [#allocation6], 0 }
   0x6   :  { %25 = vsyncpa [#allocation9], 0 }
   0x7   :  { %26 = vsyncpa [#allocation12], 0 }
   0x8   :  { %27 = vsyncpa [#allocation4], 0  ;;  %s7342_s27 = smov [#allocation5]   ;;  %s7343_s29 = smov [#allocation8]  }
   0x9   :  { %s59_s28 = sshll.u32 %s7342_s27, 4  ;;  %s85_s30 = sshll.u32 %s7343_s29, 4  ;;  %s60_s28 = int_to_ptr.vmem [resolvable:$true] %s59_s28  ;;  %s86_s30 = int_to_ptr.vmem [resolvable:$true] %s85_s30 }
   0xa   :  { %s7200_s0 = scalar_lea.vmem %s60_s28, 64  ;;  %p7205_p1 = scmp.lt.s32.totalorder %s60_s28, %s60_s28 }
   0xb   :  { %p7201_p0 = scmp.ne.s32.totalorder %s60_s28, %s7200_s0  ;;  %p7206_p2 = scmp.lt.s32.totalorder %s7200_s0, %s7200_s0 }
   0xd   :  { %p7207_p3 = por %p7206_p2, %p7205_p1 }
   0xf   :  { %p7208_p4 = pnand %p7207_p3, %p7201_p0 }
  0x11   :  { %7211 = shalt.err (!%p7208_p4)
}
  0x12   :  { %s7344_s19 = smov 16   ;;  %s7345_s1 = smov 1  }
  0x13   :  { %65 = dma.hbm_to_vmem [thread:$0]  %s8716_s8, 64, %s60_s28, [#allocation6], %s7344_s19, %s7344_s19, %s7345_s1  }
  0x14   :  { %s7220_s22 = scalar_lea.vmem %s86_s30, 64  ;;  %p7225_p6 = scmp.lt.s32.totalorder %s86_s30, %s86_s30 }
  0x15   :  { %p7221_p5 = scmp.ne.s32.totalorder %s86_s30, %s7220_s22  ;;  %p7226_p7 = scmp.lt.s32.totalorder %s7220_s22, %s7220_s22 }
  0x17   :  { %p7227_p8 = por %p7226_p7, %p7225_p6 }
  0x19   :  { %p7228_p9 = pnand %p7227_p8, %p7221_p5 }
  0x1b   :  { %7231 = shalt.err (!%p7228_p9)
}
  0x1c   :  { %91 = dma.hbm_to_vmem [thread:$0]  %s8719_s11, 64, %s86_s30, [#allocation9], %s7344_s19, %s7344_s19, %s7345_s1  }
  0x1d   :  { %s7346_s24 = smov [#allocation2]   ;;  %s7347_s26 = smov [#allocation7]  }
  0x1e   :  { %s47_s25 = sshll.u32 %s7346_s24, 4  ;;  %s71_s27 = sshll.u32 %s7347_s26, 4  ;;  %s48_s25 = int_to_ptr.vmem [resolvable:$true] %s47_s25  ;;  %s72_s27 = int_to_ptr.vmem [resolvable:$true] %s71_s27 }
  0x1f   :  { %s7240_s8 = scalar_lea.vmem %s48_s25, 64  ;;  %p7245_p11 = scmp.lt.s32.totalorder %s48_s25, %s48_s25 }
  0x20   :  { %p7241_p10 = scmp.ne.s32.totalorder %s48_s25, %s7240_s8  ;;  %p7246_p12 = scmp.lt.s32.totalorder %s7240_s8, %s7240_s8 }
  0x22   :  { %p7247_p13 = por %p7246_p12, %p7245_p11 }
  0x24   :  { %p7248_p0 = pnand %p7247_p13, %p7241_p10 }
  0x26   :  { %7251 = shalt.err (!%p7248_p0)
}
  0x27   :  { %53 = dma.hbm_to_vmem [thread:$0]  %s8715_s7, 64, %s48_s25, [#allocation3], %s7344_s19, %s7344_s19, %s7345_s1  }
  0x28   :  { %s7260_s11 = scalar_lea.vmem %s72_s27, 64  ;;  %p7265_p2 = scmp.lt.s32.totalorder %s72_s27, %s72_s27 }
  0x29   :  { %p7261_p1 = scmp.ne.s32.totalorder %s72_s27, %s7260_s11  ;;  %p7266_p3 = scmp.lt.s32.totalorder %s7260_s11, %s7260_s11 }
  0x2b   :  { %p7267_p4 = por %p7266_p3, %p7265_p2 }
  0x2d   :  { %p7268_p5 = pnand %p7267_p4, %p7261_p1 }
  0x2f   :  { %7271 = shalt.err (!%p7268_p5)
}
  0x30   :  { %77 = dma.hbm_to_vmem [thread:$0]  %s8717_s9, 64, %s72_s27, [#allocation6], %s7344_s19, %s7344_s19, %s7345_s1  }
  0x31   :  { %s7348_s20 = smov [#allocation10]   ;;  %s7349_s22 = smov [#allocation11]  }
  0x32   :  { %s99_s21 = sshll.u32 %s7348_s20, 4  ;;  %s115_s2 = sshll.u32 %s7349_s22, 4  ;;  %s100_s21 = int_to_ptr.vmem [resolvable:$true] %s99_s21  ;;  %s116_s2 = int_to_ptr.vmem [resolvable:$true] %s115_s2 }
  0x33   :  { %s7280_s7 = scalar_lea.vmem %s100_s21, 64  ;;  %p7285_p7 = scmp.lt.s32.totalorder %s100_s21, %s100_s21 }
  0x34   :  { %p7281_p6 = scmp.ne.s32.totalorder %s100_s21, %s7280_s7  ;;  %p7286_p8 = scmp.lt.s32.totalorder %s7280_s7, %s7280_s7 }
  0x36   :  { %p7287_p9 = por %p7286_p8, %p7285_p7 }
  0x38   :  { %p7288_p10 = pnand %p7287_p9, %p7281_p6 }
  0x3a   :  { %7291 = shalt.err (!%p7288_p10)
}
  0x3b   :  { %105 = dma.hbm_to_vmem [thread:$0]  %s8721_s13, 64, %s100_s21, [#allocation9], %s7344_s19, %s7344_s19, %s7345_s1  }
  0x3c   :  { %s7300_s9 = scalar_lea.vmem %s116_s2, 512  ;;  %p7305_p12 = scmp.lt.s32.totalorder %s116_s2, %s116_s2 }
  0x3d   :  { %p7301_p11 = scmp.ne.s32.totalorder %s116_s2, %s7300_s9  ;;  %p7306_p13 = scmp.lt.s32.totalorder %s7300_s9, %s7300_s9 }
  0x3f   :  { %p7307_p0 = por %p7306_p13, %p7305_p12 }
  0x41   :  { %p7308_p1 = pnand %p7307_p0, %p7301_p11 }
  0x43   :  { %7311 = shalt.err (!%p7308_p1)
}
  0x44   :  { %s7350_s25 = smov 128   ;;  %s7351_s26 = smov 8  }
  0x45   :  { %121 = dma.hbm_to_vmem [thread:$0]  %s8724_s16, 512, %s116_s2, [#allocation12], %s7350_s25, %s7350_s25, %s7351_s26  }
  0x46   :  { %7332 = dma.done.wait [#allocation3], 64  }
  0x47   :  { %7333 = vsyncadd [#allocation3], 4294967232 }
  0x48   :  { %7334 = dma.done.wait [#allocation6], 128  }
  0x49   :  { %7335 = vsyncadd [#allocation6], 4294967168 }
  0x4a   :  { %7336 = dma.done.wait [#allocation9], 128  }
  0x4b   :  { %7337 = vsyncadd [#allocation9], 4294967168 }
  0x4c   :  { %7338 = dma.done.wait [#allocation12], 512  }
  0x4d   :  { %7339 = vsyncadd [#allocation12], 4294966784  ;;  %v7352_v0 = vmov 0   ;;  %v144_v1 = vlaneseq  ;;  %vm175_vm0 = vcmask 1040384   ;;  %s8732_s1 = sld [smem:[#allocation19_spill]]  ;;  %vm168_vm4 = vcmask 531456  }
  0x4e   :  { %7027 = vset.pattern.permute.xlu0 %v7352_v0  ;;  %s8733_s29 = sld [smem:[#allocation20_spill]]  ;;  %v7353_v16 = vmov -1e+30   ;;  %v7354_v23 = vmov 0.0   ;;  %vm273_vm7 = vcmask 261120   ;;  %v327_v44 = vld [vmem:[%s8711_s3 + $0x50] sm:$0xff] }
  0x4f   :  { %v7490_v2 = vand.u32 127, %v144_v1  ;;  %v7492_v3 = vshrl.u32 %v144_v1, 7  ;;  %s8734_s30 = sld [smem:[#allocation21_spill]]  ;;  %v326_v45 = vld [vmem:[%s8711_s3 + $0x48] sm:$0xff]  ;;  %v324_v46 = vld [vmem:[%s8711_s3 + $0x38] sm:$0xff]  ;;  %v323_v47 = vld [vmem:[%s8711_s3 + $0x30] sm:$0xff] }
  0x50   :  { %v328_v48 = vld [vmem:[%s8711_s3 + $0x58] sm:$0xff]  ;;  %v321_v49 = vld [vmem:[%s8711_s3 + $0x20] sm:$0xff]  ;;  %v318_v52 = vld [vmem:[%s8711_s3 + $0x8] sm:$0xff]  ;;  %s7355_s24 = smov 96   ;;  %s7356_s9 = smov 64   ;;  %vm578_vm11 = vcmask 130048  }
  0x51   :  { %v256_v7 = vadd.s32 8, %v7492_v3  ;;  %v259_v8 = vshra.s32 %v7490_v2, 3  ;;  %v264_v9 = vand.u32 7, %v7490_v2  ;;  %6503 = vmatprep.subr.mxu1 %v328_v48  ;;  %v325_v50 = vld [vmem:[%s8711_s3 + $0x40] sm:$0xff]  ;;  %v320_v51 = vld [vmem:[%s8711_s3 + $0x18] sm:$0xff]  ;;  %v322_v54 = vld [vmem:[%s8711_s3 + $0x28] sm:$0xff] }
  0x52   :  { %6504 = vmatpush3.msra.mxu1 %v328_v48  ;;  %v317_v53 = vld [vmem:[%s8711_s3] sm:$0xff]  ;;  %v319_v55 = vld [vmem:[%s8711_s3 + $0x10] sm:$0xff]  ;;  %s7357_s27 = smov 32  }
  0x53   :  { %v142_v4 = vld [vmem:[%s8732_s1] sm:$0xff]  ;;  %v143_v10 = vld [vmem:[%s8732_s1 + $0x8] sm:$0xff]  ;;  %v258_v12 = vshra.s32 %v256_v7, 3  ;;  %v263_v13 = vand.u32 7, %v256_v7  ;;  %6505 = vmatprep.subr.mxu1 %v325_v50 }
  0x54   :  { %v166_v5 = vld [vmem:[%s8733_s29 + $0x40] sm:$0x1]  ;;  %147 = vperm.xlu0 %7027, %v142_v4   ;;  %v165_v6 = vld [vmem:[%s8733_s29 + $0x38] sm:$0xff]  ;;  %v164_v11 = vld [vmem:[%s8733_s29 + $0x30] sm:$0xff]  ;;  %6506 = vmatpush3.msra.mxu1 %v325_v50 }
  0x55   :  { %6482 = vmatprep.subr.msk.mxu0 %vm175_vm0, %v166_v5  ;;  %v163_v14 = vld [vmem:[%s8733_s29 + $0x28] sm:$0xff]  ;;  %vm261_vm1 = vcmp.eq.s32.totalorder %v258_v12, %v259_v8  ;;  %vm266_vm2 = vcmp.ge.s32.totalorder %v263_v13, %v264_v9  ;;  %v162_v15 = vld [vmem:[%s8733_s29 + $0x20] sm:$0xff]  ;;  %v161_v18 = vld [vmem:[%s8733_s29 + $0x18] sm:$0xff]  ;;  %6507 = vmatprep.subr.mxu1 %v322_v54 }
  0x56   :  { %6483 = vmatpush3.msk.msra.mxu0 %vm175_vm0, %v166_v5  ;;  %vm268_vm3 = vmand %vm261_vm1, %vm266_vm2  ;;  %v160_v19 = vld [vmem:[%s8733_s29 + $0x10] sm:$0xff]  ;;  %v159_v20 = vld [vmem:[%s8733_s29 + $0x8] sm:$0xff]  ;;  %6508 = vmatpush3.msra.mxu1 %v322_v54 }
  0x57   :  { %6484 = vmatprep.subr.mxu0 %v165_v6  ;;  %v7523_v17 = vsel %vm268_vm3, 0.0, %v7353_v16  ;;  %v158_v21 = vld [vmem:[%s8733_s29] sm:$0xff]  ;;  %6509 = vmatprep.subr.mxu1 %v319_v55 }
  0x58   :  { %6485 = vmatpush3.msra.mxu0 %v165_v6  ;;  %150 = vperm.xlu0 %7027, %v143_v10   ;;  %v167_v28 = vld [vmem:[%s8734_s30] sm:$0xff] }
  0x59   :  { %6486 = vmatprep.subr.mxu0 %v164_v11  ;;  %6510 = vmatpush3.msra.mxu1 %v319_v55  ;;  %v5918_v63 = vld [vmem:[%s8714_s6] ss:$0 sm:$0xff] }
  0x5a   :  { %6487 = vmatpush3.msra.mxu0 %v164_v11  ;;  %v5919_v1 = vld [vmem:[#allocation2] ss:$0 sm:$0xff] }
  0x5b   :  { %6488 = vmatprep.subr.mxu0 %v163_v14 }
  0x5c   :  { %6489 = vmatpush3.msra.mxu0 %v163_v14 }
  0x5d   :  { %6490 = vmatprep.subr.mxu0 %v162_v15 }
  0x5e   :  { %6491 = vmatpush3.msra.mxu0 %v162_v15 }
  0x5f   :  { %6492 = vmatprep.subr.mxu0 %v161_v18 }
  0x60   :  { %6493 = vmatpush3.msra.mxu0 %v161_v18 }
  0x61   :  { %6494 = vmatprep.subr.mxu0 %v160_v19 }
  0x62   :  { %6495 = vmatpush3.msra.mxu0 %v160_v19 }
  0x63   :  { %6496 = vmatprep.subr.mxu0 %v159_v20 }
  0x64   :  { %6497 = vmatpush3.msra.mxu0 %v159_v20 }
  0x65   :  { %6498 = vmatprep.subr.mxu0 %v158_v21 }
  0x66   :  { %6499 = vmatpush3.msra.mxu0 %v158_v21 }
  0x67   :  { %359 = vmatprep.subr.mxu0 %v327_v44 }
  0xcf   :  { %v148_v22 = vpop.permute.xlu0 %147 }
  0xd0   :  { %vm152_vm5 = vcmp.eq.s32.totalorder %v148_v22, %v7490_v2 }
  0xd1   :  { %v5913_v24 = vsel %vm152_vm5, 1.0, %v7354_v23 }
  0xd2   :  { %6500 = vmatprep.mubr.msk.f32.mxu0 %vm168_vm4, %v5913_v24 }
  0xd3   :  { %v151_v25 = vpop.permute.xlu0 %150 }
  0xd4   :  { %vm153_vm6 = vcmp.eq.s32.totalorder %v151_v25, %v7490_v2 }
  0xd5   :  { %v5914_v26 = vsel %vm153_vm6, 1.0, %v7354_v23 }
  0xd6   :  { %6501 = vmatmul.mubr.msk.f32.vlgmr.msra.gmra.mxu0 %vm168_vm4, %v5914_v26 }
  0xd7   :  { %399 = vmatprep.mubr.f32.mxu0 %v7354_v23  ;;  %360 = vmatpush1.msra.mxu0 %v326_v45 }
  0xd8   :  { %361 = vmatprep.subr.mxu0 %v324_v46 }
  0xd9   :  { %362 = vmatpush1.msra.mxu0 %v323_v47 }
  0xda   :  { %363 = vmatprep.subr.mxu0 %v321_v49 }
  0xdb   :  { %364 = vmatpush1.msra.mxu0 %v320_v51 }
  0xdc   :  { %365 = vmatprep.subr.mxu0 %v318_v52 }
  0xdd   :  { %366 = vmatpush1.msra.mxu0 %v317_v53 }
 0x196   :  { %v6502_v27 = vpop.f32.mrf.mxu0 }
 0x197   :  { %v7549_v31 = vadd.f32 %v6502_v27, %v167_v28  ;;  %v257_v27 = vshra.s32 %v7492_v3, 3 }
 0x198   :  { %v245_v29 = vpop.f32.mrf.mxu0 }
 0x199   :  { %v7547_v30 = vadd.f32 %v245_v29, %v167_v28  ;;  %v277_v33 = vsel %vm273_vm7, %v7549_v31, 0.0  ;;  %v262_v28 = vand.u32 7, %v7492_v3  ;;  %vm260_vm8 = vcmp.eq.s32.totalorder %v257_v27, %v259_v8 }
 0x19b   :  { %v274_v32 = vsel %vm273_vm7, %v7547_v30, 0.0  ;;  %vm265_vm9 = vcmp.ge.s32.totalorder %v262_v28, %v264_v9 }
 0x19c   :  { %275 = vadd.xlane.f32.xlu1 %v274_v32  ;;  %vm267_vm10 = vmand %vm260_vm8, %vm265_vm9 }
 0x1a0   :  { %278 = vadd.xlane.f32.xlu1 %v277_v33 }
 0x225   :  { %v276_v34 = vpop.xlane.xlu1 %275 }
 0x226   :  { %v281_v35 = vmul.f32 0.03125, %v276_v34  ;;  %v7662_v34 = vsel %vm267_vm10, 0.0, %v7353_v16 }
 0x228   :  { %v283_v36 = vsub.f32 %v7547_v30, %v281_v35 }
 0x229   :  { %v279_v37 = vpop.xlane.xlu1 %278 }
 0x22a   :  { %v282_v38 = vmul.f32 0.03125, %v279_v37  ;;  %v285_v39 = vmul.f32 %v283_v36, %v283_v36 }
 0x22c   :  { %v284_v40 = vsub.f32 %v7549_v31, %v282_v38  ;;  %v287_v41 = vsel %vm273_vm7, %v285_v39, 0.0 }
 0x22d   :  { %288 = vadd.xlane.f32.xlu0 %v287_v41 }
 0x22e   :  { %v286_v42 = vmul.f32 %v284_v40, %v284_v40 }
 0x230   :  { %v290_v43 = vsel %vm273_vm7, %v286_v42, 0.0 }
 0x231   :  { %291 = vadd.xlane.f32.xlu1 %v290_v43 }
 0x2b6   :  { %v289_v56 = vpop.xlane.xlu0 %288 }
 0x2b7   :  { %v293_v57 = vmul.f32 0.03125, %v289_v56 }
 0x2b9   :  { %v295_v58 = vadd.f32 1e-05, %v293_v57 }
 0x2ba   :  { %v292_v59 = vpop.xlane.xlu1 %291 }
 0x2bb   :  { %7028 = vrsqrt.f32 %v295_v58  ;;  %v294_v60 = vmul.f32 0.03125, %v292_v59 }
 0x2bd   :  { %v296_v61 = vadd.f32 1e-05, %v294_v60 }
 0x2bf   :  { %7030 = vrsqrt.f32 %v296_v61 }
 0x2c8   :  { %v7029_v62 = vpop.eup %7028 }
 0x2c9   :  { %v299_v0 = vmul.f32 %v7029_v62, %v283_v36 }
 0x2cb   :  { %v307_v4 = vmul.f32 %v5918_v63, %v299_v0 }
 0x2cc   :  { %v7031_v5 = vpop.eup %7030 }
 0x2cd   :  { %v315_v6 = vadd.f32 %v5919_v1, %v307_v4  ;;  %v300_v7 = vmul.f32 %v7031_v5, %v284_v40 }
 0x2cf   :  { %5920 = vmatmul.mubr.msk.f32.vlgmr.msra.gmra.mxu0 %vm273_vm7, %v315_v6  ;;  %6511 = vmatprep.mubr.msk.f32.mxu1 %vm273_vm7, %v315_v6  ;;  %v308_v10 = vmul.f32 %v5918_v63, %v300_v7 }
 0x2d0   :  { %405 = vmatprep.mubr.f32.mxu0 %v7354_v23 }
 0x2d1   :  { %v316_v11 = vadd.f32 %v5919_v1, %v308_v10 }
 0x2d3   :  { %5921 = vmatmul.mubr.msk.f32.gmra.mxu0 %vm273_vm7, %v316_v11  ;;  %6512 = vmatmul.mubr.msk.f32.vlgmr.msra.gmra.mxu1 %vm273_vm7, %v316_v11 }
 0x38f   :  { %v7603_v12 = vpop.f32.mrf.mxu0 }
 0x390   :  { %601 = vrot.lane.b32.xlu1 %v7603_v12, %s7355_s24  ;;  %6518 = vmatprep.mubr.msk.f32.mxu1 %vm273_vm7, %v7603_v12 }
 0x391   :  { %v7609_v13 = vpop.f32.mrf.mxu0 }
 0x393   :  { %v7611_v14 = vpop.f32.mrf.mxu0  ;;  %v7653_v29 = vpop.f32.mrf.mxu1 }
 0x394   :  { %605 = vrot.lane.b32.xlu1 %v7609_v13, %s7355_s24 }
 0x395   :  { %v7615_v15 = vpop.f32.mrf.mxu0  ;;  %v7659_v32 = vpop.f32.mrf.mxu1 }
 0x396   :  { %894 = vrot.lane.b32.xlu0 %v7615_v15, %s7356_s9  ;;  %6514 = vmatprep.subr.msk.mxu1 %vm273_vm7, %v7615_v15 }
 0x397   :  { %6515 = vmatpush3.xpose.msk.msra.mxu1 %vm273_vm7, %v7615_v15 }
 0x398   :  { %607 = vrot.lane.b32.xlu1 %v7615_v15, %s7355_s24  ;;  %6516 = vmatprep.subr.msk.mxu1 %vm273_vm7, %v7609_v13 }
 0x39b   :  { %6517 = vmatpush3.xpose.msk.msra.mxu1 %vm273_vm7, %v7609_v13 }
 0x39c   :  { %603 = vrot.lane.b32.xlu1 %v7611_v14, %s7355_s24 }
 0x39e   :  { %6519 = vmatmul.mubr.msk.f32.vlgmr.msra.gmra.mxu1 %vm273_vm7, %v7611_v14 }
 0x3a0   :  { %892 = vrot.lane.b32.xlu1 %v7609_v13, %s7356_s9 }
 0x3a4   :  { %888 = vrot.lane.b32.xlu1 %v7603_v12, %s7356_s9 }
 0x3a8   :  { %890 = vrot.lane.b32.xlu1 %v7611_v14, %s7356_s9 }
 0x402   :  { %v602_v18 = vpop.permute.xlu1 %601 }
 0x403   :  { %6525 = vmatprep.mubr.msk.f32.mxu0 %vm273_vm7, %v602_v18 }
 0x406   :  { %v606_v19 = vpop.permute.xlu1 %605 }
 0x408   :  { %v895_v20 = vpop.permute.xlu0 %894 }
 0x409   :  { %6542 = vmatprep.subr.msk.mxu1 %vm273_vm7, %v895_v20 }
 0x40a   :  { %6543 = vmatpush3.xpose.msk.msra.mxu1 %vm273_vm7, %v895_v20  ;;  %v608_v21 = vpop.permute.xlu1 %607 }
 0x40b   :  { %6521 = vmatprep.subr.msk.mxu0 %vm273_vm7, %v608_v21 }
 0x40c   :  { %6522 = vmatpush3.xpose.msk.msra.mxu0 %vm273_vm7, %v608_v21 }
 0x40d   :  { %6523 = vmatprep.subr.msk.mxu0 %vm273_vm7, %v606_v19 }
 0x40e   :  { %v604_v22 = vpop.permute.xlu1 %603 }
 0x410   :  { %6524 = vmatpush3.xpose.msk.msra.mxu0 %vm273_vm7, %v606_v19 }
 0x412   :  { %v893_v24 = vpop.permute.xlu1 %892 }
 0x413   :  { %6526 = vmatmul.mubr.msk.f32.vlgmr.msra.gmra.mxu0 %vm273_vm7, %v604_v22  ;;  %6544 = vmatprep.subr.msk.mxu1 %vm273_vm7, %v893_v24 }
 0x414   :  { %6545 = vmatpush3.xpose.msk.msra.mxu1 %vm273_vm7, %v893_v24 }
 0x416   :  { %v889_v25 = vpop.permute.xlu1 %888 }
 0x417   :  { %6546 = vmatprep.mubr.msk.f32.mxu1 %vm273_vm7, %v889_v25 }
 0x41a   :  { %v891_v26 = vpop.permute.xlu1 %890 }
 0x41b   :  { %6547 = vmatmul.mubr.msk.f32.vlgmr.msra.gmra.mxu1 %vm273_vm7, %v891_v26 }
 0x45e   :  { %v6520_v33 = vpop.f32.mrf.mxu1 }
 0x45f   :  { %v575_v8 = vmul.f32 0.17677669, %v6520_v33 }
 0x460   :  { %v565_v35 = vpop.f32.mrf.mxu1 }
 0x461   :  { %v574_v36 = vmul.f32 0.17677669, %v565_v35  ;;  %v577_v42 = vadd.f32 %v575_v8, %v7523_v17 }
 0x463   :  { %v576_v37 = vadd.f32 %v574_v36, %v7662_v34  ;;  %v582_v46 = vsel %vm578_vm11, %v577_v42, -inf }
 0x465   :  { %v579_v3 = vsel %vm578_vm11, %v576_v37, -inf }
 0x466   :  { %580 = vmax.xlane.f32.xlu1 %v579_v3 }
 0x477   :  { %722 = vrot.lane.b32.xlu1 %v7653_v29, %s7355_s24 }
 0x47b   :  { %1007 = vrot.lane.b32.xlu1 %v7653_v29, %s7356_s9 }
 0x4d3   :  { %v6527_v2 = vpop.f32.mrf.mxu0 }
 0x4d4   :  { %v693_v9 = vmul.f32 0.17677669, %v6527_v2 }
 0x4d5   :  { %v683_v38 = vpop.f32.mrf.mxu0 }
 0x4d6   :  { %v692_v16 = vmul.f32 0.17677669, %v683_v38  ;;  %v695_v39 = vadd.f32 %v693_v9, %v7523_v17 }
 0x4d8   :  { %v699_v40 = vsel %vm578_vm11, %v695_v39, -inf  ;;  %v694_v41 = vadd.f32 %v692_v16, %v7662_v34 }
 0x4d9   :  { %700 = vmax.xlane.f32.xlu0 %v699_v40 }
 0x4da   :  { %v696_v43 = vsel %vm578_vm11, %v694_v41, -inf }
 0x4db   :  { %697 = vmax.xlane.f32.xlu1 %v696_v43  ;;  %v6548_v44 = vpop.f32.mrf.mxu1 }
 0x4dc   :  { %v980_v45 = vmul.f32 0.17677669, %v6548_v44 }
 0x4dd   :  { %583 = vmax.xlane.f32.xlu0 %v582_v46  ;;  %v970_v47 = vpop.f32.mrf.mxu1 }
 0x4de   :  { %v979_v48 = vmul.f32 0.17677669, %v970_v47  ;;  %v982_v49 = vadd.f32 %v980_v45, %v7523_v17 }
 0x4e0   :  { %v986_v50 = vsel %vm578_vm11, %v982_v49, -inf  ;;  %v981_v51 = vadd.f32 %v979_v48, %v7662_v34 }
 0x4e1   :  { %987 = vmax.xlane.f32.xlu0 %v986_v50 }
 0x4e2   :  { %v983_v52 = vsel %vm578_vm11, %v981_v51, -inf }
 0x4e3   :  { %984 = vmax.xlane.f32.xlu1 %v983_v52 }
 0x4ef   :  { %v581_v53 = vpop.xlane.xlu1 %580 }
 0x4f0   :  { %v585_v55 = vsub.f32 %v576_v37, %v581_v53 }
 0x4f2   :  { %v587_v56 = vmul.f32 1.442695, %v585_v55 }
 0x4f3   :  { %v723_v54 = vpop.permute.xlu1 %722 }
 0x4f4   :  { %1005 = vrot.lane.b32.xlu1 %v7659_v32, %s7356_s9  ;;  %6528 = vmatprep.subr.mxu0 %v723_v54  ;;  %7032 = vpow2.f32 %v587_v56 }
 0x4f5   :  { %6529 = vmatpush3.msra.mxu0 %v723_v54 }
 0x4f7   :  { %720 = vrot.lane.b32.xlu0 %v7659_v32, %s7355_s24  ;;  %v7688_v59 = vpop.permute.xlu1 %1007 }
 0x501   :  { %v7684_v57 = vpop.eup %7032 }
 0x502   :  { %v591_v58 = vsel %vm578_vm11, %v7684_v57, 0.0 }
 0x518   :  { %592 = vadd.xlane.f32.xlu1 %v591_v58 }
 0x562   :  { %v701_v60 = vpop.xlane.xlu0 %700 }
 0x563   :  { %v703_v62 = vsub.f32 %v695_v39, %v701_v60 }
 0x564   :  { %v698_v61 = vpop.xlane.xlu1 %697 }
 0x565   :  { %v702_v63 = vsub.f32 %v694_v41, %v698_v61  ;;  %v706_v5 = vmul.f32 1.442695, %v703_v62 }
 0x566   :  { %v584_v0 = vpop.xlane.xlu0 %583 }
 0x567   :  { %v704_v1 = vmul.f32 1.442695, %v702_v63  ;;  %v586_v4 = vsub.f32 %v577_v42, %v584_v0 }
 0x569   :  { %7034 = vpow2.f32 %v704_v1  ;;  %v589_v6 = vmul.f32 1.442695, %v586_v4 }
 0x56a   :  { %v988_v7 = vpop.xlane.xlu0 %987 }
 0x56b   :  { %7036 = vpow2.f32 %v589_v6  ;;  %v990_v10 = vsub.f32 %v982_v49, %v988_v7 }
 0x56c   :  { %7038 = vpow2.f32 %v706_v5  ;;  %v985_v28 = vpop.xlane.xlu1 %984 }
 0x56d   :  { %v993_v11 = vmul.f32 1.442695, %v990_v10  ;;  %v989_v33 = vsub.f32 %v981_v51, %v985_v28 }
 0x56e   :  { %v721_v18 = vpop.permute.xlu0 %720 }
 0x56f   :  { %6530 = vmatprep.subr.mxu0 %v721_v18  ;;  %7040 = vpow2.f32 %v993_v11  ;;  %v991_v35 = vmul.f32 1.442695, %v989_v33 }
 0x570   :  { %6531 = vmatpush3.msra.mxu0 %v721_v18  ;;  %v1006_v3 = vpop.permute.xlu1 %1005 }
 0x571   :  { %6535 = vmatprep.subr.mxu0 %v7653_v29  ;;  %7042 = vpow2.f32 %v991_v35  ;;  %v1303_v35 = vld [vmem:[%s8712_s4 + $0x18] sm:$0xff] }
 0x576   :  { %v7035_v19 = vpop.eup %7034 }
 0x577   :  { %v708_v20 = vsel %vm578_vm11, %v7035_v19, 0.0 }
 0x578   :  { %v7037_v21 = vpop.eup %7036  ;;  %709 = vadd.xlane.f32.xlu1 %v708_v20 }
 0x579   :  { %v594_v22 = vsel %vm578_vm11, %v7037_v21, 0.0  ;;  %v7039_v24 = vpop.eup %7038 }
 0x57a   :  { %595 = vadd.xlane.f32.xlu0 %v594_v22  ;;  %v711_v25 = vsel %vm578_vm11, %v7039_v24, 0.0 }
 0x57c   :  { %v7041_v26 = vpop.eup %7040 }
 0x57d   :  { %v998_v27 = vsel %vm578_vm11, %v7041_v26, 0.0 }
 0x57e   :  { %712 = vadd.xlane.f32.xlu0 %v711_v25  ;;  %v7043_v36 = vpop.eup %7042 }
 0x57f   :  { %v995_v37 = vsel %vm578_vm11, %v7043_v36, 0.0 }
 0x582   :  { %999 = vadd.xlane.f32.xlu0 %v998_v27 }
 0x589   :  { %1098 = vrot.lane.b32.xlu1 %v7609_v13, %s7357_s27 }
 0x598   :  { %1100 = vrot.lane.b32.xlu0 %v7615_v15, %s7357_s27 }
 0x59c   :  { %1094 = vrot.lane.b32.xlu0 %v7603_v12, %s7357_s27 }
 0x5a1   :  { %v593_v2 = vpop.xlane.xlu1 %592 }
 0x5ad   :  { %996 = vadd.xlane.f32.xlu1 %v995_v37 }
 0x5be   :  { %1096 = vrot.lane.b32.xlu1 %v7611_v14, %s7357_s27 }
 0x601   :  { %v710_v13 = vpop.xlane.xlu1 %709 }
 0x602   :  { %7044 = vrcp.f32 %v710_v13  ;;  %v1301_v13 = vld [vmem:[%s8712_s4 + $0x8] sm:$0xff] }
 0x603   :  { %v596_v8 = vpop.xlane.xlu0 %595  ;;  %7046 = vrcp.f32 %v593_v2 }
 0x605   :  { %v1099_v44 = vpop.permute.xlu1 %1098 }
 0x607   :  { %v713_v9 = vpop.xlane.xlu0 %712 }
 0x608   :  { %7048 = vrcp.f32 %v713_v9 }
 0x609   :  { %7050 = vrcp.f32 %v596_v8  ;;  %v1300_v8 = vld [vmem:[%s8712_s4] sm:$0xff] }
 0x60b   :  { %v1000_v14 = vpop.xlane.xlu0 %999 }
 0x60c   :  { %7052 = vrcp.f32 %v1000_v14 }
 0x60f   :  { %v7045_v15 = vpop.eup %7044  ;;  %v1101_v43 = vpop.permute.xlu0 %1100 }
 0x610   :  { %v716_v38 = vmul.f32 %v7045_v15, %v7035_v19  ;;  %v7047_v12 = vpop.eup %7046 }
 0x611   :  { %v599_v41 = vmul.f32 %v7047_v12, %v7684_v57 }
 0x612   :  { %6532 = vmatprep.mubr.msk.f32.mxu0 %vm578_vm11, %v716_v38 }
 0x613   :  { %v1095_v50 = vpop.permute.xlu0 %1094 }
 0x615   :  { %v7049_v16 = vpop.eup %7048 }
 0x616   :  { %v717_v39 = vmul.f32 %v7049_v16, %v7039_v24  ;;  %v7051_v40 = vpop.eup %7050 }
 0x617   :  { %v600_v42 = vmul.f32 %v7051_v40, %v7037_v21 }
 0x618   :  { %6533 = vmatmul.mubr.msk.f32.vlgmr.msra.gmra.mxu0 %vm578_vm11, %v717_v39  ;;  %v5950_v39 = vld [vmem:[%s8713_s5] ss:$0 sm:$0xff] }
 0x619   :  { %6536 = vmatpush3.msra.mxu0 %v7653_v29  ;;  %6539 = vmatprep.mubr.msk.f32.mxu0 %vm578_vm11, %v599_v41  ;;  %v7053_v46 = vpop.eup %7052 }
 0x61a   :  { %6537 = vmatprep.subr.mxu0 %v7659_v32  ;;  %v1004_v49 = vmul.f32 %v7053_v46, %v7041_v26 }
 0x61b   :  { %6538 = vmatpush3.msra.mxu0 %v7659_v32 }
 0x61c   :  { %6549 = vmatprep.subr.mxu0 %v7688_v59  ;;  %6540 = vmatmul.mubr.msk.f32.vlgmr.msra.gmra.mxu0 %vm578_vm11, %v600_v42 }
 0x61d   :  { %6550 = vmatpush3.msra.mxu0 %v7688_v59 }
 0x61e   :  { %6551 = vmatprep.subr.mxu0 %v1006_v3 }
 0x61f   :  { %6552 = vmatpush3.msra.mxu0 %v1006_v3 }
 0x620   :  { %6556 = vmatprep.subr.msk.mxu0 %vm273_vm7, %v1101_v43 }
 0x636   :  { %v997_v45 = vpop.xlane.xlu1 %996 }
 0x637   :  { %7054 = vrcp.f32 %v997_v45 }
 0x63a   :  { %v1097_v51 = vpop.permute.xlu1 %1096 }
 0x644   :  { %v7055_v47 = vpop.eup %7054 }
 0x645   :  { %v1003_v48 = vmul.f32 %v7055_v47, %v7043_v36 }
 0x647   :  { %6553 = vmatprep.mubr.msk.f32.mxu0 %vm578_vm11, %v1003_v48 }
 0x648   :  { %6554 = vmatmul.mubr.msk.f32.vlgmr.msra.gmra.mxu0 %vm578_vm11, %v1004_v49 }
 0x649   :  { %6557 = vmatpush3.xpose.msk.msra.mxu0 %vm273_vm7, %v1101_v43  ;;  %6560 = vmatprep.mubr.msk.f32.mxu0 %vm273_vm7, %v1095_v50 }
 0x64a   :  { %6558 = vmatprep.subr.msk.mxu0 %vm273_vm7, %v1099_v44 }
 0x64d   :  { %6559 = vmatpush3.xpose.msk.msra.mxu0 %vm273_vm7, %v1099_v44 }
 0x650   :  { %6561 = vmatmul.mubr.msk.f32.vlgmr.msra.gmra.mxu0 %vm273_vm7, %v1097_v51 }
 0x6d8   :  { %v6534_v52 = vpop.f32.mrf.mxu0 }
 0x6da   :  { %v798_v53 = vpop.f32.mrf.mxu0 }
 0x6dc   :  { %v6541_v54 = vpop.f32.mrf.mxu0 }
 0x6dd   :  { %v885_v55 = vadd.f32 %v6541_v54, %v6534_v52  ;;  %v1443_v54 = vld [vmem:[%s8718_s10 + $0x18] sm:$0xff] }
 0x6de   :  { %v879_v56 = vpop.f32.mrf.mxu0  ;;  %6581 = vmatprep.subr.mxu0 %v1443_v54 }
 0x6df   :  { %v880_v57 = vadd.f32 %v879_v56, %v798_v53  ;;  %6582 = vmatpush3.msra.mxu0 %v1443_v54  ;;  %v1441_v56 = vld [vmem:[%s8718_s10 + $0x8] sm:$0xff] }
 0x708   :  { %v6555_v58 = vpop.f32.mrf.mxu0 }
 0x709   :  { %v1093_v59 = vadd.f32 %v6555_v58, %v885_v55  ;;  %v1442_v55 = vld [vmem:[%s8718_s10 + $0x10] sm:$0xff]  ;;  %v1549_v58 = vld [vmem:[%s8720_s12 + $0x78] sm:$0xff] }
 0x70a   :  { %v1083_v60 = vpop.f32.mrf.mxu0  ;;  %6583 = vmatprep.subr.mxu0 %v1442_v55 }
 0x70b   :  { %v1092_v61 = vadd.f32 %v1083_v60, %v880_v57  ;;  %6584 = vmatpush3.msra.mxu0 %v1442_v55  ;;  %v1440_v57 = vld [vmem:[%s8718_s10] sm:$0xff]  ;;  %v1547_v60 = vld [vmem:[%s8720_s12 + $0x68] sm:$0xff]  ;;  %v5970_v55 = vld [vmem:[%s8711_s3 + $0xb0] sm:$0xff] }
 0x70c   :  { %6585 = vmatprep.subr.mxu0 %v1441_v56 }
 0x70d   :  { %6586 = vmatpush3.msra.mxu0 %v1441_v56  ;;  %v5969_v56 = vld [vmem:[%s8711_s3 + $0xa8] sm:$0xff] }
 0x70e   :  { %6587 = vmatprep.subr.mxu0 %v1440_v57 }
 0x70f   :  { %6588 = vmatpush3.msra.mxu0 %v1440_v57  ;;  %v5967_v57 = vld [vmem:[%s8711_s3 + $0x98] sm:$0xff] }
 0x710   :  { %v6562_v62 = vpop.f32.mrf.mxu0  ;;  %1725 = vmatprep.subr.mxu0 %v5970_v55 }
 0x711   :  { %v1186_v63 = vmul.f32 0.17677669, %v6562_v62  ;;  %v1545_v62 = vld [vmem:[%s8720_s12 + $0x58] sm:$0xff] }
 0x712   :  { %v1176_v0 = vpop.f32.mrf.mxu0 }
 0x713   :  { %v1185_v1 = vmul.f32 0.17677669, %v1176_v0  ;;  %v1188_v4 = vadd.f32 %v1186_v63, %v7523_v17  ;;  %v1544_v63 = vld [vmem:[%s8720_s12 + $0x50] sm:$0xff]  ;;  %v1543_v0 = vld [vmem:[%s8720_s12 + $0x48] sm:$0xff] }
 0x715   :  { %v1192_v5 = vsel %vm578_vm11, %v1188_v4, -inf  ;;  %v1187_v6 = vadd.f32 %v1185_v1, %v7662_v34  ;;  %v1542_v1 = vld [vmem:[%s8720_s12 + $0x40] sm:$0xff] }
 0x716   :  { %1193 = vmax.xlane.f32.xlu1 %v1192_v5  ;;  %v1540_v5 = vld [vmem:[%s8720_s12 + $0x30] sm:$0xff] }
 0x717   :  { %v1189_v7 = vsel %vm578_vm11, %v1187_v6, -inf }
 0x718   :  { %1190 = vmax.xlane.f32.xlu0 %v1189_v7  ;;  %v1538_v7 = vld [vmem:[%s8720_s12 + $0x20] sm:$0xff] }
 0x727   :  { %1213 = vrot.lane.b32.xlu1 %v7653_v29, %s7357_s27 }
 0x79f   :  { %v1194_v10 = vpop.xlane.xlu1 %1193 }
 0x7a0   :  { %v1196_v11 = vsub.f32 %v1188_v4, %v1194_v10  ;;  %v1541_v4 = vld [vmem:[%s8720_s12 + $0x38] sm:$0xff] }
 0x7a1   :  { %v1191_v18 = vpop.xlane.xlu0 %1190 }
 0x7a2   :  { %v1199_v19 = vmul.f32 1.442695, %v1196_v11  ;;  %v1195_v20 = vsub.f32 %v1187_v6, %v1191_v18  ;;  %v1539_v6 = vld [vmem:[%s8720_s12 + $0x28] sm:$0xff] }
 0x7a3   :  { %v1214_v21 = vpop.permute.xlu1 %1213 }
 0x7a4   :  { %7056 = vpow2.f32 %v1199_v19  ;;  %v1197_v22 = vmul.f32 1.442695, %v1195_v20  ;;  %6563 = vmatprep.subr.mxu1 %v1214_v21 }
 0x7a5   :  { %6564 = vmatpush3.msra.mxu1 %v1214_v21 }
 0x7a6   :  { %7058 = vpow2.f32 %v1197_v22 }
 0x7b1   :  { %v7057_v24 = vpop.eup %7056 }
 0x7b2   :  { %v1204_v25 = vsel %vm578_vm11, %v7057_v24, 0.0 }
 0x7b3   :  { %v7059_v26 = vpop.eup %7058  ;;  %1205 = vadd.xlane.f32.xlu0 %v1204_v25 }
 0x7b4   :  { %v1201_v27 = vsel %vm578_vm11, %v7059_v26, 0.0 }
 0x7b7   :  { %1202 = vadd.xlane.f32.xlu0 %v1201_v27 }
 0x7cd   :  { %1211 = vrot.lane.b32.xlu0 %v7659_v32, %s7357_s27  ;;  %v1302_v32 = vld [vmem:[%s8712_s4 + $0x10] sm:$0xff] }
 0x83c   :  { %v1206_v29 = vpop.xlane.xlu0 %1205 }
 0x83d   :  { %7060 = vrcp.f32 %v1206_v29 }
 0x840   :  { %v1203_v28 = vpop.xlane.xlu0 %1202 }
 0x841   :  { %7062 = vrcp.f32 %v1203_v28  ;;  %v5952_v28 = vld [vmem:[#allocation7] ss:$0 sm:$0xff] }
 0x844   :  { %v1212_v33 = vpop.permute.xlu0 %1211 }
 0x845   :  { %6565 = vmatprep.subr.mxu1 %v1212_v33 }
 0x846   :  { %6566 = vmatpush3.msra.mxu1 %v1212_v33 }
 0x847   :  { %6570 = vmatprep.subr.mxu1 %v1303_v35 }
 0x84a   :  { %v7061_v36 = vpop.eup %7060 }
 0x84b   :  { %v1210_v2 = vmul.f32 %v7061_v36, %v7057_v24  ;;  %v5951_v24 = vld [vmem:[#allocation5] ss:$0 sm:$0xff] }
 0x84e   :  { %v7063_v37 = vpop.eup %7062 }
 0x84f   :  { %v1209_v3 = vmul.f32 %v7063_v37, %v7059_v26  ;;  %v1537_v37 = vld [vmem:[%s8720_s12 + $0x18] sm:$0xff] }
 0x851   :  { %6567 = vmatprep.mubr.msk.f32.mxu1 %vm578_vm11, %v1209_v3  ;;  %v1536_v3 = vld [vmem:[%s8720_s12 + $0x10] sm:$0xff] }
 0x852   :  { %6568 = vmatmul.mubr.msk.f32.vlgmr.msra.gmra.mxu1 %vm578_vm11, %v1210_v2  ;;  %v1535_v2 = vld [vmem:[%s8720_s12 + $0x8] sm:$0xff] }
 0x853   :  { %6571 = vmatpush3.msra.mxu1 %v1303_v35 }
 0x854   :  { %6572 = vmatprep.subr.mxu1 %v1302_v32 }
 0x855   :  { %6573 = vmatpush3.msra.mxu1 %v1302_v32  ;;  %v1534_v32 = vld [vmem:[%s8720_s12] sm:$0xff] }
 0x856   :  { %6574 = vmatprep.subr.mxu1 %v1301_v13 }
 0x857   :  { %6575 = vmatpush3.msra.mxu1 %v1301_v13  ;;  %v5953_v13 = vld [vmem:[#allocation8] ss:$0 sm:$0xff] }
 0x858   :  { %6576 = vmatprep.subr.mxu1 %v1300_v8 }
 0x859   :  { %6577 = vmatpush3.msra.mxu1 %v1300_v8 }
 0x85a   :  { %6592 = vmatprep.subr.mxu1 %v1549_v58 }
 0x912   :  { %v6569_v9 = vpop.f32.mrf.mxu1 }
 0x913   :  { %v1299_v12 = vadd.f32 %v6569_v9, %v1093_v59  ;;  %v1548_v59 = vld [vmem:[%s8720_s12 + $0x70] sm:$0xff] }
 0x914   :  { %v1289_v15 = vpop.f32.mrf.mxu1 }
 0x915   :  { %v1298_v38 = vadd.f32 %v1289_v15, %v1092_v61  ;;  %v1546_v61 = vld [vmem:[%s8720_s12 + $0x60] sm:$0xff] }
 0x917   :  { %6578 = vmatprep.mubr.msk.f32.mxu1 %vm273_vm7, %v1298_v38 }
 0x918   :  { %6579 = vmatmul.mubr.msk.f32.vlgmr.msra.gmra.mxu1 %vm273_vm7, %v1299_v12 }
 0x919   :  { %6593 = vmatpush3.msra.mxu1 %v1549_v58  ;;  %v5966_v58 = vld [vmem:[%s8711_s3 + $0x90] sm:$0xff] }
 0x91a   :  { %6594 = vmatprep.subr.mxu1 %v1548_v59 }
 0x91b   :  { %6595 = vmatpush3.msra.mxu1 %v1548_v59  ;;  %v5964_v59 = vld [vmem:[%s8711_s3 + $0x80] sm:$0xff] }
 0x91c   :  { %6596 = vmatprep.subr.mxu1 %v1547_v60 }
 0x91d   :  { %6597 = vmatpush3.msra.mxu1 %v1547_v60  ;;  %v5963_v60 = vld [vmem:[%s8711_s3 + $0x78] sm:$0xff] }
 0x91e   :  { %6598 = vmatprep.subr.mxu1 %v1546_v61 }
 0x91f   :  { %6599 = vmatpush3.msra.mxu1 %v1546_v61  ;;  %v5961_v61 = vld [vmem:[%s8711_s3 + $0x68] sm:$0xff] }
 0x920   :  { %6600 = vmatprep.subr.mxu1 %v1545_v62 }
 0x921   :  { %6601 = vmatpush3.msra.mxu1 %v1545_v62  ;;  %v5960_v62 = vld [vmem:[%s8711_s3 + $0x60] sm:$0xff] }
 0x922   :  { %6602 = vmatprep.subr.mxu1 %v1544_v63 }
 0x923   :  { %6603 = vmatpush3.msra.mxu1 %v1544_v63  ;;  %v5971_v63 = vld [vmem:[%s8711_s3 + $0xb8] sm:$0xff] }
 0x924   :  { %6604 = vmatprep.subr.mxu1 %v1543_v0 }
 0x925   :  { %6605 = vmatpush3.msra.mxu1 %v1543_v0 }
 0x926   :  { %6606 = vmatprep.subr.mxu1 %v1542_v1 }
 0x927   :  { %6607 = vmatpush3.msra.mxu1 %v1542_v1 }
 0x928   :  { %6608 = vmatprep.subr.mxu1 %v1541_v4 }
 0x929   :  { %6609 = vmatpush3.msra.mxu1 %v1541_v4 }
 0x92a   :  { %6610 = vmatprep.subr.mxu1 %v1540_v5 }
 0x92b   :  { %6611 = vmatpush3.msra.mxu1 %v1540_v5 }
 0x92c   :  { %6612 = vmatprep.subr.mxu1 %v1539_v6 }
 0x92d   :  { %6613 = vmatpush3.msra.mxu1 %v1539_v6 }
 0x92e   :  { %6614 = vmatprep.subr.mxu1 %v1538_v7 }
 0x92f   :  { %6615 = vmatpush3.msra.mxu1 %v1538_v7 }
 0x930   :  { %6616 = vmatprep.subr.mxu1 %v1537_v37 }
 0x931   :  { %6617 = vmatpush3.msra.mxu1 %v1537_v37 }
 0x932   :  { %6618 = vmatprep.subr.mxu1 %v1536_v3 }
 0x933   :  { %6619 = vmatpush3.msra.mxu1 %v1536_v3 }
 0x934   :  { %6620 = vmatprep.subr.mxu1 %v1535_v2 }
 0x935   :  { %6621 = vmatpush3.msra.mxu1 %v1535_v2 }
 0x936   :  { %6622 = vmatprep.subr.mxu1 %v1534_v32 }
 0x937   :  { %6623 = vmatpush3.msra.mxu1 %v1534_v32 }
 0x9d8   :  { %v6580_v16 = vpop.f32.mrf.mxu1 }
 0x9d9   :  { %v1386_v40 = vadd.f32 %v6580_v16, %v7549_v31 }
 0x9da   :  { %v1376_v41 = vpop.f32.mrf.mxu1 }
 0x9db   :  { %v7752_v14 = vadd.f32 %v5950_v39, %v1386_v40  ;;  %v1385_v42 = vadd.f32 %v1376_v41, %v7547_v30  ;;  %v5956_v40 = vld [vmem:[#allocation10] ss:$0 sm:$0xff] }
 0x9dd   :  { %v7755_v43 = vadd.f32 %v5950_v39, %v1385_v42  ;;  %v1401_v44 = vsel %vm273_vm7, %v7752_v14, 0.0 }
 0x9de   :  { %1402 = vadd.xlane.f32.xlu0 %v1401_v44 }
 0x9df   :  { %v1398_v45 = vsel %vm273_vm7, %v7755_v43, 0.0 }
 0x9e0   :  { %1399 = vadd.xlane.f32.xlu1 %v1398_v45 }
 0xa67   :  { %v1403_v46 = vpop.xlane.xlu0 %1402 }
 0xa68   :  { %v1405_v47 = vmul.f32 0.03125, %v1403_v46 }
 0xa69   :  { %v1400_v48 = vpop.xlane.xlu1 %1399 }
 0xa6a   :  { %v7762_v31 = vsub.f32 %v7752_v14, %v1405_v47  ;;  %v1404_v49 = vmul.f32 0.03125, %v1400_v48 }
 0xa6c   :  { %v7765_v50 = vsub.f32 %v7755_v43, %v1404_v49  ;;  %v1409_v30 = vmul.f32 %v7762_v31, %v7762_v31 }
 0xa6e   :  { %v1413_v51 = vsel %vm273_vm7, %v1409_v30, 0.0  ;;  %v1408_v52 = vmul.f32 %v7765_v50, %v7765_v50 }
 0xa6f   :  { %1414 = vadd.xlane.f32.xlu0 %v1413_v51 }
 0xa70   :  { %v1410_v53 = vsel %vm273_vm7, %v1408_v52, 0.0 }
 0xa71   :  { %1411 = vadd.xlane.f32.xlu1 %v1410_v53 }
 0xaf8   :  { %v1415_v10 = vpop.xlane.xlu0 %1414 }
 0xaf9   :  { %v1417_v11 = vmul.f32 0.03125, %v1415_v10 }
 0xafa   :  { %v1412_v18 = vpop.xlane.xlu1 %1411 }
 0xafb   :  { %v1419_v19 = vadd.f32 1e-05, %v1417_v11  ;;  %v1416_v20 = vmul.f32 0.03125, %v1412_v18 }
 0xafd   :  { %7064 = vrsqrt.f32 %v1419_v19  ;;  %v1418_v21 = vadd.f32 1e-05, %v1416_v20  ;;  %v5958_v20 = vld [vmem:[%s8714_s6 + $0x1] ss:$0 sm:$0xff] }
 0xaff   :  { %7066 = vrsqrt.f32 %v1418_v21 }
 0xb0a   :  { %v7065_v22 = vpop.eup %7064 }
 0xb0b   :  { %v1423_v25 = vmul.f32 %v7065_v22, %v7762_v31  ;;  %v5959_v22 = vld [vmem:[#allocation2 + $0x1] ss:$0 sm:$0xff] }
 0xb0c   :  { %v7067_v26 = vpop.eup %7066 }
 0xb0d   :  { %v1422_v27 = vmul.f32 %v7067_v26, %v7765_v50  ;;  %v1431_v29 = vmul.f32 %v5951_v24, %v1423_v25  ;;  %v5968_v26 = vld [vmem:[%s8711_s3 + $0xa0] sm:$0xff] }
 0xb0f   :  { %v1430_v33 = vmul.f32 %v5951_v24, %v1422_v27  ;;  %v1439_v36 = vadd.f32 %v5952_v28, %v1431_v29  ;;  %v5965_v27 = vld [vmem:[%s8711_s3 + $0x88] sm:$0xff] }
 0xb11   :  { %v1438_v35 = vadd.f32 %v5952_v28, %v1430_v33  ;;  %v5962_v28 = vld [vmem:[%s8711_s3 + $0x70] sm:$0xff] }
 0xb13   :  { %6589 = vmatprep.mubr.msk.f32.mxu0 %vm273_vm7, %v1438_v35 }
 0xb14   :  { %6590 = vmatmul.mubr.msk.f32.vlgmr.msra.gmra.mxu0 %vm273_vm7, %v1439_v36 }
 0xb15   :  { %1765 = vmatprep.mubr.f32.mxu0 %v7354_v23  ;;  %1726 = vmatpush1.msra.mxu0 %v5969_v56 }
 0xb16   :  { %1727 = vmatprep.subr.mxu0 %v5967_v57 }
 0xb17   :  { %1728 = vmatpush1.msra.mxu0 %v5966_v58 }
 0xb18   :  { %1729 = vmatprep.subr.mxu0 %v5964_v59 }
 0xb19   :  { %1730 = vmatpush1.msra.mxu0 %v5963_v60 }
 0xb1a   :  { %1731 = vmatprep.subr.mxu0 %v5961_v61 }
 0xb1b   :  { %1732 = vmatpush1.msra.mxu0 %v5960_v62 }
 0xb1c   :  { %6627 = vmatprep.subr.mxu0 %v5971_v63 }
 0xbd4   :  { %v6591_v8 = vpop.f32.mrf.mxu0 }
 0xbd5   :  { %v1529_v9 = vadd.f32 %v6591_v8, %v5953_v13 }
 0xbd6   :  { %v1523_v15 = vpop.f32.mrf.mxu0 }
 0xbd7   :  { %v1524_v38 = vadd.f32 %v5953_v13, %v1523_v15  ;;  %v1533_v16 = vmax.f32 %v1529_v9, 0.0 }
 0xbd9   :  { %v1532_v12 = vmax.f32 %v1524_v38, 0.0 }
 0xbdb   :  { %6624 = vmatprep.mubr.f32.mxu1 %v1532_v12 }
 0xbdc   :  { %6625 = vmatmul.mubr.f32.vlgmr.msra.gmra.mxu1 %v1533_v16 }
 0xc9c   :  { %v6626_v39 = vpop.f32.mrf.mxu1 }
 0xc9d   :  { %v1626_v41 = vadd.f32 %v6626_v39, %v7752_v14 }
 0xc9e   :  { %v1616_v42 = vpop.f32.mrf.mxu1 }
 0xc9f   :  { %v7839_v44 = vadd.f32 %v5956_v40, %v1626_v41  ;;  %v1625_v45 = vadd.f32 %v1616_v42, %v7755_v43 }
 0xca1   :  { %v7842_v46 = vadd.f32 %v5956_v40, %v1625_v45  ;;  %v1643_v47 = vsel %vm273_vm7, %v7839_v44, 0.0 }
 0xca2   :  { %1644 = vadd.xlane.f32.xlu0 %v1643_v47 }
 0xca3   :  { %v1640_v48 = vsel %vm273_vm7, %v7842_v46, 0.0 }
 0xca4   :  { %1641 = vadd.xlane.f32.xlu1 %v1640_v48 }
 0xd2b   :  { %v1645_v31 = vpop.xlane.xlu0 %1644 }
 0xd2c   :  { %v1647_v49 = vmul.f32 0.03125, %v1645_v31 }
 0xd2d   :  { %v1642_v50 = vpop.xlane.xlu1 %1641 }
 0xd2e   :  { %v1649_v14 = vsub.f32 %v7839_v44, %v1647_v49  ;;  %v1646_v30 = vmul.f32 0.03125, %v1642_v50 }
 0xd30   :  { %v1648_v51 = vsub.f32 %v7842_v46, %v1646_v30  ;;  %v1651_v52 = vmul.f32 %v1649_v14, %v1649_v14 }
 0xd32   :  { %v1655_v43 = vsel %vm273_vm7, %v1651_v52, 0.0  ;;  %v1650_v53 = vmul.f32 %v1648_v51, %v1648_v51 }
 0xd33   :  { %1656 = vadd.xlane.f32.xlu0 %v1655_v43 }
 0xd34   :  { %v1652_v54 = vsel %vm273_vm7, %v1650_v53, 0.0 }
 0xd35   :  { %1653 = vadd.xlane.f32.xlu1 %v1652_v54 }
 0xdbc   :  { %v1657_v0 = vpop.xlane.xlu0 %1656 }
 0xdbd   :  { %v1659_v1 = vmul.f32 0.03125, %v1657_v0 }
 0xdbe   :  { %v1654_v4 = vpop.xlane.xlu1 %1653 }
 0xdbf   :  { %v1661_v5 = vadd.f32 1e-05, %v1659_v1  ;;  %v1658_v6 = vmul.f32 0.03125, %v1654_v4 }
 0xdc1   :  { %7068 = vrsqrt.f32 %v1661_v5  ;;  %v1660_v7 = vadd.f32 1e-05, %v1658_v6 }
 0xdc3   :  { %7070 = vrsqrt.f32 %v1660_v7 }
 0xdce   :  { %v7069_v10 = vpop.eup %7068 }
 0xdcf   :  { %v1665_v19 = vmul.f32 %v7069_v10, %v1649_v14 }
 0xdd0   :  { %v7071_v11 = vpop.eup %7070 }
 0xdd1   :  { %v1664_v18 = vmul.f32 %v7071_v11, %v1648_v51  ;;  %v1673_v25 = vmul.f32 %v5958_v20, %v1665_v19 }
 0xdd3   :  { %v1672_v21 = vmul.f32 %v5958_v20, %v1664_v18  ;;  %v1681_v29 = vadd.f32 %v5959_v22, %v1673_v25 }
 0xdd5   :  { %v1680_v24 = vadd.f32 %v5959_v22, %v1672_v21 }
 0xdd7   :  { %5972 = vmatmul.mubr.msk.f32.vlgmr.msra.gmra.mxu0 %vm273_vm7, %v1680_v24 }
 0xdd8   :  { %6628 = vmatpush3.msra.mxu0 %v5971_v63  ;;  %1771 = vmatprep.mubr.f32.mxu0 %v7354_v23 }
 0xdd9   :  { %6629 = vmatprep.subr.mxu0 %v5968_v26 }
 0xdda   :  { %6630 = vmatpush3.msra.mxu0 %v5968_v26 }
 0xddb   :  { %5973 = vmatmul.mubr.msk.f32.gmra.mxu0 %vm273_vm7, %v1681_v29  ;;  %6631 = vmatprep.subr.mxu0 %v5965_v27 }
 0xddc   :  { %6632 = vmatpush3.msra.mxu0 %v5965_v27  ;;  %6635 = vmatprep.mubr.msk.f32.mxu0 %vm273_vm7, %v1680_v24 }
 0xddd   :  { %6633 = vmatprep.subr.mxu0 %v5962_v28 }
 0xdde   :  { %6634 = vmatpush3.msra.mxu0 %v5962_v28 }
 0xddf   :  { %6636 = vmatmul.mubr.msk.f32.vlgmr.msra.gmra.mxu0 %vm273_vm7, %v1681_v29 }
 0xe97   :  { %v7896_v33 = vpop.f32.mrf.mxu0 }
 0xe98   :  { %6642 = vmatprep.mubr.msk.f32.mxu0 %vm273_vm7, %v7896_v33 }
 0xe99   :  { %v7900_v35 = vpop.f32.mrf.mxu0 }
 0xe9a   :  { %1970 = vrot.lane.b32.xlu0 %v7900_v35, %s7355_s24 }
 0xe9b   :  { %v7904_v36 = vpop.f32.mrf.mxu0 }
 0xe9d   :  { %v7906_v37 = vpop.f32.mrf.mxu0 }
 0xe9e   :  { %1972 = vrot.lane.b32.xlu1 %v7906_v37, %s7355_s24  ;;  %6638 = vmatprep.subr.msk.mxu0 %vm273_vm7, %v7906_v37 }
 0xe9f   :  { %6639 = vmatpush3.xpose.msk.msra.mxu0 %vm273_vm7, %v7906_v37  ;;  %v7928_v13 = vpop.f32.mrf.mxu0 }
 0xea0   :  { %6640 = vmatprep.subr.msk.mxu0 %vm273_vm7, %v7900_v35 }
 0xea1   :  { %v7933_v9 = vpop.f32.mrf.mxu0 }
 0xea2   :  { %1966 = vrot.lane.b32.xlu1 %v7896_v33, %s7355_s24 }
 0xea3   :  { %6641 = vmatpush3.xpose.msk.msra.mxu0 %vm273_vm7, %v7900_v35 }
 0xea6   :  { %1968 = vrot.lane.b32.xlu1 %v7904_v36, %s7355_s24  ;;  %6643 = vmatmul.mubr.msk.f32.vlgmr.msra.gmra.mxu0 %vm273_vm7, %v7904_v36 }
 0xf0c   :  { %v1971_v2 = vpop.permute.xlu0 %1970 }
 0xf10   :  { %v1973_v3 = vpop.permute.xlu1 %1972 }
 0xf11   :  { %6645 = vmatprep.subr.msk.mxu0 %vm273_vm7, %v1973_v3 }
 0xf12   :  { %6646 = vmatpush3.xpose.msk.msra.mxu0 %vm273_vm7, %v1973_v3 }
 0xf13   :  { %6647 = vmatprep.subr.msk.mxu0 %vm273_vm7, %v1971_v2 }
 0xf14   :  { %v1967_v32 = vpop.permute.xlu1 %1966 }
 0xf15   :  { %6649 = vmatprep.mubr.msk.f32.mxu0 %vm273_vm7, %v1967_v32 }
 0xf16   :  { %6648 = vmatpush3.xpose.msk.msra.mxu0 %vm273_vm7, %v1971_v2 }
 0xf17   :  { %6659 = vmatprep.subr.mxu0 %v7928_v13 }
 0xf18   :  { %v1969_v8 = vpop.permute.xlu1 %1968 }
 0xf19   :  { %6650 = vmatmul.mubr.msk.f32.vlgmr.msra.gmra.mxu0 %vm273_vm7, %v1969_v8 }
 0xf1a   :  { %6660 = vmatpush3.msra.mxu0 %v7928_v13 }
 0xf1b   :  { %6661 = vmatprep.subr.mxu0 %v7933_v9 }
 0xf1c   :  { %6662 = vmatpush3.msra.mxu0 %v7933_v9 }
 0xf66   :  { %v6644_v15 = vpop.f32.mrf.mxu0 }
 0xf67   :  { %v1941_v48 = vmul.f32 0.17677669, %v6644_v15 }
 0xf68   :  { %v1931_v38 = vpop.f32.mrf.mxu0 }
 0xf69   :  { %v1943_v31 = vadd.f32 %v1941_v48, %v7523_v17  ;;  %v1940_v58 = vmul.f32 0.17677669, %v1931_v38 }
 0xf6b   :  { %v1947_v49 = vsel %vm578_vm11, %v1943_v31, -inf  ;;  %v1942_v59 = vadd.f32 %v1940_v58, %v7662_v34 }
 0xf6d   :  { %v1944_v60 = vsel %vm578_vm11, %v1942_v59, -inf }
 0xfd9   :  { %v6651_v12 = vpop.f32.mrf.mxu0 }
 0xfda   :  { %v2058_v16 = vmul.f32 0.17677669, %v6651_v12 }
 0xfdb   :  { %v2048_v39 = vpop.f32.mrf.mxu0 }
 0xfdc   :  { %v2057_v40 = vmul.f32 0.17677669, %v2048_v39  ;;  %v2060_v41 = vadd.f32 %v2058_v16, %v7523_v17 }
 0xfde   :  { %v2064_v42 = vsel %vm578_vm11, %v2060_v41, -inf  ;;  %v2059_v45 = vadd.f32 %v2057_v40, %v7662_v34 }
 0xfdf   :  { %2065 = vmax.xlane.f32.xlu1 %v2064_v42 }
 0xfe0   :  { %v2061_v47 = vsel %vm578_vm11, %v2059_v45, -inf }
 0xfe1   :  { %2062 = vmax.xlane.f32.xlu0 %v2061_v47 }
 0xff0   :  { %2087 = vrot.lane.b32.xlu1 %v7928_v13, %s7355_s24 }
 0xff4   :  { %2259 = vrot.lane.b32.xlu1 %v7906_v37, %s7356_s9 }
 0xff8   :  { %2257 = vrot.lane.b32.xlu1 %v7900_v35, %s7356_s9 }
 0xffc   :  { %2255 = vrot.lane.b32.xlu1 %v7904_v36, %s7356_s9 }
0x1020   :  { %1948 = vmax.xlane.f32.xlu1 %v1947_v49 }
0x1068   :  { %v2066_v50 = vpop.xlane.xlu1 %2065 }
0x1069   :  { %v2068_v14 = vsub.f32 %v2060_v41, %v2066_v50 }
0x106a   :  { %v2063_v30 = vpop.xlane.xlu0 %2062 }
0x106b   :  { %v2071_v51 = vmul.f32 1.442695, %v2068_v14  ;;  %v2067_v52 = vsub.f32 %v2059_v45, %v2063_v30 }
0x106c   :  { %v2088_v43 = vpop.permute.xlu1 %2087 }
0x106d   :  { %7072 = vpow2.f32 %v2071_v51  ;;  %v2069_v53 = vmul.f32 1.442695, %v2067_v52  ;;  %6652 = vmatprep.subr.mxu1 %v2088_v43 }
0x106e   :  { %6653 = vmatpush3.msra.mxu1 %v2088_v43 }
0x106f   :  { %7074 = vpow2.f32 %v2069_v53 }
0x1070   :  { %v2260_v0 = vpop.permute.xlu1 %2259 }
0x1074   :  { %v2258_v10 = vpop.permute.xlu1 %2257 }
0x1078   :  { %v2256_v11 = vpop.permute.xlu1 %2255 }
0x107a   :  { %v7073_v54 = vpop.eup %7072 }
0x107b   :  { %v2076_v55 = vsel %vm578_vm11, %v7073_v54, 0.0 }
0x107c   :  { %v7075_v56 = vpop.eup %7074  ;;  %2077 = vadd.xlane.f32.xlu0 %v2076_v55 }
0x107d   :  { %v2073_v57 = vsel %vm578_vm11, %v7075_v56, 0.0 }
0x1080   :  { %2074 = vadd.xlane.f32.xlu0 %v2073_v57 }
0x1096   :  { %2085 = vrot.lane.b32.xlu0 %v7933_v9, %s7355_s24 }
0x109a   :  { %2253 = vrot.lane.b32.xlu0 %v7896_v33, %s7356_s9 }
0x10a9   :  { %v1949_v24 = vpop.xlane.xlu1 %1948 }
0x10aa   :  { %v1951_v25 = vsub.f32 %v1943_v31, %v1949_v24 }
0x10ac   :  { %v1954_v27 = vmul.f32 1.442695, %v1951_v25 }
0x10b9   :  { %1945 = vmax.xlane.f32.xlu0 %v1944_v60 }
0x1105   :  { %v2078_v61 = vpop.xlane.xlu0 %2077 }
0x1106   :  { %7076 = vrcp.f32 %v2078_v61 }
0x1109   :  { %v2075_v62 = vpop.xlane.xlu0 %2074 }
0x110a   :  { %7078 = vrcp.f32 %v2075_v62 }
0x110d   :  { %v2086_v63 = vpop.permute.xlu0 %2085 }
0x110e   :  { %6654 = vmatprep.subr.mxu1 %v2086_v63 }
0x110f   :  { %6655 = vmatpush3.msra.mxu1 %v2086_v63 }
0x1110   :  { %6666 = vmatprep.subr.msk.mxu1 %vm273_vm7, %v2260_v0 }
0x1111   :  { %v2254_v7 = vpop.permute.xlu0 %2253 }
0x1113   :  { %v7077_v1 = vpop.eup %7076 }
0x1114   :  { %v2082_v6 = vmul.f32 %v7077_v1, %v7073_v54 }
0x1117   :  { %v7079_v4 = vpop.eup %7078 }
0x1118   :  { %v2081_v5 = vmul.f32 %v7079_v4, %v7075_v56 }
0x111a   :  { %6656 = vmatprep.mubr.msk.f32.mxu1 %vm578_vm11, %v2081_v5 }
0x111b   :  { %6657 = vmatmul.mubr.msk.f32.vlgmr.msra.gmra.mxu1 %vm578_vm11, %v2082_v6 }
0x111c   :  { %6667 = vmatpush3.xpose.msk.msra.mxu1 %vm273_vm7, %v2260_v0  ;;  %6670 = vmatprep.mubr.msk.f32.mxu1 %vm273_vm7, %v2254_v7 }
0x111d   :  { %6668 = vmatprep.subr.msk.mxu1 %vm273_vm7, %v2258_v10 }
0x1120   :  { %6669 = vmatpush3.xpose.msk.msra.mxu1 %vm273_vm7, %v2258_v10 }
0x1123   :  { %6671 = vmatmul.mubr.msk.f32.vlgmr.msra.gmra.mxu1 %vm273_vm7, %v2256_v11 }
0x1142   :  { %v1946_v18 = vpop.xlane.xlu0 %1945 }
0x1143   :  { %v1950_v19 = vsub.f32 %v1942_v59, %v1946_v18 }
0x1145   :  { %v1952_v20 = vmul.f32 1.442695, %v1950_v19 }
0x1147   :  { %7080 = vpow2.f32 %v1952_v20 }
0x1154   :  { %v7081_v21 = vpop.eup %7080 }
0x1155   :  { %v1956_v22 = vsel %vm578_vm11, %v7081_v21, 0.0 }
0x1156   :  { %1957 = vadd.xlane.f32.xlu1 %v1956_v22 }
0x1167   :  { %2372 = vrot.lane.b32.xlu1 %v7928_v13, %s7356_s9 }
0x116b   :  { %2465 = vrot.lane.b32.xlu1 %v7906_v37, %s7357_s27 }
0x116f   :  { %2463 = vrot.lane.b32.xlu1 %v7900_v35, %s7357_s27 }
0x11db   :  { %v7975_v26 = vpop.f32.mrf.mxu1 }
0x11dd   :  { %v7977_v28 = vpop.f32.mrf.mxu1 }
0x11df   :  { %v1958_v29 = vpop.xlane.xlu1 %1957 }
0x11e0   :  { %7082 = vrcp.f32 %v1958_v29 }
0x11e1   :  { %7084 = vpow2.f32 %v1954_v27 }
0x11e3   :  { %v6672_v3 = vpop.f32.mrf.mxu1  ;;  %v2373_v2 = vpop.permute.xlu1 %2372 }
0x11e4   :  { %6673 = vmatprep.subr.mxu0 %v2373_v2  ;;  %v2345_v8 = vmul.f32 0.17677669, %v6672_v3 }
0x11e5   :  { %v2335_v32 = vpop.f32.mrf.mxu1 }
0x11e6   :  { %v2344_v15 = vmul.f32 0.17677669, %v2335_v32  ;;  %v2347_v38 = vadd.f32 %v2345_v8, %v7523_v17 }
0x11e7   :  { %v2466_v54 = vpop.permute.xlu1 %2465 }
0x11e8   :  { %v2346_v37 = vadd.f32 %v2344_v15, %v7662_v34  ;;  %v2351_v16 = vsel %vm578_vm11, %v2347_v38, -inf }
0x11ea   :  { %v2348_v35 = vsel %vm578_vm11, %v2346_v37, -inf }
0x11eb   :  { %2349 = vmax.xlane.f32.xlu0 %v2348_v35  ;;  %v2464_v55 = vpop.permute.xlu1 %2463 }
0x11ed   :  { %v7083_v12 = vpop.eup %7082 }
0x11ee   :  { %v1964_v39 = vmul.f32 %v7083_v12, %v7081_v21  ;;  %v7085_v40 = vpop.eup %7084  ;;  %v6003_v12 = vld [vmem:[%s8712_s4 + $0x38] sm:$0xff] }
0x11ef   :  { %2352 = vmax.xlane.f32.xlu0 %v2351_v16  ;;  %v1959_v41 = vsel %vm578_vm11, %v7085_v40, 0.0 }
0x11f0   :  { %6663 = vmatprep.mubr.msk.f32.mxu0 %vm578_vm11, %v1964_v39 }
0x11f3   :  { %1960 = vadd.xlane.f32.xlu0 %v1959_v41 }
0x1274   :  { %v2350_v42 = vpop.xlane.xlu0 %2349 }
0x1275   :  { %v2354_v45 = vsub.f32 %v2346_v37, %v2350_v42  ;;  %v6001_v42 = vld [vmem:[%s8712_s4 + $0x28] sm:$0xff] }
0x1277   :  { %v2356_v47 = vmul.f32 1.442695, %v2354_v45  ;;  %v6000_v45 = vld [vmem:[%s8712_s4 + $0x20] sm:$0xff] }
0x1278   :  { %v2353_v48 = vpop.xlane.xlu0 %2352 }
0x1279   :  { %7086 = vpow2.f32 %v2356_v47  ;;  %v2355_v31 = vsub.f32 %v2347_v38, %v2353_v48 }
0x127b   :  { %v2358_v49 = vmul.f32 1.442695, %v2355_v31 }
0x127c   :  { %v1961_v50 = vpop.xlane.xlu0 %1960 }
0x127d   :  { %7088 = vpow2.f32 %v2358_v49 }
0x127e   :  { %7090 = vrcp.f32 %v1961_v50 }
0x1286   :  { %v7087_v14 = vpop.eup %7086 }
0x1287   :  { %v2360_v30 = vsel %vm578_vm11, %v7087_v14, 0.0 }
0x1288   :  { %2361 = vadd.xlane.f32.xlu1 %v2360_v30 }
0x128a   :  { %v7089_v51 = vpop.eup %7088 }
0x128b   :  { %v7091_v52 = vpop.eup %7090  ;;  %v2363_v43 = vsel %vm578_vm11, %v7089_v51, 0.0 }
0x128c   :  { %2364 = vadd.xlane.f32.xlu0 %v2363_v43  ;;  %v1965_v53 = vmul.f32 %v7091_v52, %v7085_v40 }
0x128e   :  { %6664 = vmatmul.mubr.msk.f32.vlgmr.msra.gmra.mxu0 %vm578_vm11, %v1965_v53 }
0x128f   :  { %6674 = vmatpush3.msra.mxu0 %v2373_v2 }
0x1299   :  { %2461 = vrot.lane.b32.xlu1 %v7904_v36, %s7357_s27 }
0x12a2   :  { %2370 = vrot.lane.b32.xlu0 %v7933_v9, %s7356_s9 }
0x12a6   :  { %2459 = vrot.lane.b32.xlu0 %v7896_v33, %s7357_s27 }
0x1311   :  { %v2362_v56 = vpop.xlane.xlu1 %2361 }
0x1312   :  { %7092 = vrcp.f32 %v2362_v56 }
0x1315   :  { %v2365_v57 = vpop.xlane.xlu0 %2364  ;;  %v2462_v33 = vpop.permute.xlu1 %2461 }
0x1316   :  { %7094 = vrcp.f32 %v2365_v57 }
0x1319   :  { %v2371_v58 = vpop.permute.xlu0 %2370 }
0x131a   :  { %6675 = vmatprep.subr.mxu0 %v2371_v58 }
0x131b   :  { %6676 = vmatpush3.msra.mxu0 %v2371_v58 }
0x131c   :  { %6680 = vmatprep.subr.msk.mxu0 %vm273_vm7, %v2466_v54 }
0x131d   :  { %v2460_v62 = vpop.permute.xlu0 %2459 }
0x131f   :  { %v7093_v59 = vpop.eup %7092 }
0x1320   :  { %v2368_v60 = vmul.f32 %v7093_v59, %v7087_v14 }
0x1322   :  { %6677 = vmatprep.mubr.msk.f32.mxu0 %vm578_vm11, %v2368_v60 }
0x1323   :  { %v7095_v36 = vpop.eup %7094 }
0x1324   :  { %v2369_v61 = vmul.f32 %v7095_v36, %v7089_v51  ;;  %v6007_v51 = vld [vmem:[%s8713_s5 + $0x1] ss:$0 sm:$0xff] }
0x1326   :  { %6678 = vmatmul.mubr.msk.f32.vlgmr.msra.gmra.mxu0 %vm578_vm11, %v2369_v61 }
0x1327   :  { %6681 = vmatpush3.xpose.msk.msra.mxu0 %vm273_vm7, %v2466_v54  ;;  %6684 = vmatprep.mubr.msk.f32.mxu0 %vm273_vm7, %v2460_v62 }
0x1328   :  { %6682 = vmatprep.subr.msk.mxu0 %vm273_vm7, %v2464_v55 }
0x132b   :  { %6683 = vmatpush3.xpose.msk.msra.mxu0 %vm273_vm7, %v2464_v55 }
0x132e   :  { %6685 = vmatmul.mubr.msk.f32.vlgmr.msra.gmra.mxu0 %vm273_vm7, %v2462_v33 }
0x134e   :  { %v6665_v63 = vpop.f32.mrf.mxu0 }
0x134f   :  { %v2250_v1 = vadd.f32 %v6665_v63, %v7975_v26  ;;  %v6013_v63 = vld [vmem:[%s8718_s10 + $0x38] sm:$0xff] }
0x1350   :  { %v2244_v0 = vpop.f32.mrf.mxu0  ;;  %6705 = vmatprep.subr.mxu0 %v6013_v63 }
0x1351   :  { %v2245_v47 = vadd.f32 %v2244_v0, %v7977_v28  ;;  %v6012_v0 = vld [vmem:[%s8718_s10 + $0x30] sm:$0xff]  ;;  %6706 = vmatpush3.msra.mxu0 %v6013_v63 }
0x1352   :  { %6707 = vmatprep.subr.mxu0 %v6012_v0 }
0x1353   :  { %6708 = vmatpush3.msra.mxu0 %v6012_v0  ;;  %v6047_v0 = vld [vmem:[%s8711_s3 + $0x110] sm:$0xff] }
0x13e6   :  { %v6679_v4 = vpop.f32.mrf.mxu0 }
0x13e7   :  { %v2458_v5 = vadd.f32 %v6679_v4, %v2250_v1  ;;  %v6011_v1 = vld [vmem:[%s8718_s10 + $0x28] sm:$0xff]  ;;  %v6010_v4 = vld [vmem:[%s8718_s10 + $0x20] sm:$0xff] }
0x13e8   :  { %v2448_v6 = vpop.f32.mrf.mxu0  ;;  %6709 = vmatprep.subr.mxu0 %v6011_v1 }
0x13e9   :  { %v2457_v31 = vadd.f32 %v2448_v6, %v2245_v47  ;;  %6710 = vmatpush3.msra.mxu0 %v6011_v1  ;;  %v6031_v6 = vld [vmem:[%s8720_s12 + $0xf0] sm:$0xff]  ;;  %v6014_v47 = vld [vmem:[#allocation8 + $0x1] ss:$0 sm:$0xff] }
0x13ea   :  { %6711 = vmatprep.subr.mxu0 %v6010_v4  ;;  %v6046_v1 = vld [vmem:[%s8711_s3 + $0x108] sm:$0xff] }
0x13eb   :  { %6712 = vmatpush3.msra.mxu0 %v6010_v4  ;;  %v6044_v4 = vld [vmem:[%s8711_s3 + $0xf8] sm:$0xff] }
0x13ec   :  { %3098 = vmatprep.subr.mxu0 %v6047_v0 }
0x13ee   :  { %v6686_v7 = vpop.f32.mrf.mxu0 }
0x13ef   :  { %v2551_v10 = vmul.f32 0.17677669, %v6686_v7  ;;  %v6030_v7 = vld [vmem:[%s8720_s12 + $0xe8] sm:$0xff] }
0x13f0   :  { %v2541_v11 = vpop.f32.mrf.mxu0 }
0x13f1   :  { %v2550_v18 = vmul.f32 0.17677669, %v2541_v11  ;;  %v2553_v19 = vadd.f32 %v2551_v10, %v7523_v17  ;;  %v6029_v10 = vld [vmem:[%s8720_s12 + $0xe0] sm:$0xff]  ;;  %v6028_v11 = vld [vmem:[%s8720_s12 + $0xd8] sm:$0xff] }
0x13f3   :  { %v2557_v20 = vsel %vm578_vm11, %v2553_v19, -inf  ;;  %v2552_v21 = vadd.f32 %v2550_v18, %v7662_v34  ;;  %v6027_v18 = vld [vmem:[%s8720_s12 + $0xd0] sm:$0xff] }
0x13f4   :  { %2558 = vmax.xlane.f32.xlu1 %v2557_v20  ;;  %v6025_v20 = vld [vmem:[%s8720_s12 + $0xc0] sm:$0xff] }
0x13f5   :  { %v2554_v22 = vsel %vm578_vm11, %v2552_v21, -inf }
0x13f6   :  { %2555 = vmax.xlane.f32.xlu0 %v2554_v22  ;;  %v6023_v22 = vld [vmem:[%s8720_s12 + $0xb0] sm:$0xff] }
0x1405   :  { %2578 = vrot.lane.b32.xlu1 %v7928_v13, %s7357_s27 }
0x147d   :  { %v2559_v24 = vpop.xlane.xlu1 %2558 }
0x147e   :  { %v2561_v25 = vsub.f32 %v2553_v19, %v2559_v24  ;;  %v6026_v19 = vld [vmem:[%s8720_s12 + $0xc8] sm:$0xff] }
0x147f   :  { %v2556_v26 = vpop.xlane.xlu0 %2555  ;;  %v6022_v24 = vld [vmem:[%s8720_s12 + $0xa8] sm:$0xff] }
0x1480   :  { %v2564_v27 = vmul.f32 1.442695, %v2561_v25  ;;  %v2560_v29 = vsub.f32 %v2552_v21, %v2556_v26  ;;  %v6024_v21 = vld [vmem:[%s8720_s12 + $0xb8] sm:$0xff]  ;;  %v6021_v25 = vld [vmem:[%s8720_s12 + $0xa0] sm:$0xff] }
0x1481   :  { %v2579_v3 = vpop.permute.xlu1 %2578 }
0x1482   :  { %7096 = vpow2.f32 %v2564_v27  ;;  %v2562_v2 = vmul.f32 1.442695, %v2560_v29  ;;  %6687 = vmatprep.subr.mxu1 %v2579_v3 }
0x1483   :  { %6688 = vmatpush3.msra.mxu1 %v2579_v3 }
0x1484   :  { %7098 = vpow2.f32 %v2562_v2 }
0x148f   :  { %v7097_v32 = vpop.eup %7096 }
0x1490   :  { %v2569_v8 = vsel %vm578_vm11, %v7097_v32, 0.0 }
0x1491   :  { %v7099_v15 = vpop.eup %7098  ;;  %2570 = vadd.xlane.f32.xlu0 %v2569_v8 }
0x1492   :  { %v2566_v37 = vsel %vm578_vm11, %v7099_v15, 0.0 }
0x1495   :  { %2567 = vadd.xlane.f32.xlu0 %v2566_v37 }
0x14ab   :  { %2576 = vrot.lane.b32.xlu0 %v7933_v9, %s7357_s27  ;;  %v6002_v9 = vld [vmem:[%s8712_s4 + $0x30] sm:$0xff] }
0x151a   :  { %v2571_v13 = vpop.xlane.xlu0 %2570 }
0x151b   :  { %7100 = vrcp.f32 %v2571_v13 }
0x151e   :  { %v2568_v35 = vpop.xlane.xlu0 %2567 }
0x151f   :  { %7102 = vrcp.f32 %v2568_v35 }
0x1522   :  { %v2577_v38 = vpop.permute.xlu0 %2576 }
0x1523   :  { %6689 = vmatprep.subr.mxu1 %v2577_v38 }
0x1524   :  { %6690 = vmatpush3.msra.mxu1 %v2577_v38 }
0x1525   :  { %6694 = vmatprep.subr.mxu1 %v6003_v12 }
0x1528   :  { %v7101_v16 = vpop.eup %7100 }
0x1529   :  { %v2575_v41 = vmul.f32 %v7101_v16, %v7097_v32 }
0x152c   :  { %v7103_v39 = vpop.eup %7102 }
0x152d   :  { %v2574_v40 = vmul.f32 %v7103_v39, %v7099_v15  ;;  %v6008_v15 = vld [vmem:[#allocation5 + $0x1] ss:$0 sm:$0xff] }
0x152f   :  { %6691 = vmatprep.mubr.msk.f32.mxu1 %vm578_vm11, %v2574_v40 }
0x1530   :  { %6692 = vmatmul.mubr.msk.f32.vlgmr.msra.gmra.mxu1 %vm578_vm11, %v2575_v41  ;;  %v6020_v41 = vld [vmem:[%s8720_s12 + $0x98] sm:$0xff] }
0x1531   :  { %6695 = vmatpush3.msra.mxu1 %v6003_v12  ;;  %v6009_v12 = vld [vmem:[#allocation7 + $0x1] ss:$0 sm:$0xff] }
0x1532   :  { %6696 = vmatprep.subr.mxu1 %v6002_v9 }
0x1533   :  { %6697 = vmatpush3.msra.mxu1 %v6002_v9  ;;  %v6019_v9 = vld [vmem:[%s8720_s12 + $0x90] sm:$0xff] }
0x1534   :  { %6698 = vmatprep.subr.mxu1 %v6001_v42 }
0x1535   :  { %6699 = vmatpush3.msra.mxu1 %v6001_v42  ;;  %v6018_v42 = vld [vmem:[%s8720_s12 + $0x88] sm:$0xff] }
0x1536   :  { %6700 = vmatprep.subr.mxu1 %v6000_v45 }
0x1537   :  { %6701 = vmatpush3.msra.mxu1 %v6000_v45  ;;  %v6017_v45 = vld [vmem:[%s8720_s12 + $0x80] sm:$0xff] }
0x15f0   :  { %v6693_v48 = vpop.f32.mrf.mxu1 }
0x15f1   :  { %v2664_v14 = vadd.f32 %v6693_v48, %v2458_v5  ;;  %v6032_v5 = vld [vmem:[%s8720_s12 + $0xf8] sm:$0xff] }
0x15f2   :  { %v2654_v49 = vpop.f32.mrf.mxu1  ;;  %6716 = vmatprep.subr.mxu1 %v6032_v5 }
0x15f3   :  { %v2663_v50 = vadd.f32 %v2654_v49, %v2457_v31 }
0x15f5   :  { %6702 = vmatprep.mubr.msk.f32.mxu1 %vm273_vm7, %v2663_v50 }
0x15f6   :  { %6703 = vmatmul.mubr.msk.f32.vlgmr.msra.gmra.mxu1 %vm273_vm7, %v2664_v14 }
0x15f7   :  { %6717 = vmatpush3.msra.mxu1 %v6032_v5  ;;  %v6043_v5 = vld [vmem:[%s8711_s3 + $0xf0] sm:$0xff] }
0x15f8   :  { %6718 = vmatprep.subr.mxu1 %v6031_v6 }
0x15f9   :  { %6719 = vmatpush3.msra.mxu1 %v6031_v6  ;;  %v6041_v6 = vld [vmem:[%s8711_s3 + $0xe0] sm:$0xff] }
0x15fa   :  { %6720 = vmatprep.subr.mxu1 %v6030_v7 }
0x15fb   :  { %6721 = vmatpush3.msra.mxu1 %v6030_v7  ;;  %v6040_v7 = vld [vmem:[%s8711_s3 + $0xd8] sm:$0xff] }
0x15fc   :  { %6722 = vmatprep.subr.mxu1 %v6029_v10 }
0x15fd   :  { %6723 = vmatpush3.msra.mxu1 %v6029_v10  ;;  %v6038_v10 = vld [vmem:[%s8711_s3 + $0xc8] sm:$0xff] }
0x15fe   :  { %6724 = vmatprep.subr.mxu1 %v6028_v11 }
0x15ff   :  { %6725 = vmatpush3.msra.mxu1 %v6028_v11  ;;  %v6037_v11 = vld [vmem:[%s8711_s3 + $0xc0] sm:$0xff] }
0x1600   :  { %6726 = vmatprep.subr.mxu1 %v6027_v18 }
0x1601   :  { %6727 = vmatpush3.msra.mxu1 %v6027_v18  ;;  %v6048_v18 = vld [vmem:[%s8711_s3 + $0x118] sm:$0xff] }
0x1602   :  { %6728 = vmatprep.subr.mxu1 %v6026_v19 }
0x1603   :  { %6729 = vmatpush3.msra.mxu1 %v6026_v19 }
0x1604   :  { %6730 = vmatprep.subr.mxu1 %v6025_v20 }
0x1605   :  { %6731 = vmatpush3.msra.mxu1 %v6025_v20 }
0x1606   :  { %6732 = vmatprep.subr.mxu1 %v6024_v21 }
0x1607   :  { %6733 = vmatpush3.msra.mxu1 %v6024_v21 }
0x1608   :  { %6734 = vmatprep.subr.mxu1 %v6023_v22 }
0x1609   :  { %6735 = vmatpush3.msra.mxu1 %v6023_v22 }
0x160a   :  { %6736 = vmatprep.subr.mxu1 %v6022_v24 }
0x160b   :  { %6737 = vmatpush3.msra.mxu1 %v6022_v24 }
0x160c   :  { %6738 = vmatprep.subr.mxu1 %v6021_v25 }
0x160d   :  { %6739 = vmatpush3.msra.mxu1 %v6021_v25 }
0x160e   :  { %6740 = vmatprep.subr.mxu1 %v6020_v41 }
0x160f   :  { %6741 = vmatpush3.msra.mxu1 %v6020_v41 }
0x1610   :  { %6742 = vmatprep.subr.mxu1 %v6019_v9 }
0x1611   :  { %6743 = vmatpush3.msra.mxu1 %v6019_v9 }
0x1612   :  { %6744 = vmatprep.subr.mxu1 %v6018_v42 }
0x1613   :  { %6745 = vmatpush3.msra.mxu1 %v6018_v42 }
0x1614   :  { %6746 = vmatprep.subr.mxu1 %v6017_v45 }
0x1615   :  { %6747 = vmatpush3.msra.mxu1 %v6017_v45 }
0x16b6   :  { %v6704_v30 = vpop.f32.mrf.mxu1 }
0x16b7   :  { %v2752_v52 = vadd.f32 %v6704_v30, %v7839_v44 }
0x16b8   :  { %v2742_v43 = vpop.f32.mrf.mxu1 }
0x16b9   :  { %v8034_v53 = vadd.f32 %v6007_v51, %v2752_v52  ;;  %v2751_v28 = vadd.f32 %v2742_v43, %v7842_v46  ;;  %v6033_v52 = vld [vmem:[#allocation10 + $0x1] ss:$0 sm:$0xff] }
0x16bb   :  { %v8037_v54 = vadd.f32 %v6007_v51, %v2751_v28  ;;  %v2770_v55 = vsel %vm273_vm7, %v8034_v53, 0.0 }
0x16bc   :  { %2771 = vadd.xlane.f32.xlu0 %v2770_v55 }
0x16bd   :  { %v2767_v56 = vsel %vm273_vm7, %v8037_v54, 0.0 }
0x16be   :  { %2768 = vadd.xlane.f32.xlu1 %v2767_v56 }
0x1745   :  { %v2772_v57 = vpop.xlane.xlu0 %2771 }
0x1746   :  { %v2774_v58 = vmul.f32 0.03125, %v2772_v57 }
0x1747   :  { %v2769_v59 = vpop.xlane.xlu1 %2768 }
0x1748   :  { %v8044_v44 = vsub.f32 %v8034_v53, %v2774_v58  ;;  %v2773_v60 = vmul.f32 0.03125, %v2769_v59 }
0x174a   :  { %v8047_v36 = vsub.f32 %v8037_v54, %v2773_v60  ;;  %v2778_v46 = vmul.f32 %v8044_v44, %v8044_v44 }
0x174c   :  { %v2782_v61 = vsel %vm273_vm7, %v2778_v46, 0.0  ;;  %v2777_v62 = vmul.f32 %v8047_v36, %v8047_v36 }
0x174d   :  { %2783 = vadd.xlane.f32.xlu0 %v2782_v61 }
0x174e   :  { %v2779_v33 = vsel %vm273_vm7, %v2777_v62, 0.0 }
0x174f   :  { %2780 = vadd.xlane.f32.xlu1 %v2779_v33 }
0x17d6   :  { %v2784_v26 = vpop.xlane.xlu0 %2783 }
0x17d7   :  { %v2786_v27 = vmul.f32 0.03125, %v2784_v26 }
0x17d8   :  { %v2781_v29 = vpop.xlane.xlu1 %2780 }
0x17d9   :  { %v2788_v3 = vadd.f32 1e-05, %v2786_v27  ;;  %v2785_v2 = vmul.f32 0.03125, %v2781_v29 }
0x17db   :  { %7104 = vrsqrt.f32 %v2788_v3  ;;  %v2787_v32 = vadd.f32 1e-05, %v2785_v2  ;;  %v6035_v2 = vld [vmem:[%s8714_s6 + $0x2] ss:$0 sm:$0xff] }
0x17dd   :  { %7106 = vrsqrt.f32 %v2787_v32 }
0x17e8   :  { %v7105_v8 = vpop.eup %7104 }
0x17e9   :  { %v2792_v37 = vmul.f32 %v7105_v8, %v8044_v44  ;;  %v6036_v8 = vld [vmem:[#allocation2 + $0x2] ss:$0 sm:$0xff] }
0x17ea   :  { %v7107_v13 = vpop.eup %7106 }
0x17eb   :  { %v2791_v35 = vmul.f32 %v7107_v13, %v8047_v36  ;;  %v2800_v38 = vmul.f32 %v6008_v15, %v2792_v37  ;;  %v6045_v13 = vld [vmem:[%s8711_s3 + $0x100] sm:$0xff] }
0x17ed   :  { %v2799_v16 = vmul.f32 %v6008_v15, %v2791_v35  ;;  %v2808_v40 = vadd.f32 %v6009_v12, %v2800_v38  ;;  %v6042_v35 = vld [vmem:[%s8711_s3 + $0xe8] sm:$0xff] }
0x17ef   :  { %v2807_v39 = vadd.f32 %v6009_v12, %v2799_v16  ;;  %v6039_v12 = vld [vmem:[%s8711_s3 + $0xd0] sm:$0xff] }
0x17f1   :  { %6713 = vmatprep.mubr.msk.f32.mxu0 %vm273_vm7, %v2807_v39 }
0x17f2   :  { %6714 = vmatmul.mubr.msk.f32.vlgmr.msra.gmra.mxu0 %vm273_vm7, %v2808_v40 }
0x17f3   :  { %3138 = vmatprep.mubr.f32.mxu0 %v7354_v23  ;;  %3099 = vmatpush1.msra.mxu0 %v6046_v1 }
0x17f4   :  { %3100 = vmatprep.subr.mxu0 %v6044_v4 }
0x17f5   :  { %3101 = vmatpush1.msra.mxu0 %v6043_v5 }
0x17f6   :  { %3102 = vmatprep.subr.mxu0 %v6041_v6 }
0x17f7   :  { %3103 = vmatpush1.msra.mxu0 %v6040_v7 }
0x17f8   :  { %3104 = vmatprep.subr.mxu0 %v6038_v10 }
0x17f9   :  { %3105 = vmatpush1.msra.mxu0 %v6037_v11 }
0x17fa   :  { %6751 = vmatprep.subr.mxu0 %v6048_v18 }
0x18b2   :  { %v6715_v48 = vpop.f32.mrf.mxu0 }
0x18b3   :  { %v2900_v31 = vadd.f32 %v6715_v48, %v6014_v47 }
0x18b4   :  { %v2894_v49 = vpop.f32.mrf.mxu0 }
0x18b5   :  { %v2895_v50 = vadd.f32 %v6014_v47, %v2894_v49  ;;  %v2904_v30 = vmax.f32 %v2900_v31, 0.0 }
0x18b7   :  { %v2903_v14 = vmax.f32 %v2895_v50, 0.0 }
0x18b9   :  { %6748 = vmatprep.mubr.f32.mxu1 %v2903_v14 }
0x18ba   :  { %6749 = vmatmul.mubr.f32.vlgmr.msra.gmra.mxu1 %v2904_v30 }
0x197a   :  { %v6750_v51 = vpop.f32.mrf.mxu1 }
0x197b   :  { %v2998_v43 = vadd.f32 %v6750_v51, %v8034_v53 }
0x197c   :  { %v2988_v28 = vpop.f32.mrf.mxu1 }
0x197d   :  { %v8121_v55 = vadd.f32 %v6033_v52, %v2998_v43  ;;  %v2997_v56 = vadd.f32 %v2988_v28, %v8037_v54 }
0x197f   :  { %v8124_v57 = vadd.f32 %v6033_v52, %v2997_v56  ;;  %v3016_v58 = vsel %vm273_vm7, %v8121_v55, 0.0 }
0x1980   :  { %3017 = vadd.xlane.f32.xlu0 %v3016_v58 }
0x1981   :  { %v3013_v59 = vsel %vm273_vm7, %v8124_v57, 0.0 }
0x1982   :  { %3014 = vadd.xlane.f32.xlu1 %v3013_v59 }
0x1a09   :  { %v3018_v44 = vpop.xlane.xlu0 %3017 }
0x1a0a   :  { %v3020_v60 = vmul.f32 0.03125, %v3018_v44 }
0x1a0b   :  { %v3015_v36 = vpop.xlane.xlu1 %3014 }
0x1a0c   :  { %v3022_v53 = vsub.f32 %v8121_v55, %v3020_v60  ;;  %v3019_v46 = vmul.f32 0.03125, %v3015_v36 }
0x1a0e   :  { %v3021_v61 = vsub.f32 %v8124_v57, %v3019_v46  ;;  %v3024_v62 = vmul.f32 %v3022_v53, %v3022_v53 }
0x1a10   :  { %v3028_v54 = vsel %vm273_vm7, %v3024_v62, 0.0  ;;  %v3023_v33 = vmul.f32 %v3021_v61, %v3021_v61 }
0x1a11   :  { %3029 = vadd.xlane.f32.xlu0 %v3028_v54 }
0x1a12   :  { %v3025_v63 = vsel %vm273_vm7, %v3023_v33, 0.0 }
0x1a13   :  { %3026 = vadd.xlane.f32.xlu1 %v3025_v63 }
0x1a9a   :  { %v3030_v19 = vpop.xlane.xlu0 %3029 }
0x1a9b   :  { %v3032_v20 = vmul.f32 0.03125, %v3030_v19 }
0x1a9c   :  { %v3027_v21 = vpop.xlane.xlu1 %3026 }
0x1a9d   :  { %v3034_v22 = vadd.f32 1e-05, %v3032_v20  ;;  %v3031_v24 = vmul.f32 0.03125, %v3027_v21 }
0x1a9f   :  { %7108 = vrsqrt.f32 %v3034_v22  ;;  %v3033_v25 = vadd.f32 1e-05, %v3031_v24 }
0x1aa1   :  { %7110 = vrsqrt.f32 %v3033_v25 }
0x1aac   :  { %v7109_v26 = vpop.eup %7108 }
0x1aad   :  { %v3038_v3 = vmul.f32 %v7109_v26, %v3022_v53 }
0x1aae   :  { %v7111_v27 = vpop.eup %7110 }
0x1aaf   :  { %v3037_v29 = vmul.f32 %v7111_v27, %v3021_v61  ;;  %v3046_v37 = vmul.f32 %v6035_v2, %v3038_v3 }
0x1ab1   :  { %v3045_v32 = vmul.f32 %v6035_v2, %v3037_v29  ;;  %v3054_v38 = vadd.f32 %v6036_v8, %v3046_v37 }
0x1ab3   :  { %v3053_v15 = vadd.f32 %v6036_v8, %v3045_v32 }
0x1ab5   :  { %6049 = vmatmul.mubr.msk.f32.vlgmr.msra.gmra.mxu0 %vm273_vm7, %v3053_v15 }
0x1ab6   :  { %6752 = vmatpush3.msra.mxu0 %v6048_v18  ;;  %3144 = vmatprep.mubr.f32.mxu0 %v7354_v23 }
0x1ab7   :  { %6753 = vmatprep.subr.mxu0 %v6045_v13 }
0x1ab8   :  { %6754 = vmatpush3.msra.mxu0 %v6045_v13 }
0x1ab9   :  { %6050 = vmatmul.mubr.msk.f32.gmra.mxu0 %vm273_vm7, %v3054_v38  ;;  %6755 = vmatprep.subr.mxu0 %v6042_v35 }
0x1aba   :  { %6756 = vmatpush3.msra.mxu0 %v6042_v35  ;;  %6759 = vmatprep.mubr.msk.f32.mxu0 %vm273_vm7, %v3053_v15 }
0x1abb   :  { %6757 = vmatprep.subr.mxu0 %v6039_v12 }
0x1abc   :  { %6758 = vmatpush3.msra.mxu0 %v6039_v12 }
0x1abd   :  { %6760 = vmatmul.mubr.msk.f32.vlgmr.msra.gmra.mxu0 %vm273_vm7, %v3054_v38 }
0x1b75   :  { %v8178_v16 = vpop.f32.mrf.mxu0 }
0x1b76   :  { %6766 = vmatprep.mubr.msk.f32.mxu0 %vm273_vm7, %v8178_v16 }
0x1b77   :  { %v8182_v39 = vpop.f32.mrf.mxu0 }
0x1b78   :  { %3343 = vrot.lane.b32.xlu0 %v8182_v39, %s7355_s24 }
0x1b79   :  { %v8186_v40 = vpop.f32.mrf.mxu0 }
0x1b7b   :  { %v8188_v41 = vpop.f32.mrf.mxu0 }
0x1b7c   :  { %3345 = vrot.lane.b32.xlu1 %v8188_v41, %s7355_s24  ;;  %6762 = vmatprep.subr.msk.mxu0 %vm273_vm7, %v8188_v41 }
0x1b7d   :  { %6763 = vmatpush3.xpose.msk.msra.mxu0 %vm273_vm7, %v8188_v41  ;;  %v8210_v47 = vpop.f32.mrf.mxu0 }
0x1b7e   :  { %6764 = vmatprep.subr.msk.mxu0 %vm273_vm7, %v8182_v39 }
0x1b7f   :  { %v8215_v31 = vpop.f32.mrf.mxu0 }
0x1b80   :  { %3339 = vrot.lane.b32.xlu1 %v8178_v16, %s7355_s24 }
0x1b81   :  { %6765 = vmatpush3.xpose.msk.msra.mxu0 %vm273_vm7, %v8182_v39 }
0x1b84   :  { %3341 = vrot.lane.b32.xlu1 %v8186_v40, %s7355_s24  ;;  %6767 = vmatmul.mubr.msk.f32.vlgmr.msra.gmra.mxu0 %vm273_vm7, %v8186_v40 }
0x1bea   :  { %v3344_v42 = vpop.permute.xlu0 %3343 }
0x1bee   :  { %v3346_v9 = vpop.permute.xlu1 %3345 }
0x1bef   :  { %6769 = vmatprep.subr.msk.mxu0 %vm273_vm7, %v3346_v9 }
0x1bf0   :  { %6770 = vmatpush3.xpose.msk.msra.mxu0 %vm273_vm7, %v3346_v9 }
0x1bf1   :  { %6771 = vmatprep.subr.msk.mxu0 %vm273_vm7, %v3344_v42 }
0x1bf2   :  { %v3340_v45 = vpop.permute.xlu1 %3339 }
0x1bf3   :  { %6773 = vmatprep.mubr.msk.f32.mxu0 %vm273_vm7, %v3340_v45 }
0x1bf4   :  { %6772 = vmatpush3.xpose.msk.msra.mxu0 %vm273_vm7, %v3344_v42 }
0x1bf5   :  { %6783 = vmatprep.subr.mxu0 %v8210_v47 }
0x1bf6   :  { %v3342_v48 = vpop.permute.xlu1 %3341 }
0x1bf7   :  { %6774 = vmatmul.mubr.msk.f32.vlgmr.msra.gmra.mxu0 %vm273_vm7, %v3342_v48 }
0x1bf8   :  { %6784 = vmatpush3.msra.mxu0 %v8210_v47 }
0x1bf9   :  { %6785 = vmatprep.subr.mxu0 %v8215_v31 }
0x1bfa   :  { %6786 = vmatpush3.msra.mxu0 %v8215_v31 }
0x1c44   :  { %v6768_v49 = vpop.f32.mrf.mxu0 }
0x1c45   :  { %v3314_v59 = vmul.f32 0.17677669, %v6768_v49 }
0x1c46   :  { %v3304_v50 = vpop.f32.mrf.mxu0 }
0x1c47   :  { %v3316_v44 = vadd.f32 %v3314_v59, %v7523_v17  ;;  %v3313_v5 = vmul.f32 0.17677669, %v3304_v50 }
0x1c49   :  { %v3320_v60 = vsel %vm578_vm11, %v3316_v44, -inf  ;;  %v3315_v6 = vadd.f32 %v3313_v5, %v7662_v34 }
0x1c4b   :  { %v3317_v7 = vsel %vm578_vm11, %v3315_v6, -inf }
0x1cb7   :  { %v6775_v14 = vpop.f32.mrf.mxu0 }
0x1cb8   :  { %v3431_v30 = vmul.f32 0.17677669, %v6775_v14 }
0x1cb9   :  { %v3421_v51 = vpop.f32.mrf.mxu0 }
0x1cba   :  { %v3433_v52 = vadd.f32 %v3431_v30, %v7523_v17  ;;  %v3430_v43 = vmul.f32 0.17677669, %v3421_v51 }
0x1cbc   :  { %v3437_v28 = vsel %vm578_vm11, %v3433_v52, -inf  ;;  %v3432_v56 = vadd.f32 %v3430_v43, %v7662_v34 }
0x1cbd   :  { %3438 = vmax.xlane.f32.xlu1 %v3437_v28 }
0x1cbe   :  { %v3434_v58 = vsel %vm578_vm11, %v3432_v56, -inf }
0x1cbf   :  { %3435 = vmax.xlane.f32.xlu0 %v3434_v58 }
0x1cce   :  { %3460 = vrot.lane.b32.xlu1 %v8210_v47, %s7355_s24 }
0x1cd2   :  { %3632 = vrot.lane.b32.xlu1 %v8188_v41, %s7356_s9 }
0x1cd6   :  { %3630 = vrot.lane.b32.xlu1 %v8182_v39, %s7356_s9 }
0x1cda   :  { %3628 = vrot.lane.b32.xlu1 %v8186_v40, %s7356_s9 }
0x1cfe   :  { %3321 = vmax.xlane.f32.xlu1 %v3320_v60 }
0x1d46   :  { %v3439_v36 = vpop.xlane.xlu1 %3438 }
0x1d47   :  { %v3441_v53 = vsub.f32 %v3433_v52, %v3439_v36 }
0x1d48   :  { %v3436_v46 = vpop.xlane.xlu0 %3435 }
0x1d49   :  { %v3444_v61 = vmul.f32 1.442695, %v3441_v53  ;;  %v3440_v62 = vsub.f32 %v3432_v56, %v3436_v46 }
0x1d4a   :  { %v3461_v54 = vpop.permute.xlu1 %3460 }
0x1d4b   :  { %7112 = vpow2.f32 %v3444_v61  ;;  %v3442_v33 = vmul.f32 1.442695, %v3440_v62  ;;  %6776 = vmatprep.subr.mxu1 %v3461_v54 }
0x1d4c   :  { %6777 = vmatpush3.msra.mxu1 %v3461_v54 }
0x1d4d   :  { %7114 = vpow2.f32 %v3442_v33 }
0x1d4e   :  { %v3633_v19 = vpop.permute.xlu1 %3632 }
0x1d52   :  { %v3631_v26 = vpop.permute.xlu1 %3630 }
0x1d56   :  { %v3629_v27 = vpop.permute.xlu1 %3628 }
0x1d58   :  { %v7113_v63 = vpop.eup %7112 }
0x1d59   :  { %v3449_v0 = vsel %vm578_vm11, %v7113_v63, 0.0 }
0x1d5a   :  { %v7115_v1 = vpop.eup %7114  ;;  %3450 = vadd.xlane.f32.xlu0 %v3449_v0 }
0x1d5b   :  { %v3446_v4 = vsel %vm578_vm11, %v7115_v1, 0.0 }
0x1d5e   :  { %3447 = vadd.xlane.f32.xlu0 %v3446_v4 }
0x1d74   :  { %3458 = vrot.lane.b32.xlu0 %v8215_v31, %s7355_s24 }
0x1d78   :  { %3626 = vrot.lane.b32.xlu0 %v8178_v16, %s7356_s9 }
0x1d87   :  { %v3322_v15 = vpop.xlane.xlu1 %3321 }
0x1d88   :  { %v3324_v37 = vsub.f32 %v3316_v44, %v3322_v15 }
0x1d8a   :  { %v3327_v35 = vmul.f32 1.442695, %v3324_v37 }
0x1d97   :  { %3318 = vmax.xlane.f32.xlu0 %v3317_v7 }
0x1de3   :  { %v3451_v10 = vpop.xlane.xlu0 %3450 }
0x1de4   :  { %7116 = vrcp.f32 %v3451_v10 }
0x1de7   :  { %v3448_v11 = vpop.xlane.xlu0 %3447 }
0x1de8   :  { %7118 = vrcp.f32 %v3448_v11 }
0x1deb   :  { %v3459_v18 = vpop.permute.xlu0 %3458 }
0x1dec   :  { %6778 = vmatprep.subr.mxu1 %v3459_v18 }
0x1ded   :  { %6779 = vmatpush3.msra.mxu1 %v3459_v18 }
0x1dee   :  { %6790 = vmatprep.subr.msk.mxu1 %vm273_vm7, %v3633_v19 }
0x1def   :  { %v3627_v25 = vpop.permute.xlu0 %3626 }
0x1df1   :  { %v7117_v20 = vpop.eup %7116 }
0x1df2   :  { %v3455_v24 = vmul.f32 %v7117_v20, %v7113_v63 }
0x1df5   :  { %v7119_v21 = vpop.eup %7118 }
0x1df6   :  { %v3454_v22 = vmul.f32 %v7119_v21, %v7115_v1 }
0x1df8   :  { %6780 = vmatprep.mubr.msk.f32.mxu1 %vm578_vm11, %v3454_v22 }
0x1df9   :  { %6781 = vmatmul.mubr.msk.f32.vlgmr.msra.gmra.mxu1 %vm578_vm11, %v3455_v24 }
0x1dfa   :  { %6791 = vmatpush3.xpose.msk.msra.mxu1 %vm273_vm7, %v3633_v19  ;;  %6794 = vmatprep.mubr.msk.f32.mxu1 %vm273_vm7, %v3627_v25 }
0x1dfb   :  { %6792 = vmatprep.subr.msk.mxu1 %vm273_vm7, %v3631_v26 }
0x1dfe   :  { %6793 = vmatpush3.xpose.msk.msra.mxu1 %vm273_vm7, %v3631_v26 }
0x1e01   :  { %6795 = vmatmul.mubr.msk.f32.vlgmr.msra.gmra.mxu1 %vm273_vm7, %v3629_v27 }
0x1e20   :  { %v3319_v29 = vpop.xlane.xlu0 %3318 }
0x1e21   :  { %v3323_v3 = vsub.f32 %v3315_v6, %v3319_v29 }
0x1e23   :  { %v3325_v2 = vmul.f32 1.442695, %v3323_v3 }
0x1e25   :  { %7120 = vpow2.f32 %v3325_v2 }
0x1e32   :  { %v7121_v32 = vpop.eup %7120 }
0x1e33   :  { %v3329_v8 = vsel %vm578_vm11, %v7121_v32, 0.0 }
0x1e34   :  { %3330 = vadd.xlane.f32.xlu1 %v3329_v8 }
0x1e45   :  { %3745 = vrot.lane.b32.xlu1 %v8210_v47, %s7356_s9 }
0x1e49   :  { %3838 = vrot.lane.b32.xlu1 %v8188_v41, %s7357_s27 }
0x1e4d   :  { %3836 = vrot.lane.b32.xlu1 %v8182_v39, %s7357_s27 }
0x1eb9   :  { %v8257_v13 = vpop.f32.mrf.mxu1 }
0x1ebb   :  { %v8259_v12 = vpop.f32.mrf.mxu1 }
0x1ebd   :  { %v3331_v38 = vpop.xlane.xlu1 %3330 }
0x1ebe   :  { %7122 = vrcp.f32 %v3331_v38 }
0x1ebf   :  { %7124 = vpow2.f32 %v3327_v35 }
0x1ec1   :  { %v6796_v9 = vpop.f32.mrf.mxu1  ;;  %v3746_v42 = vpop.permute.xlu1 %3745 }
0x1ec2   :  { %6797 = vmatprep.subr.mxu0 %v3746_v42  ;;  %v3718_v48 = vmul.f32 0.17677669, %v6796_v9 }
0x1ec3   :  { %v3708_v45 = vpop.f32.mrf.mxu1 }
0x1ec4   :  { %v3717_v49 = vmul.f32 0.17677669, %v3708_v45  ;;  %v3720_v39 = vadd.f32 %v3718_v48, %v7523_v17 }
0x1ec5   :  { %v3839_v63 = vpop.permute.xlu1 %3838 }
0x1ec6   :  { %v3719_v41 = vadd.f32 %v3717_v49, %v7662_v34  ;;  %v3724_v30 = vsel %vm578_vm11, %v3720_v39, -inf }
0x1ec8   :  { %v3721_v50 = vsel %vm578_vm11, %v3719_v41, -inf }
0x1ec9   :  { %3722 = vmax.xlane.f32.xlu0 %v3721_v50  ;;  %v3837_v0 = vpop.permute.xlu1 %3836 }
0x1ecb   :  { %v7123_v14 = vpop.eup %7122 }
0x1ecc   :  { %v3337_v51 = vmul.f32 %v7123_v14, %v7121_v32  ;;  %v7125_v52 = vpop.eup %7124  ;;  %v6080_v14 = vld [vmem:[%s8712_s4 + $0x58] sm:$0xff] }
0x1ecd   :  { %3725 = vmax.xlane.f32.xlu0 %v3724_v30  ;;  %v3332_v43 = vsel %vm578_vm11, %v7125_v52, 0.0 }
0x1ece   :  { %6787 = vmatprep.mubr.msk.f32.mxu0 %vm578_vm11, %v3337_v51 }
0x1ed1   :  { %3333 = vadd.xlane.f32.xlu0 %v3332_v43 }
0x1f52   :  { %v3723_v28 = vpop.xlane.xlu0 %3722 }
0x1f53   :  { %v3727_v56 = vsub.f32 %v3719_v41, %v3723_v28  ;;  %v6078_v28 = vld [vmem:[%s8712_s4 + $0x48] sm:$0xff] }
0x1f55   :  { %v3729_v58 = vmul.f32 1.442695, %v3727_v56  ;;  %v6077_v56 = vld [vmem:[%s8712_s4 + $0x40] sm:$0xff] }
0x1f56   :  { %v3726_v59 = vpop.xlane.xlu0 %3725 }
0x1f57   :  { %7126 = vpow2.f32 %v3729_v58  ;;  %v3728_v44 = vsub.f32 %v3720_v39, %v3726_v59 }
0x1f59   :  { %v3731_v60 = vmul.f32 1.442695, %v3728_v44 }
0x1f5a   :  { %v3334_v36 = vpop.xlane.xlu0 %3333 }
0x1f5b   :  { %7128 = vpow2.f32 %v3731_v60 }
0x1f5c   :  { %7130 = vrcp.f32 %v3334_v36 }
0x1f64   :  { %v7127_v53 = vpop.eup %7126 }
0x1f65   :  { %v3733_v46 = vsel %vm578_vm11, %v7127_v53, 0.0 }
0x1f66   :  { %3734 = vadd.xlane.f32.xlu1 %v3733_v46 }
0x1f68   :  { %v7129_v61 = vpop.eup %7128 }
0x1f69   :  { %v7131_v62 = vpop.eup %7130  ;;  %v3736_v54 = vsel %vm578_vm11, %v7129_v61, 0.0 }
0x1f6a   :  { %3737 = vadd.xlane.f32.xlu0 %v3736_v54  ;;  %v3338_v33 = vmul.f32 %v7131_v62, %v7125_v52 }
0x1f6c   :  { %6788 = vmatmul.mubr.msk.f32.vlgmr.msra.gmra.mxu0 %vm578_vm11, %v3338_v33 }
0x1f6d   :  { %6798 = vmatpush3.msra.mxu0 %v3746_v42 }
0x1f77   :  { %3834 = vrot.lane.b32.xlu1 %v8186_v40, %s7357_s27 }
0x1f80   :  { %3743 = vrot.lane.b32.xlu0 %v8215_v31, %s7356_s9 }
0x1f84   :  { %3832 = vrot.lane.b32.xlu0 %v8178_v16, %s7357_s27 }
0x1fef   :  { %v3735_v1 = vpop.xlane.xlu1 %3734 }
0x1ff0   :  { %7132 = vrcp.f32 %v3735_v1 }
0x1ff3   :  { %v3738_v4 = vpop.xlane.xlu0 %3737  ;;  %v3835_v16 = vpop.permute.xlu1 %3834 }
0x1ff4   :  { %7134 = vrcp.f32 %v3738_v4 }
0x1ff7   :  { %v3744_v5 = vpop.permute.xlu0 %3743 }
0x1ff8   :  { %6799 = vmatprep.subr.mxu0 %v3744_v5 }
0x1ff9   :  { %6800 = vmatpush3.msra.mxu0 %v3744_v5 }
0x1ffa   :  { %6804 = vmatprep.subr.msk.mxu0 %vm273_vm7, %v3839_v63 }
0x1ffb   :  { %v3833_v11 = vpop.permute.xlu0 %3832 }
0x1ffd   :  { %v7133_v6 = vpop.eup %7132 }
0x1ffe   :  { %v3741_v7 = vmul.f32 %v7133_v6, %v7127_v53 }
0x2000   :  { %6801 = vmatprep.mubr.msk.f32.mxu0 %vm578_vm11, %v3741_v7 }
0x2001   :  { %v7135_v40 = vpop.eup %7134 }
0x2002   :  { %v3742_v10 = vmul.f32 %v7135_v40, %v7129_v61  ;;  %v6084_v61 = vld [vmem:[%s8713_s5 + $0x2] ss:$0 sm:$0xff] }
0x2004   :  { %6802 = vmatmul.mubr.msk.f32.vlgmr.msra.gmra.mxu0 %vm578_vm11, %v3742_v10 }
0x2005   :  { %6805 = vmatpush3.xpose.msk.msra.mxu0 %vm273_vm7, %v3839_v63  ;;  %6808 = vmatprep.mubr.msk.f32.mxu0 %vm273_vm7, %v3833_v11 }
0x2006   :  { %6806 = vmatprep.subr.msk.mxu0 %vm273_vm7, %v3837_v0 }
0x2009   :  { %6807 = vmatpush3.xpose.msk.msra.mxu0 %vm273_vm7, %v3837_v0 }
0x200c   :  { %6809 = vmatmul.mubr.msk.f32.vlgmr.msra.gmra.mxu0 %vm273_vm7, %v3835_v16 }
0x202c   :  { %v6789_v18 = vpop.f32.mrf.mxu0 }
0x202d   :  { %v3623_v20 = vadd.f32 %v6789_v18, %v8257_v13  ;;  %v6090_v18 = vld [vmem:[%s8718_s10 + $0x58] sm:$0xff] }
0x202e   :  { %v3617_v19 = vpop.f32.mrf.mxu0  ;;  %6829 = vmatprep.subr.mxu0 %v6090_v18 }
0x202f   :  { %v3618_v58 = vadd.f32 %v3617_v19, %v8259_v12  ;;  %v6089_v19 = vld [vmem:[%s8718_s10 + $0x50] sm:$0xff]  ;;  %6830 = vmatpush3.msra.mxu0 %v6090_v18 }
0x2030   :  { %6831 = vmatprep.subr.mxu0 %v6089_v19 }
0x2031   :  { %6832 = vmatpush3.msra.mxu0 %v6089_v19  ;;  %v6124_v19 = vld [vmem:[%s8711_s3 + $0x170] sm:$0xff] }
0x20c4   :  { %v6803_v21 = vpop.f32.mrf.mxu0 }
0x20c5   :  { %v3831_v22 = vadd.f32 %v6803_v21, %v3623_v20  ;;  %v6088_v20 = vld [vmem:[%s8718_s10 + $0x48] sm:$0xff]  ;;  %v6087_v21 = vld [vmem:[%s8718_s10 + $0x40] sm:$0xff] }
0x20c6   :  { %v3821_v24 = vpop.f32.mrf.mxu0  ;;  %6833 = vmatprep.subr.mxu0 %v6088_v20 }
0x20c7   :  { %v3830_v44 = vadd.f32 %v3821_v24, %v3618_v58  ;;  %6834 = vmatpush3.msra.mxu0 %v6088_v20  ;;  %v6108_v24 = vld [vmem:[%s8720_s12 + $0x170] sm:$0xff]  ;;  %v6091_v58 = vld [vmem:[#allocation8 + $0x2] ss:$0 sm:$0xff] }
0x20c8   :  { %6835 = vmatprep.subr.mxu0 %v6087_v21  ;;  %v6123_v20 = vld [vmem:[%s8711_s3 + $0x168] sm:$0xff] }
0x20c9   :  { %6836 = vmatpush3.msra.mxu0 %v6087_v21  ;;  %v6121_v21 = vld [vmem:[%s8711_s3 + $0x158] sm:$0xff] }
0x20ca   :  { %4471 = vmatprep.subr.mxu0 %v6124_v19 }
0x20cc   :  { %v6810_v25 = vpop.f32.mrf.mxu0 }
0x20cd   :  { %v3924_v26 = vmul.f32 0.17677669, %v6810_v25  ;;  %v6107_v25 = vld [vmem:[%s8720_s12 + $0x168] sm:$0xff] }
0x20ce   :  { %v3914_v27 = vpop.f32.mrf.mxu0 }
0x20cf   :  { %v3926_v29 = vadd.f32 %v3924_v26, %v7523_v17  ;;  %v3923_v3 = vmul.f32 0.17677669, %v3914_v27  ;;  %v6106_v26 = vld [vmem:[%s8720_s12 + $0x160] sm:$0xff]  ;;  %v6105_v27 = vld [vmem:[%s8720_s12 + $0x158] sm:$0xff] }
0x20d1   :  { %v3925_v2 = vadd.f32 %v3923_v3, %v7662_v34  ;;  %v3930_v32 = vsel %vm578_vm11, %v3926_v29, -inf  ;;  %v6103_v3 = vld [vmem:[%s8720_s12 + $0x148] sm:$0xff] }
0x20d2   :  { %3931 = vmax.xlane.f32.xlu1 %v3930_v32  ;;  %v6101_v32 = vld [vmem:[%s8720_s12 + $0x138] sm:$0xff] }
0x20d3   :  { %v3927_v8 = vsel %vm578_vm11, %v3925_v2, -inf }
0x20d4   :  { %3928 = vmax.xlane.f32.xlu0 %v3927_v8  ;;  %v6100_v8 = vld [vmem:[%s8720_s12 + $0x130] sm:$0xff] }
0x20e3   :  { %3951 = vrot.lane.b32.xlu1 %v8210_v47, %s7357_s27 }
0x215b   :  { %v3932_v15 = vpop.xlane.xlu1 %3931 }
0x215c   :  { %v3934_v37 = vsub.f32 %v3926_v29, %v3932_v15  ;;  %v6104_v29 = vld [vmem:[%s8720_s12 + $0x150] sm:$0xff]  ;;  %v6099_v15 = vld [vmem:[%s8720_s12 + $0x128] sm:$0xff] }
0x215d   :  { %v3929_v13 = vpop.xlane.xlu0 %3928 }
0x215e   :  { %v3937_v35 = vmul.f32 1.442695, %v3934_v37  ;;  %v3933_v38 = vsub.f32 %v3925_v2, %v3929_v13  ;;  %v6102_v2 = vld [vmem:[%s8720_s12 + $0x140] sm:$0xff] }
0x215f   :  { %v3952_v9 = vpop.permute.xlu1 %3951  ;;  %v6098_v37 = vld [vmem:[%s8720_s12 + $0x120] sm:$0xff] }
0x2160   :  { %7136 = vpow2.f32 %v3937_v35  ;;  %v3935_v42 = vmul.f32 1.442695, %v3933_v38  ;;  %6811 = vmatprep.subr.mxu1 %v3952_v9 }
0x2161   :  { %6812 = vmatpush3.msra.mxu1 %v3952_v9 }
0x2162   :  { %7138 = vpow2.f32 %v3935_v42 }
0x216d   :  { %v7137_v45 = vpop.eup %7136 }
0x216e   :  { %v3942_v48 = vsel %vm578_vm11, %v7137_v45, 0.0 }
0x216f   :  { %v7139_v49 = vpop.eup %7138  ;;  %3943 = vadd.xlane.f32.xlu0 %v3942_v48 }
0x2170   :  { %v3939_v41 = vsel %vm578_vm11, %v7139_v49, 0.0 }
0x2173   :  { %3940 = vadd.xlane.f32.xlu0 %v3939_v41 }
0x2189   :  { %3949 = vrot.lane.b32.xlu0 %v8215_v31, %s7357_s27  ;;  %v6079_v31 = vld [vmem:[%s8712_s4 + $0x50] sm:$0xff] }
0x21f8   :  { %v3944_v47 = vpop.xlane.xlu0 %3943 }
0x21f9   :  { %7140 = vrcp.f32 %v3944_v47 }
0x21fc   :  { %v3941_v39 = vpop.xlane.xlu0 %3940 }
0x21fd   :  { %7142 = vrcp.f32 %v3941_v39 }
0x2200   :  { %v3950_v50 = vpop.permute.xlu0 %3949 }
0x2201   :  { %6813 = vmatprep.subr.mxu1 %v3950_v50 }
0x2202   :  { %6814 = vmatpush3.msra.mxu1 %v3950_v50 }
0x2203   :  { %6818 = vmatprep.subr.mxu1 %v6080_v14 }
0x2206   :  { %v7141_v30 = vpop.eup %7140 }
0x2207   :  { %v3948_v43 = vmul.f32 %v7141_v30, %v7137_v45 }
0x220a   :  { %v7143_v51 = vpop.eup %7142 }
0x220b   :  { %v3947_v52 = vmul.f32 %v7143_v51, %v7139_v49  ;;  %v6085_v49 = vld [vmem:[#allocation5 + $0x2] ss:$0 sm:$0xff] }
0x220d   :  { %6815 = vmatprep.mubr.msk.f32.mxu1 %vm578_vm11, %v3947_v52 }
0x220e   :  { %6816 = vmatmul.mubr.msk.f32.vlgmr.msra.gmra.mxu1 %vm578_vm11, %v3948_v43  ;;  %v6097_v43 = vld [vmem:[%s8720_s12 + $0x118] sm:$0xff] }
0x220f   :  { %6819 = vmatpush3.msra.mxu1 %v6080_v14  ;;  %v6086_v14 = vld [vmem:[#allocation7 + $0x2] ss:$0 sm:$0xff] }
0x2210   :  { %6820 = vmatprep.subr.mxu1 %v6079_v31 }
0x2211   :  { %6821 = vmatpush3.msra.mxu1 %v6079_v31  ;;  %v6096_v31 = vld [vmem:[%s8720_s12 + $0x110] sm:$0xff] }
0x2212   :  { %6822 = vmatprep.subr.mxu1 %v6078_v28 }
0x2213   :  { %6823 = vmatpush3.msra.mxu1 %v6078_v28  ;;  %v6095_v28 = vld [vmem:[%s8720_s12 + $0x108] sm:$0xff] }
0x2214   :  { %6824 = vmatprep.subr.mxu1 %v6077_v56 }
0x2215   :  { %6825 = vmatpush3.msra.mxu1 %v6077_v56  ;;  %v6094_v56 = vld [vmem:[%s8720_s12 + $0x100] sm:$0xff] }
0x22ce   :  { %v6817_v59 = vpop.f32.mrf.mxu1 }
0x22cf   :  { %v4037_v53 = vadd.f32 %v6817_v59, %v3831_v22  ;;  %v6109_v22 = vld [vmem:[%s8720_s12 + $0x178] sm:$0xff] }
0x22d0   :  { %v4027_v60 = vpop.f32.mrf.mxu1  ;;  %6840 = vmatprep.subr.mxu1 %v6109_v22 }
0x22d1   :  { %v4036_v36 = vadd.f32 %v4027_v60, %v3830_v44 }
0x22d3   :  { %6826 = vmatprep.mubr.msk.f32.mxu1 %vm273_vm7, %v4036_v36 }
0x22d4   :  { %6827 = vmatmul.mubr.msk.f32.vlgmr.msra.gmra.mxu1 %vm273_vm7, %v4037_v53 }
0x22d5   :  { %6841 = vmatpush3.msra.mxu1 %v6109_v22  ;;  %v6120_v22 = vld [vmem:[%s8711_s3 + $0x150] sm:$0xff] }
0x22d6   :  { %6842 = vmatprep.subr.mxu1 %v6108_v24 }
0x22d7   :  { %6843 = vmatpush3.msra.mxu1 %v6108_v24  ;;  %v6118_v24 = vld [vmem:[%s8711_s3 + $0x140] sm:$0xff] }
0x22d8   :  { %6844 = vmatprep.subr.mxu1 %v6107_v25 }
0x22d9   :  { %6845 = vmatpush3.msra.mxu1 %v6107_v25  ;;  %v6117_v25 = vld [vmem:[%s8711_s3 + $0x138] sm:$0xff] }
0x22da   :  { %6846 = vmatprep.subr.mxu1 %v6106_v26 }
0x22db   :  { %6847 = vmatpush3.msra.mxu1 %v6106_v26  ;;  %v6115_v26 = vld [vmem:[%s8711_s3 + $0x128] sm:$0xff] }
0x22dc   :  { %6848 = vmatprep.subr.mxu1 %v6105_v27 }
0x22dd   :  { %6849 = vmatpush3.msra.mxu1 %v6105_v27  ;;  %v6114_v27 = vld [vmem:[%s8711_s3 + $0x120] sm:$0xff] }
0x22de   :  { %6850 = vmatprep.subr.mxu1 %v6104_v29 }
0x22df   :  { %6851 = vmatpush3.msra.mxu1 %v6104_v29  ;;  %v6125_v29 = vld [vmem:[%s8711_s3 + $0x178] sm:$0xff] }
0x22e0   :  { %6852 = vmatprep.subr.mxu1 %v6103_v3 }
0x22e1   :  { %6853 = vmatpush3.msra.mxu1 %v6103_v3 }
0x22e2   :  { %6854 = vmatprep.subr.mxu1 %v6102_v2 }
0x22e3   :  { %6855 = vmatpush3.msra.mxu1 %v6102_v2 }
0x22e4   :  { %6856 = vmatprep.subr.mxu1 %v6101_v32 }
0x22e5   :  { %6857 = vmatpush3.msra.mxu1 %v6101_v32 }
0x22e6   :  { %6858 = vmatprep.subr.mxu1 %v6100_v8 }
0x22e7   :  { %6859 = vmatpush3.msra.mxu1 %v6100_v8 }
0x22e8   :  { %6860 = vmatprep.subr.mxu1 %v6099_v15 }
0x22e9   :  { %6861 = vmatpush3.msra.mxu1 %v6099_v15 }
0x22ea   :  { %6862 = vmatprep.subr.mxu1 %v6098_v37 }
0x22eb   :  { %6863 = vmatpush3.msra.mxu1 %v6098_v37 }
0x22ec   :  { %6864 = vmatprep.subr.mxu1 %v6097_v43 }
0x22ed   :  { %6865 = vmatpush3.msra.mxu1 %v6097_v43 }
0x22ee   :  { %6866 = vmatprep.subr.mxu1 %v6096_v31 }
0x22ef   :  { %6867 = vmatpush3.msra.mxu1 %v6096_v31 }
0x22f0   :  { %6868 = vmatprep.subr.mxu1 %v6095_v28 }
0x22f1   :  { %6869 = vmatpush3.msra.mxu1 %v6095_v28 }
0x22f2   :  { %6870 = vmatprep.subr.mxu1 %v6094_v56 }
0x22f3   :  { %6871 = vmatpush3.msra.mxu1 %v6094_v56 }
0x2394   :  { %v6828_v46 = vpop.f32.mrf.mxu1 }
0x2395   :  { %v4125_v62 = vadd.f32 %v6828_v46, %v8121_v55 }
0x2396   :  { %v4115_v54 = vpop.f32.mrf.mxu1 }
0x2397   :  { %v8316_v33 = vadd.f32 %v6084_v61, %v4125_v62  ;;  %v4124_v12 = vadd.f32 %v4115_v54, %v8124_v57  ;;  %v6110_v62 = vld [vmem:[#allocation10 + $0x2] ss:$0 sm:$0xff] }
0x2399   :  { %v8319_v63 = vadd.f32 %v6084_v61, %v4124_v12  ;;  %v4143_v0 = vsel %vm273_vm7, %v8316_v33, 0.0 }
0x239a   :  { %4144 = vadd.xlane.f32.xlu0 %v4143_v0 }
0x239b   :  { %v4140_v1 = vsel %vm273_vm7, %v8319_v63, 0.0 }
0x239c   :  { %4141 = vadd.xlane.f32.xlu1 %v4140_v1 }
0x2423   :  { %v4145_v4 = vpop.xlane.xlu0 %4144 }
0x2424   :  { %v4147_v5 = vmul.f32 0.03125, %v4145_v4 }
0x2425   :  { %v4142_v6 = vpop.xlane.xlu1 %4141 }
0x2426   :  { %v8326_v55 = vsub.f32 %v8316_v33, %v4147_v5  ;;  %v4146_v7 = vmul.f32 0.03125, %v4142_v6 }
0x2428   :  { %v8329_v40 = vsub.f32 %v8319_v63, %v4146_v7  ;;  %v4151_v57 = vmul.f32 %v8326_v55, %v8326_v55 }
0x242a   :  { %v4155_v10 = vsel %vm273_vm7, %v4151_v57, 0.0  ;;  %v4150_v11 = vmul.f32 %v8329_v40, %v8329_v40 }
0x242b   :  { %4156 = vadd.xlane.f32.xlu0 %v4155_v10 }
0x242c   :  { %v4152_v16 = vsel %vm273_vm7, %v4150_v11, 0.0 }
0x242d   :  { %4153 = vadd.xlane.f32.xlu1 %v4152_v16 }
0x24b4   :  { %v4157_v13 = vpop.xlane.xlu0 %4156 }
0x24b5   :  { %v4159_v35 = vmul.f32 0.03125, %v4157_v13 }
0x24b6   :  { %v4154_v38 = vpop.xlane.xlu1 %4153 }
0x24b7   :  { %v4161_v9 = vadd.f32 1e-05, %v4159_v35  ;;  %v4158_v42 = vmul.f32 0.03125, %v4154_v38 }
0x24b9   :  { %7144 = vrsqrt.f32 %v4161_v9  ;;  %v4160_v45 = vadd.f32 1e-05, %v4158_v42  ;;  %v6112_v42 = vld [vmem:[%s8714_s6 + $0x3] ss:$0 sm:$0xff] }
0x24bb   :  { %7146 = vrsqrt.f32 %v4160_v45 }
0x24c6   :  { %v7145_v48 = vpop.eup %7144 }
0x24c7   :  { %v4165_v41 = vmul.f32 %v7145_v48, %v8326_v55  ;;  %v6113_v48 = vld [vmem:[#allocation2 + $0x3] ss:$0 sm:$0xff] }
0x24c8   :  { %v7147_v47 = vpop.eup %7146 }
0x24c9   :  { %v4164_v39 = vmul.f32 %v7147_v47, %v8329_v40  ;;  %v4173_v50 = vmul.f32 %v6085_v49, %v4165_v41  ;;  %v6122_v47 = vld [vmem:[%s8711_s3 + $0x160] sm:$0xff] }
0x24cb   :  { %v4172_v30 = vmul.f32 %v6085_v49, %v4164_v39  ;;  %v4181_v52 = vadd.f32 %v6086_v14, %v4173_v50  ;;  %v6119_v39 = vld [vmem:[%s8711_s3 + $0x148] sm:$0xff] }
0x24cd   :  { %v4180_v51 = vadd.f32 %v6086_v14, %v4172_v30  ;;  %v6116_v14 = vld [vmem:[%s8711_s3 + $0x130] sm:$0xff] }
0x24cf   :  { %6837 = vmatprep.mubr.msk.f32.mxu0 %vm273_vm7, %v4180_v51 }
0x24d0   :  { %6838 = vmatmul.mubr.msk.f32.vlgmr.msra.gmra.mxu0 %vm273_vm7, %v4181_v52 }
0x24d1   :  { %4511 = vmatprep.mubr.f32.mxu0 %v7354_v23  ;;  %4472 = vmatpush1.msra.mxu0 %v6123_v20 }
0x24d2   :  { %4473 = vmatprep.subr.mxu0 %v6121_v21 }
0x24d3   :  { %4474 = vmatpush1.msra.mxu0 %v6120_v22 }
0x24d4   :  { %4475 = vmatprep.subr.mxu0 %v6118_v24 }
0x24d5   :  { %4476 = vmatpush1.msra.mxu0 %v6117_v25 }
0x24d6   :  { %4477 = vmatprep.subr.mxu0 %v6115_v26 }
0x24d7   :  { %4478 = vmatpush1.msra.mxu0 %v6114_v27 }
0x24d8   :  { %6875 = vmatprep.subr.mxu0 %v6125_v29 }
0x2590   :  { %v6839_v59 = vpop.f32.mrf.mxu0 }
0x2591   :  { %v4273_v44 = vadd.f32 %v6839_v59, %v6091_v58 }
0x2592   :  { %v4267_v60 = vpop.f32.mrf.mxu0 }
0x2593   :  { %v4268_v36 = vadd.f32 %v6091_v58, %v4267_v60  ;;  %v4277_v46 = vmax.f32 %v4273_v44, 0.0 }
0x2595   :  { %v4276_v53 = vmax.f32 %v4268_v36, 0.0 }
0x2597   :  { %6872 = vmatprep.mubr.f32.mxu1 %v4276_v53 }
0x2598   :  { %6873 = vmatmul.mubr.f32.vlgmr.msra.gmra.mxu1 %v4277_v46 }
0x2658   :  { %v6874_v61 = vpop.f32.mrf.mxu1 }
0x2659   :  { %v4371_v54 = vadd.f32 %v6874_v61, %v8316_v33 }
0x265a   :  { %v4361_v12 = vpop.f32.mrf.mxu1 }
0x265b   :  { %v8403_v0 = vadd.f32 %v6110_v62, %v4371_v54  ;;  %v4370_v1 = vadd.f32 %v4361_v12, %v8319_v63 }
0x265d   :  { %v8406_v4 = vadd.f32 %v6110_v62, %v4370_v1  ;;  %v4389_v5 = vsel %vm273_vm7, %v8403_v0, 0.0 }
0x265e   :  { %4390 = vadd.xlane.f32.xlu0 %v4389_v5 }
0x265f   :  { %v4386_v6 = vsel %vm273_vm7, %v8406_v4, 0.0 }
0x2660   :  { %4387 = vadd.xlane.f32.xlu1 %v4386_v6 }
0x26e7   :  { %v4391_v55 = vpop.xlane.xlu0 %4390 }
0x26e8   :  { %v4393_v7 = vmul.f32 0.03125, %v4391_v55 }
0x26e9   :  { %v4388_v40 = vpop.xlane.xlu1 %4387 }
0x26ea   :  { %v4395_v33 = vsub.f32 %v8403_v0, %v4393_v7  ;;  %v4392_v57 = vmul.f32 0.03125, %v4388_v40 }
0x26ec   :  { %v4394_v10 = vsub.f32 %v8406_v4, %v4392_v57  ;;  %v4397_v11 = vmul.f32 %v4395_v33, %v4395_v33 }
0x26ee   :  { %v4401_v63 = vsel %vm273_vm7, %v4397_v11, 0.0  ;;  %v4396_v16 = vmul.f32 %v4394_v10, %v4394_v10 }
0x26ef   :  { %4402 = vadd.xlane.f32.xlu0 %v4401_v63 }
0x26f0   :  { %v4398_v18 = vsel %vm273_vm7, %v4396_v16, 0.0 }
0x26f1   :  { %4399 = vadd.xlane.f32.xlu1 %v4398_v18 }
0x2778   :  { %v4403_v3 = vpop.xlane.xlu0 %4402 }
0x2779   :  { %v4405_v2 = vmul.f32 0.03125, %v4403_v3 }
0x277a   :  { %v4400_v32 = vpop.xlane.xlu1 %4399 }
0x277b   :  { %v4407_v8 = vadd.f32 1e-05, %v4405_v2  ;;  %v4404_v15 = vmul.f32 0.03125, %v4400_v32 }
0x277d   :  { %7148 = vrsqrt.f32 %v4407_v8  ;;  %v4406_v37 = vadd.f32 1e-05, %v4404_v15 }
0x277f   :  { %7150 = vrsqrt.f32 %v4406_v37 }
0x278a   :  { %v7149_v13 = vpop.eup %7148 }
0x278b   :  { %v4411_v9 = vmul.f32 %v7149_v13, %v4395_v33 }
0x278c   :  { %v7151_v35 = vpop.eup %7150 }
0x278d   :  { %v4410_v38 = vmul.f32 %v7151_v35, %v4394_v10  ;;  %v4419_v41 = vmul.f32 %v6112_v42, %v4411_v9 }
0x278f   :  { %v4418_v45 = vmul.f32 %v6112_v42, %v4410_v38  ;;  %v4427_v50 = vadd.f32 %v6113_v48, %v4419_v41 }
0x2791   :  { %v4426_v49 = vadd.f32 %v6113_v48, %v4418_v45 }
0x2793   :  { %6126 = vmatmul.mubr.msk.f32.vlgmr.msra.gmra.mxu0 %vm273_vm7, %v4426_v49 }
0x2794   :  { %6876 = vmatpush3.msra.mxu0 %v6125_v29  ;;  %4517 = vmatprep.mubr.f32.mxu0 %v7354_v23 }
0x2795   :  { %6877 = vmatprep.subr.mxu0 %v6122_v47 }
0x2796   :  { %6878 = vmatpush3.msra.mxu0 %v6122_v47 }
0x2797   :  { %6127 = vmatmul.mubr.msk.f32.gmra.mxu0 %vm273_vm7, %v4427_v50  ;;  %6879 = vmatprep.subr.mxu0 %v6119_v39 }
0x2798   :  { %6880 = vmatpush3.msra.mxu0 %v6119_v39  ;;  %6883 = vmatprep.mubr.msk.f32.mxu0 %vm273_vm7, %v4426_v49 }
0x2799   :  { %6881 = vmatprep.subr.mxu0 %v6116_v14 }
0x279a   :  { %6882 = vmatpush3.msra.mxu0 %v6116_v14 }
0x279b   :  { %6884 = vmatmul.mubr.msk.f32.vlgmr.msra.gmra.mxu0 %vm273_vm7, %v4427_v50 }
0x2853   :  { %v8460_v23 = vpop.f32.mrf.mxu0 }
0x2854   :  { %6890 = vmatprep.mubr.msk.f32.mxu0 %vm273_vm7, %v8460_v23 }
0x2855   :  { %v8464_v30 = vpop.f32.mrf.mxu0 }
0x2856   :  { %4716 = vrot.lane.b32.xlu0 %v8464_v30, %s7355_s24 }
0x2857   :  { %v8468_v51 = vpop.f32.mrf.mxu0 }
0x2859   :  { %v8470_v52 = vpop.f32.mrf.mxu0 }
0x285a   :  { %4718 = vrot.lane.b32.xlu1 %v8470_v52, %s7355_s24  ;;  %6886 = vmatprep.subr.msk.mxu0 %vm273_vm7, %v8470_v52 }
0x285b   :  { %6887 = vmatpush3.xpose.msk.msra.mxu0 %vm273_vm7, %v8470_v52  ;;  %v8492_v56 = vpop.f32.mrf.mxu0 }
0x285c   :  { %6888 = vmatprep.subr.msk.mxu0 %vm273_vm7, %v8464_v30 }
0x285d   :  { %v8497_v59 = vpop.f32.mrf.mxu0 }
0x285e   :  { %4712 = vrot.lane.b32.xlu1 %v8460_v23, %s7355_s24 }
0x285f   :  { %6889 = vmatpush3.xpose.msk.msra.mxu0 %vm273_vm7, %v8464_v30 }
0x2862   :  { %4714 = vrot.lane.b32.xlu1 %v8468_v51, %s7355_s24  ;;  %6891 = vmatmul.mubr.msk.f32.vlgmr.msra.gmra.mxu0 %vm273_vm7, %v8468_v51 }
0x28c8   :  { %v4717_v31 = vpop.permute.xlu0 %4716 }
0x28cc   :  { %v4719_v43 = vpop.permute.xlu1 %4718 }
0x28cd   :  { %6893 = vmatprep.subr.msk.mxu0 %vm273_vm7, %v4719_v43 }
0x28ce   :  { %6894 = vmatpush3.xpose.msk.msra.mxu0 %vm273_vm7, %v4719_v43 }
0x28cf   :  { %6895 = vmatprep.subr.msk.mxu0 %vm273_vm7, %v4717_v31 }
0x28d0   :  { %v4713_v28 = vpop.permute.xlu1 %4712 }
0x28d1   :  { %6897 = vmatprep.mubr.msk.f32.mxu0 %vm273_vm7, %v4713_v28 }
0x28d2   :  { %6896 = vmatpush3.xpose.msk.msra.mxu0 %vm273_vm7, %v4717_v31 }
0x28d3   :  { %6907 = vmatprep.subr.mxu0 %v8492_v56 }
0x28d4   :  { %v4715_v58 = vpop.permute.xlu1 %4714 }
0x28d5   :  { %6898 = vmatmul.mubr.msk.f32.vlgmr.msra.gmra.mxu0 %vm273_vm7, %v4715_v58 }
0x28d6   :  { %6908 = vmatpush3.msra.mxu0 %v8492_v56 }
0x28d7   :  { %6909 = vmatprep.subr.mxu0 %v8497_v59 }
0x28d8   :  { %6910 = vmatpush3.msra.mxu0 %v8497_v59 }
0x2922   :  { %v6892_v44 = vpop.f32.mrf.mxu0 }
0x2923   :  { %v4687_v5 = vmul.f32 0.17677669, %v6892_v44 }
0x2924   :  { %v4677_v60 = vpop.f32.mrf.mxu0 }
0x2925   :  { %v4689_v6 = vadd.f32 %v4687_v5, %v7523_v17  ;;  %v4686_v21 = vmul.f32 0.17677669, %v4677_v60 }
0x2927   :  { %v4693_v55 = vsel %vm578_vm11, %v4689_v6, -inf  ;;  %v4688_v22 = vadd.f32 %v4686_v21, %v7662_v34 }
0x2929   :  { %v4690_v24 = vsel %vm578_vm11, %v4688_v22, -inf }
0x2995   :  { %v6899_v36 = vpop.f32.mrf.mxu0 }
0x2996   :  { %v4804_v53 = vmul.f32 0.17677669, %v6899_v36 }
0x2997   :  { %v4794_v46 = vpop.f32.mrf.mxu0 }
0x2998   :  { %v4806_v61 = vadd.f32 %v4804_v53, %v7523_v17  ;;  %v4803_v62 = vmul.f32 0.17677669, %v4794_v46 }
0x299a   :  { %v4805_v54 = vadd.f32 %v4803_v62, %v7662_v34  ;;  %v4810_v12 = vsel %vm578_vm11, %v4806_v61, -inf }
0x299b   :  { %4811 = vmax.xlane.f32.xlu1 %v4810_v12 }
0x299c   :  { %v4807_v1 = vsel %vm578_vm11, %v4805_v54, -inf }
0x299d   :  { %4808 = vmax.xlane.f32.xlu0 %v4807_v1 }
0x29ac   :  { %4833 = vrot.lane.b32.xlu1 %v8492_v56, %s7355_s24 }
0x29b0   :  { %5005 = vrot.lane.b32.xlu1 %v8470_v52, %s7356_s9 }
0x29b4   :  { %5003 = vrot.lane.b32.xlu1 %v8464_v30, %s7356_s9 }
0x29b8   :  { %5001 = vrot.lane.b32.xlu1 %v8468_v51, %s7356_s9 }
0x29dc   :  { %4694 = vmax.xlane.f32.xlu1 %v4693_v55 }
0x2a24   :  { %v4812_v7 = vpop.xlane.xlu1 %4811 }
0x2a25   :  { %v4814_v40 = vsub.f32 %v4806_v61, %v4812_v7 }
0x2a26   :  { %v4809_v33 = vpop.xlane.xlu0 %4808 }
0x2a27   :  { %v4817_v57 = vmul.f32 1.442695, %v4814_v40  ;;  %v4813_v10 = vsub.f32 %v4805_v54, %v4809_v33 }
0x2a28   :  { %v4834_v11 = vpop.permute.xlu1 %4833 }
0x2a29   :  { %7152 = vpow2.f32 %v4817_v57  ;;  %v4815_v63 = vmul.f32 1.442695, %v4813_v10  ;;  %6900 = vmatprep.subr.mxu1 %v4834_v11 }
0x2a2a   :  { %6901 = vmatpush3.msra.mxu1 %v4834_v11 }
0x2a2b   :  { %7154 = vpow2.f32 %v4815_v63 }
0x2a2c   :  { %v5006_v29 = vpop.permute.xlu1 %5005 }
0x2a30   :  { %v5004_v37 = vpop.permute.xlu1 %5003 }
0x2a34   :  { %v5002_v13 = vpop.permute.xlu1 %5001 }
0x2a36   :  { %v7153_v16 = vpop.eup %7152 }
0x2a37   :  { %v4822_v18 = vsel %vm578_vm11, %v7153_v16, 0.0 }
0x2a38   :  { %v7155_v19 = vpop.eup %7154  ;;  %4823 = vadd.xlane.f32.xlu0 %v4822_v18 }
0x2a39   :  { %v4819_v20 = vsel %vm578_vm11, %v7155_v19, 0.0 }
0x2a3c   :  { %4820 = vadd.xlane.f32.xlu0 %v4819_v20 }
0x2a52   :  { %4831 = vrot.lane.b32.xlu0 %v8497_v59, %s7355_s24 }
0x2a56   :  { %4999 = vrot.lane.b32.xlu0 %v8460_v23, %s7356_s9 }
0x2a65   :  { %v4695_v48 = vpop.xlane.xlu1 %4694 }
0x2a66   :  { %v4697_v49 = vsub.f32 %v4689_v6, %v4695_v48 }
0x2a68   :  { %v4700_v47 = vmul.f32 1.442695, %v4697_v49 }
0x2a75   :  { %4691 = vmax.xlane.f32.xlu0 %v4690_v24 }
0x2ac1   :  { %v4824_v25 = vpop.xlane.xlu0 %4823 }
0x2ac2   :  { %7156 = vrcp.f32 %v4824_v25 }
0x2ac5   :  { %v4821_v26 = vpop.xlane.xlu0 %4820 }
0x2ac6   :  { %7158 = vrcp.f32 %v4821_v26 }
0x2ac9   :  { %v4832_v27 = vpop.permute.xlu0 %4831 }
0x2aca   :  { %6902 = vmatprep.subr.mxu1 %v4832_v27 }
0x2acb   :  { %6903 = vmatpush3.msra.mxu1 %v4832_v27 }
0x2acc   :  { %6914 = vmatprep.subr.msk.mxu1 %vm273_vm7, %v5006_v29 }
0x2acd   :  { %v5000_v15 = vpop.permute.xlu0 %4999 }
0x2acf   :  { %v7157_v3 = vpop.eup %7156 }
0x2ad0   :  { %v4828_v8 = vmul.f32 %v7157_v3, %v7153_v16 }
0x2ad3   :  { %v7159_v2 = vpop.eup %7158 }
0x2ad4   :  { %v4827_v32 = vmul.f32 %v7159_v2, %v7155_v19 }
0x2ad6   :  { %6904 = vmatprep.mubr.msk.f32.mxu1 %vm578_vm11, %v4827_v32 }
0x2ad7   :  { %6905 = vmatmul.mubr.msk.f32.vlgmr.msra.gmra.mxu1 %vm578_vm11, %v4828_v8 }
0x2ad8   :  { %6915 = vmatpush3.xpose.msk.msra.mxu1 %vm273_vm7, %v5006_v29  ;;  %6918 = vmatprep.mubr.msk.f32.mxu1 %vm273_vm7, %v5000_v15 }
0x2ad9   :  { %6916 = vmatprep.subr.msk.mxu1 %vm273_vm7, %v5004_v37 }
0x2adc   :  { %6917 = vmatpush3.xpose.msk.msra.mxu1 %vm273_vm7, %v5004_v37 }
0x2adf   :  { %6919 = vmatmul.mubr.msk.f32.vlgmr.msra.gmra.mxu1 %vm273_vm7, %v5002_v13 }
0x2afe   :  { %v4692_v35 = vpop.xlane.xlu0 %4691 }
0x2aff   :  { %v4696_v38 = vsub.f32 %v4688_v22, %v4692_v35 }
0x2b01   :  { %v4698_v9 = vmul.f32 1.442695, %v4696_v38 }
0x2b03   :  { %7160 = vpow2.f32 %v4698_v9 }
0x2b10   :  { %v7161_v42 = vpop.eup %7160 }
0x2b11   :  { %v4702_v45 = vsel %vm578_vm11, %v7161_v42, 0.0 }
0x2b12   :  { %4703 = vadd.xlane.f32.xlu1 %v4702_v45 }
0x2b23   :  { %5118 = vrot.lane.b32.xlu1 %v8492_v56, %s7356_s9 }
0x2b27   :  { %5211 = vrot.lane.b32.xlu1 %v8470_v52, %s7357_s27 }
0x2b2b   :  { %5209 = vrot.lane.b32.xlu1 %v8464_v30, %s7357_s27 }
0x2b97   :  { %v8539_v41 = vpop.f32.mrf.mxu1 }
0x2b99   :  { %v8541_v50 = vpop.f32.mrf.mxu1 }
0x2b9b   :  { %v4704_v39 = vpop.xlane.xlu1 %4703 }
0x2b9c   :  { %7162 = vrcp.f32 %v4704_v39 }
0x2b9d   :  { %7164 = vpow2.f32 %v4700_v47 }
0x2b9f   :  { %v6920_v14 = vpop.f32.mrf.mxu1  ;;  %v5119_v43 = vpop.permute.xlu1 %5118 }
0x2ba0   :  { %6921 = vmatprep.subr.mxu0 %v5119_v43  ;;  %v5091_v28 = vmul.f32 0.17677669, %v6920_v14 }
0x2ba1   :  { %v5081_v31 = vpop.f32.mrf.mxu1 }
0x2ba2   :  { %v5090_v58 = vmul.f32 0.17677669, %v5081_v31  ;;  %v5093_v30 = vadd.f32 %v5091_v28, %v7523_v17 }
0x2ba3   :  { %v5212_v63 = vpop.permute.xlu1 %5211 }
0x2ba4   :  { %v5092_v52 = vadd.f32 %v5090_v58, %v7662_v34  ;;  %v5097_v36 = vsel %vm578_vm11, %v5093_v30, -inf }
0x2ba6   :  { %v5094_v44 = vsel %vm578_vm11, %v5092_v52, -inf }
0x2ba7   :  { %5095 = vmax.xlane.f32.xlu0 %v5094_v44  ;;  %v5210_v16 = vpop.permute.xlu1 %5209 }
0x2ba9   :  { %v7163_v60 = vpop.eup %7162 }
0x2baa   :  { %v4710_v53 = vmul.f32 %v7163_v60, %v7161_v42  ;;  %v7165_v46 = vpop.eup %7164 }
0x2bab   :  { %5098 = vmax.xlane.f32.xlu0 %v5097_v36  ;;  %v4705_v61 = vsel %vm578_vm11, %v7165_v46, 0.0 }
0x2bac   :  { %6911 = vmatprep.mubr.msk.f32.mxu0 %vm578_vm11, %v4710_v53  ;;  %v6155_v53 = vld [vmem:[%s8712_s4 + $0x68] sm:$0xff] }
0x2baf   :  { %4706 = vadd.xlane.f32.xlu0 %v4705_v61 }
0x2c30   :  { %v5096_v62 = vpop.xlane.xlu0 %5095 }
0x2c31   :  { %v5100_v54 = vsub.f32 %v5092_v52, %v5096_v62  ;;  %v6157_v52 = vld [vmem:[%s8712_s4 + $0x78] sm:$0xff] }
0x2c33   :  { %v5102_v12 = vmul.f32 1.442695, %v5100_v54 }
0x2c34   :  { %v5099_v1 = vpop.xlane.xlu0 %5098 }
0x2c35   :  { %7166 = vpow2.f32 %v5102_v12  ;;  %v5101_v5 = vsub.f32 %v5093_v30, %v5099_v1 }
0x2c37   :  { %v5104_v6 = vmul.f32 1.442695, %v5101_v5 }
0x2c38   :  { %v4707_v55 = vpop.xlane.xlu0 %4706 }
0x2c39   :  { %7168 = vpow2.f32 %v5104_v6 }
0x2c3a   :  { %7170 = vrcp.f32 %v4707_v55  ;;  %v6161_v55 = vld [vmem:[%s8713_s5 + $0x3] ss:$0 sm:$0xff] }
0x2c42   :  { %v7167_v7 = vpop.eup %7166 }
0x2c43   :  { %v5106_v40 = vsel %vm578_vm11, %v7167_v7, 0.0 }
0x2c44   :  { %5107 = vadd.xlane.f32.xlu1 %v5106_v40 }
0x2c46   :  { %v7169_v33 = vpop.eup %7168 }
0x2c47   :  { %v7171_v57 = vpop.eup %7170  ;;  %v5109_v10 = vsel %vm578_vm11, %v7169_v33, 0.0 }
0x2c48   :  { %5110 = vadd.xlane.f32.xlu0 %v5109_v10  ;;  %v4711_v11 = vmul.f32 %v7171_v57, %v7165_v46  ;;  %v6154_v46 = vld [vmem:[%s8712_s4 + $0x60] sm:$0xff] }
0x2c4a   :  { %6912 = vmatmul.mubr.msk.f32.vlgmr.msra.gmra.mxu0 %vm578_vm11, %v4711_v11 }
0x2c4b   :  { %6922 = vmatpush3.msra.mxu0 %v5119_v43 }
0x2c55   :  { %5207 = vrot.lane.b32.xlu1 %v8468_v51, %s7357_s27 }
0x2c5e   :  { %5116 = vrot.lane.b32.xlu0 %v8497_v59, %s7356_s9 }
0x2c62   :  { %5205 = vrot.lane.b32.xlu0 %v8460_v23, %s7357_s27 }
0x2ccd   :  { %v5108_v18 = vpop.xlane.xlu1 %5107 }
0x2cce   :  { %7172 = vrcp.f32 %v5108_v18 }
0x2cd1   :  { %v5111_v19 = vpop.xlane.xlu0 %5110  ;;  %v5208_v23 = vpop.permute.xlu1 %5207 }
0x2cd2   :  { %7174 = vrcp.f32 %v5111_v19 }
0x2cd5   :  { %v5117_v20 = vpop.permute.xlu0 %5116 }
0x2cd6   :  { %6923 = vmatprep.subr.mxu0 %v5117_v20 }
0x2cd7   :  { %6924 = vmatpush3.msra.mxu0 %v5117_v20 }
0x2cd8   :  { %6928 = vmatprep.subr.msk.mxu0 %vm273_vm7, %v5212_v63 }
0x2cd9   :  { %v5206_v25 = vpop.permute.xlu0 %5205 }
0x2cdb   :  { %v7173_v21 = vpop.eup %7172 }
0x2cdc   :  { %v5114_v22 = vmul.f32 %v7173_v21, %v7167_v7 }
0x2cde   :  { %6925 = vmatprep.mubr.msk.f32.mxu0 %vm578_vm11, %v5114_v22 }
0x2cdf   :  { %v7175_v51 = vpop.eup %7174 }
0x2ce0   :  { %v5115_v24 = vmul.f32 %v7175_v51, %v7169_v33 }
0x2ce2   :  { %6926 = vmatmul.mubr.msk.f32.vlgmr.msra.gmra.mxu0 %vm578_vm11, %v5115_v24  ;;  %v6167_v24 = vld [vmem:[%s8718_s10 + $0x78] sm:$0xff] }
0x2ce3   :  { %6929 = vmatpush3.xpose.msk.msra.mxu0 %vm273_vm7, %v5212_v63  ;;  %6932 = vmatprep.mubr.msk.f32.mxu0 %vm273_vm7, %v5206_v25  ;;  %v6166_v25 = vld [vmem:[%s8718_s10 + $0x70] sm:$0xff] }
0x2ce4   :  { %6930 = vmatprep.subr.msk.mxu0 %vm273_vm7, %v5210_v16 }
0x2ce7   :  { %6931 = vmatpush3.xpose.msk.msra.mxu0 %vm273_vm7, %v5210_v16 }
0x2ce8   :  { %6953 = vmatprep.subr.mxu0 %v6167_v24 }
0x2cea   :  { %6933 = vmatmul.mubr.msk.f32.vlgmr.msra.gmra.mxu0 %vm273_vm7, %v5208_v23  ;;  %v6165_v23 = vld [vmem:[%s8718_s10 + $0x68] sm:$0xff] }
0x2ceb   :  { %6954 = vmatpush3.msra.mxu0 %v6167_v24  ;;  %v5800_v24 = vld [vmem:[#allocation11 + $0x8] sm:$0xff] }
0x2cec   :  { %6955 = vmatprep.subr.mxu0 %v6166_v25 }
0x2ced   :  { %6956 = vmatpush3.msra.mxu0 %v6166_v25  ;;  %v5799_v25 = vld [vmem:[#allocation11] sm:$0xff] }
0x2cee   :  { %6957 = vmatprep.subr.mxu0 %v6165_v23 }
0x2cef   :  { %6958 = vmatpush3.msra.mxu0 %v6165_v23 }
0x2d0a   :  { %v6913_v26 = vpop.f32.mrf.mxu0 }
0x2d0b   :  { %v4996_v29 = vadd.f32 %v6913_v26, %v8539_v41  ;;  %v6164_v26 = vld [vmem:[%s8718_s10 + $0x60] sm:$0xff] }
0x2d0c   :  { %v4990_v27 = vpop.f32.mrf.mxu0  ;;  %6959 = vmatprep.subr.mxu0 %v6164_v26 }
0x2d0d   :  { %v4991_v61 = vadd.f32 %v4990_v27, %v8541_v50  ;;  %6960 = vmatpush3.msra.mxu0 %v6164_v26  ;;  %v6186_v27 = vld [vmem:[%s8720_s12 + $0x1f8] sm:$0xff] }
0x2da2   :  { %v6927_v3 = vpop.f32.mrf.mxu0 }
0x2da3   :  { %v5204_v2 = vadd.f32 %v6927_v3, %v4996_v29  ;;  %v6185_v29 = vld [vmem:[%s8720_s12 + $0x1f0] sm:$0xff]  ;;  %v6184_v3 = vld [vmem:[%s8720_s12 + $0x1e8] sm:$0xff] }
0x2da4   :  { %v5194_v32 = vpop.f32.mrf.mxu0 }
0x2da5   :  { %v5203_v54 = vadd.f32 %v5194_v32, %v4991_v61  ;;  %v6182_v32 = vld [vmem:[%s8720_s12 + $0x1d8] sm:$0xff] }
0x2daa   :  { %v6934_v8 = vpop.f32.mrf.mxu0 }
0x2dab   :  { %v5297_v15 = vmul.f32 0.17677669, %v6934_v8  ;;  %v6181_v8 = vld [vmem:[%s8720_s12 + $0x1d0] sm:$0xff] }
0x2dac   :  { %v5287_v37 = vpop.f32.mrf.mxu0 }
0x2dad   :  { %v5299_v13 = vadd.f32 %v5297_v15, %v7523_v17  ;;  %v5296_v35 = vmul.f32 0.17677669, %v5287_v37  ;;  %v6180_v15 = vld [vmem:[%s8720_s12 + $0x1c8] sm:$0xff]  ;;  %v6179_v37 = vld [vmem:[%s8720_s12 + $0x1c0] sm:$0xff] }
0x2daf   :  { %v5298_v38 = vadd.f32 %v5296_v35, %v7662_v34  ;;  %v5303_v9 = vsel %vm578_vm11, %v5299_v13, -inf  ;;  %v6177_v35 = vld [vmem:[%s8720_s12 + $0x1b0] sm:$0xff] }
0x2db0   :  { %5304 = vmax.xlane.f32.xlu1 %v5303_v9  ;;  %v6175_v9 = vld [vmem:[%s8720_s12 + $0x1a0] sm:$0xff] }
0x2db1   :  { %v5300_v42 = vsel %vm578_vm11, %v5298_v38, -inf }
0x2db2   :  { %5301 = vmax.xlane.f32.xlu0 %v5300_v42 }
0x2dc1   :  { %5324 = vrot.lane.b32.xlu1 %v8492_v56, %s7357_s27 }
0x2e39   :  { %v5305_v45 = vpop.xlane.xlu1 %5304 }
0x2e3a   :  { %v5307_v48 = vsub.f32 %v5299_v13, %v5305_v45  ;;  %v6178_v13 = vld [vmem:[%s8720_s12 + $0x1b8] sm:$0xff] }
0x2e3b   :  { %v5302_v49 = vpop.xlane.xlu0 %5301 }
0x2e3c   :  { %v5310_v41 = vmul.f32 1.442695, %v5307_v48  ;;  %v5306_v47 = vsub.f32 %v5298_v38, %v5302_v49  ;;  %v6176_v38 = vld [vmem:[%s8720_s12 + $0x1a8] sm:$0xff] }
0x2e3d   :  { %v5325_v39 = vpop.permute.xlu1 %5324 }
0x2e3e   :  { %7176 = vpow2.f32 %v5310_v41  ;;  %v5308_v17 = vmul.f32 1.442695, %v5306_v47  ;;  %6935 = vmatprep.subr.mxu1 %v5325_v39 }
0x2e3f   :  { %6936 = vmatpush3.msra.mxu1 %v5325_v39 }
0x2e40   :  { %7178 = vpow2.f32 %v5308_v17  ;;  %v6162_v17 = vld [vmem:[#allocation5 + $0x3] ss:$0 sm:$0xff] }
0x2e4b   :  { %v7177_v34 = vpop.eup %7176 }
0x2e4c   :  { %v5315_v14 = vsel %vm578_vm11, %v7177_v34, 0.0 }
0x2e4d   :  { %v7179_v43 = vpop.eup %7178  ;;  %5316 = vadd.xlane.f32.xlu0 %v5315_v14 }
0x2e4e   :  { %v5312_v31 = vsel %vm578_vm11, %v7179_v43, 0.0 }
0x2e51   :  { %5313 = vadd.xlane.f32.xlu0 %v5312_v31 }
0x2e67   :  { %5322 = vrot.lane.b32.xlu0 %v8497_v59, %s7357_s27  ;;  %v6156_v59 = vld [vmem:[%s8712_s4 + $0x70] sm:$0xff] }
0x2ed6   :  { %v5317_v56 = vpop.xlane.xlu0 %5316 }
0x2ed7   :  { %7180 = vrcp.f32 %v5317_v56  ;;  %v6163_v56 = vld [vmem:[#allocation7 + $0x3] ss:$0 sm:$0xff] }
0x2eda   :  { %v5314_v28 = vpop.xlane.xlu0 %5313 }
0x2edb   :  { %7182 = vrcp.f32 %v5314_v28 }
0x2ede   :  { %v5323_v58 = vpop.permute.xlu0 %5322 }
0x2edf   :  { %6937 = vmatprep.subr.mxu1 %v5323_v58 }
0x2ee0   :  { %6938 = vmatpush3.msra.mxu1 %v5323_v58 }
0x2ee1   :  { %6942 = vmatprep.subr.mxu1 %v6157_v52 }
0x2ee4   :  { %v7181_v30 = vpop.eup %7180 }
0x2ee5   :  { %v5321_v36 = vmul.f32 %v7181_v30, %v7177_v34  ;;  %v6174_v30 = vld [vmem:[%s8720_s12 + $0x198] sm:$0xff] }
0x2ee8   :  { %v7183_v44 = vpop.eup %7182 }
0x2ee9   :  { %v5320_v60 = vmul.f32 %v7183_v44, %v7179_v43  ;;  %v6173_v44 = vld [vmem:[%s8720_s12 + $0x190] sm:$0xff] }
0x2eeb   :  { %6939 = vmatprep.mubr.msk.f32.mxu1 %vm578_vm11, %v5320_v60  ;;  %v6172_v60 = vld [vmem:[%s8720_s12 + $0x188] sm:$0xff] }
0x2eec   :  { %6940 = vmatmul.mubr.msk.f32.vlgmr.msra.gmra.mxu1 %vm578_vm11, %v5321_v36  ;;  %v6171_v36 = vld [vmem:[%s8720_s12 + $0x180] sm:$0xff] }
0x2eed   :  { %6943 = vmatpush3.msra.mxu1 %v6157_v52 }
0x2eee   :  { %6944 = vmatprep.subr.mxu1 %v6156_v59 }
0x2eef   :  { %6945 = vmatpush3.msra.mxu1 %v6156_v59  ;;  %v6168_v59 = vld [vmem:[#allocation8 + $0x3] ss:$0 sm:$0xff] }
0x2ef0   :  { %6946 = vmatprep.subr.mxu1 %v6155_v53 }
0x2ef1   :  { %6947 = vmatpush3.msra.mxu1 %v6155_v53 }
0x2ef2   :  { %6948 = vmatprep.subr.mxu1 %v6154_v46 }
0x2ef3   :  { %6949 = vmatpush3.msra.mxu1 %v6154_v46 }
0x2ef4   :  { %6964 = vmatprep.subr.mxu1 %v6186_v27 }
0x2fac   :  { %v6941_v62 = vpop.f32.mrf.mxu1 }
0x2fad   :  { %v5410_v5 = vadd.f32 %v6941_v62, %v5204_v2  ;;  %v6183_v2 = vld [vmem:[%s8720_s12 + $0x1e0] sm:$0xff] }
0x2fae   :  { %v5400_v12 = vpop.f32.mrf.mxu1 }
0x2faf   :  { %v5409_v1 = vadd.f32 %v5400_v12, %v5203_v54 }
0x2fb1   :  { %6950 = vmatprep.mubr.msk.f32.mxu1 %vm273_vm7, %v5409_v1 }
0x2fb2   :  { %6951 = vmatmul.mubr.msk.f32.vlgmr.msra.gmra.mxu1 %vm273_vm7, %v5410_v5  ;;  %v6187_v5 = vld [vmem:[#allocation10 + $0x3] ss:$0 sm:$0xff] }
0x2fb3   :  { %6965 = vmatpush3.msra.mxu1 %v6186_v27 }
0x2fb4   :  { %6966 = vmatprep.subr.mxu1 %v6185_v29 }
0x2fb5   :  { %6967 = vmatpush3.msra.mxu1 %v6185_v29 }
0x2fb6   :  { %6968 = vmatprep.subr.mxu1 %v6184_v3 }
0x2fb7   :  { %6969 = vmatpush3.msra.mxu1 %v6184_v3 }
0x2fb8   :  { %6970 = vmatprep.subr.mxu1 %v6183_v2 }
0x2fb9   :  { %6971 = vmatpush3.msra.mxu1 %v6183_v2 }
0x2fba   :  { %6972 = vmatprep.subr.mxu1 %v6182_v32 }
0x2fbb   :  { %6973 = vmatpush3.msra.mxu1 %v6182_v32 }
0x2fbc   :  { %6974 = vmatprep.subr.mxu1 %v6181_v8 }
0x2fbd   :  { %6975 = vmatpush3.msra.mxu1 %v6181_v8  ;;  %v6188_v8 = vld [vmem:[%s8722_s14] ss:$0 sm:$0xff]  ;;  %s7358_s14 = smov [#allocation13]  }
0x2fbe   :  { %6976 = vmatprep.subr.mxu1 %v6180_v15  ;;  %s5898_s29 = sshll.u32 %s7358_s14, 4  ;;  %s5899_s29 = int_to_ptr.vmem [resolvable:$true] %s5898_s29 }
0x2fbf   :  { %6977 = vmatpush3.msra.mxu1 %v6180_v15  ;;  %p7317_p3 = scmp.lt.s32.totalorder %s5899_s29, %s5899_s29 }
0x2fc0   :  { %6978 = vmatprep.subr.mxu1 %v6179_v37 }
0x2fc1   :  { %6979 = vmatpush3.msra.mxu1 %v6179_v37 }
0x2fc2   :  { %6980 = vmatprep.subr.mxu1 %v6178_v13 }
0x2fc3   :  { %6981 = vmatpush3.msra.mxu1 %v6178_v13 }
0x2fc4   :  { %6982 = vmatprep.subr.mxu1 %v6177_v35 }
0x2fc5   :  { %6983 = vmatpush3.msra.mxu1 %v6177_v35 }
0x2fc6   :  { %6984 = vmatprep.subr.mxu1 %v6176_v38 }
0x2fc7   :  { %6985 = vmatpush3.msra.mxu1 %v6176_v38  ;;  %v6189_v38 = vld [vmem:[%s8723_s15] ss:$0 sm:$0xff]  ;;  %s7312_s15 = scalar_lea.vmem %s5899_s29, 256 }
0x2fc8   :  { %6986 = vmatprep.subr.mxu1 %v6175_v9  ;;  %p7313_p2 = scmp.ne.s32.totalorder %s5899_s29, %s7312_s15  ;;  %p7318_p4 = scmp.lt.s32.totalorder %s7312_s15, %s7312_s15 }
0x2fc9   :  { %6987 = vmatpush3.msra.mxu1 %v6175_v9 }
0x2fca   :  { %6988 = vmatprep.subr.mxu1 %v6174_v30  ;;  %p7319_p5 = por %p7318_p4, %p7317_p3 }
0x2fcb   :  { %6989 = vmatpush3.msra.mxu1 %v6174_v30 }
0x2fcc   :  { %6990 = vmatprep.subr.mxu1 %v6173_v44  ;;  %p7320_p6 = pnand %p7319_p5, %p7313_p2 }
0x2fcd   :  { %6991 = vmatpush3.msra.mxu1 %v6173_v44 }
0x2fce   :  { %6992 = vmatprep.subr.mxu1 %v6172_v60 }
0x2fcf   :  { %6993 = vmatpush3.msra.mxu1 %v6172_v60 }
0x2fd0   :  { %6994 = vmatprep.subr.mxu1 %v6171_v36 }
0x2fd1   :  { %6995 = vmatpush3.msra.mxu1 %v6171_v36 }
0x3072   :  { %v6952_v6 = vpop.f32.mrf.mxu1 }
0x3073   :  { %v5498_v7 = vadd.f32 %v6952_v6, %v8403_v0 }
0x3074   :  { %v5488_v40 = vpop.f32.mrf.mxu1 }
0x3075   :  { %v8598_v33 = vadd.f32 %v6161_v55, %v5498_v7  ;;  %v5497_v50 = vadd.f32 %v5488_v40, %v8406_v4 }
0x3077   :  { %v8601_v57 = vadd.f32 %v6161_v55, %v5497_v50  ;;  %v5516_v10 = vsel %vm273_vm7, %v8598_v33, 0.0 }
0x3078   :  { %5517 = vadd.xlane.f32.xlu0 %v5516_v10 }
0x3079   :  { %v5513_v11 = vsel %vm273_vm7, %v8601_v57, 0.0 }
0x307a   :  { %5514 = vadd.xlane.f32.xlu1 %v5513_v11 }
0x3101   :  { %v5518_v63 = vpop.xlane.xlu0 %5517 }
0x3102   :  { %v5520_v16 = vmul.f32 0.03125, %v5518_v63 }
0x3103   :  { %v5515_v18 = vpop.xlane.xlu1 %5514 }
0x3104   :  { %v8608_v0 = vsub.f32 %v8598_v33, %v5520_v16  ;;  %v5519_v19 = vmul.f32 0.03125, %v5515_v18 }
0x3106   :  { %v8611_v20 = vsub.f32 %v8601_v57, %v5519_v19  ;;  %v5524_v4 = vmul.f32 %v8608_v0, %v8608_v0 }
0x3108   :  { %v5528_v21 = vsel %vm273_vm7, %v5524_v4, 0.0  ;;  %v5523_v22 = vmul.f32 %v8611_v20, %v8611_v20 }
0x3109   :  { %5529 = vadd.xlane.f32.xlu0 %v5528_v21 }
0x310a   :  { %v5525_v51 = vsel %vm273_vm7, %v5523_v22, 0.0  ;;  %v5802_v22 = vld [vmem:[#allocation11 + $0x18] sm:$0xff] }
0x310b   :  { %5526 = vadd.xlane.f32.xlu1 %v5525_v51  ;;  %v5801_v51 = vld [vmem:[#allocation11 + $0x10] sm:$0xff]  ;;  %6999 = vmatprep.subr.mxu0 %v5802_v22 }
0x3192   :  { %v5530_v42 = vpop.xlane.xlu0 %5529 }
0x3193   :  { %v5532_v45 = vmul.f32 0.03125, %v5530_v42 }
0x3194   :  { %v5527_v48 = vpop.xlane.xlu1 %5526 }
0x3195   :  { %v5534_v49 = vadd.f32 1e-05, %v5532_v45  ;;  %v5531_v41 = vmul.f32 0.03125, %v5527_v48  ;;  %v6190_v48 = vld [vmem:[%s8725_s17] ss:$0 sm:$0xff] }
0x3197   :  { %7184 = vrsqrt.f32 %v5534_v49  ;;  %v5533_v47 = vadd.f32 1e-05, %v5531_v41 }
0x3199   :  { %7186 = vrsqrt.f32 %v5533_v47 }
0x31a4   :  { %v7185_v39 = vpop.eup %7184 }
0x31a5   :  { %v5538_v34 = vmul.f32 %v7185_v39, %v8608_v0 }
0x31a6   :  { %v7187_v14 = vpop.eup %7186 }
0x31a7   :  { %v5537_v43 = vmul.f32 %v7187_v14, %v8611_v20  ;;  %v5546_v31 = vmul.f32 %v6162_v17, %v5538_v34 }
0x31a9   :  { %v5545_v28 = vmul.f32 %v6162_v17, %v5537_v43  ;;  %v5554_v52 = vadd.f32 %v6163_v56, %v5546_v31 }
0x31ab   :  { %v5553_v58 = vadd.f32 %v6163_v56, %v5545_v28 }
0x31ad   :  { %6961 = vmatprep.mubr.msk.f32.mxu0 %vm273_vm7, %v5553_v58 }
0x31ae   :  { %6962 = vmatmul.mubr.msk.f32.vlgmr.msra.gmra.mxu0 %vm273_vm7, %v5554_v52 }
0x31af   :  { %7000 = vmatpush3.msra.mxu0 %v5802_v22 }
0x31b0   :  { %7001 = vmatprep.subr.mxu0 %v5801_v51 }
0x31b1   :  { %7002 = vmatpush3.msra.mxu0 %v5801_v51 }
0x31b2   :  { %7003 = vmatprep.subr.mxu0 %v5800_v24 }
0x31b3   :  { %7004 = vmatpush3.msra.mxu0 %v5800_v24 }
0x31b4   :  { %7005 = vmatprep.subr.mxu0 %v5799_v25 }
0x31b5   :  { %7006 = vmatpush3.msra.mxu0 %v5799_v25 }
0x326e   :  { %v6963_v53 = vpop.f32.mrf.mxu0 }
0x326f   :  { %v5646_v46 = vadd.f32 %v6963_v53, %v6168_v59 }
0x3270   :  { %v5640_v61 = vpop.f32.mrf.mxu0 }
0x3271   :  { %v5641_v62 = vadd.f32 %v6168_v59, %v5640_v61  ;;  %v5650_v12 = vmax.f32 %v5646_v46, 0.0 }
0x3273   :  { %v5649_v54 = vmax.f32 %v5641_v62, 0.0 }
0x3275   :  { %6996 = vmatprep.mubr.f32.mxu1 %v5649_v54 }
0x3276   :  { %6997 = vmatmul.mubr.f32.vlgmr.msra.gmra.mxu1 %v5650_v12 }
0x3336   :  { %v6998_v1 = vpop.f32.mrf.mxu1 }
0x3337   :  { %v5744_v6 = vadd.f32 %v6998_v1, %v8598_v33 }
0x3338   :  { %v5734_v55 = vpop.f32.mrf.mxu1 }
0x3339   :  { %v5754_v7 = vadd.f32 %v6187_v5, %v5744_v6  ;;  %v5743_v40 = vadd.f32 %v5734_v55, %v8601_v57 }
0x333b   :  { %v5753_v50 = vadd.f32 %v6187_v5, %v5743_v40  ;;  %v5760_v10 = vsel %vm273_vm7, %v5754_v7, 0.0 }
0x333c   :  { %5761 = vadd.xlane.f32.xlu0 %v5760_v10 }
0x333d   :  { %v5757_v11 = vsel %vm273_vm7, %v5753_v50, 0.0 }
0x333e   :  { %5758 = vadd.xlane.f32.xlu1 %v5757_v11 }
0x33c5   :  { %v5762_v63 = vpop.xlane.xlu0 %5761 }
0x33c6   :  { %v5764_v16 = vmul.f32 0.03125, %v5762_v63 }
0x33c7   :  { %v5759_v18 = vpop.xlane.xlu1 %5758 }
0x33c8   :  { %v5766_v0 = vsub.f32 %v5754_v7, %v5764_v16  ;;  %v5763_v19 = vmul.f32 0.03125, %v5759_v18 }
0x33ca   :  { %v5765_v20 = vsub.f32 %v5753_v50, %v5763_v19  ;;  %v5768_v4 = vmul.f32 %v5766_v0, %v5766_v0 }
0x33cc   :  { %v5772_v33 = vsel %vm273_vm7, %v5768_v4, 0.0  ;;  %v5767_v21 = vmul.f32 %v5765_v20, %v5765_v20 }
0x33cd   :  { %5773 = vadd.xlane.f32.xlu0 %v5772_v33 }
0x33ce   :  { %v5769_v57 = vsel %vm273_vm7, %v5767_v21, 0.0 }
0x33cf   :  { %5770 = vadd.xlane.f32.xlu1 %v5769_v57 }
0x3456   :  { %v5774_v23 = vpop.xlane.xlu0 %5773 }
0x3457   :  { %v5776_v26 = vmul.f32 0.03125, %v5774_v23 }
0x3458   :  { %v5771_v27 = vpop.xlane.xlu1 %5770 }
0x3459   :  { %v5778_v29 = vadd.f32 1e-05, %v5776_v26  ;;  %v5775_v3 = vmul.f32 0.03125, %v5771_v27 }
0x345b   :  { %7188 = vrsqrt.f32 %v5778_v29  ;;  %v5777_v2 = vadd.f32 1e-05, %v5775_v3 }
0x345d   :  { %7190 = vrsqrt.f32 %v5777_v2 }
0x3468   :  { %v7189_v32 = vpop.eup %7188 }
0x3469   :  { %v5782_v15 = vmul.f32 %v7189_v32, %v5766_v0 }
0x346a   :  { %v7191_v37 = vpop.eup %7190 }
0x346b   :  { %v5781_v13 = vmul.f32 %v7191_v37, %v5765_v20  ;;  %v5790_v35 = vmul.f32 %v6188_v8, %v5782_v15 }
0x346d   :  { %v5789_v9 = vmul.f32 %v6188_v8, %v5781_v13  ;;  %v5798_v45 = vadd.f32 %v6189_v38, %v5790_v35 }
0x346f   :  { %v5797_v42 = vadd.f32 %v6189_v38, %v5789_v9 }
0x3471   :  { %7007 = vmatprep.mubr.msk.f32.mxu0 %vm273_vm7, %v5797_v42 }
0x3472   :  { %7008 = vmatmul.mubr.msk.f32.vlgmr.msra.gmra.mxu0 %vm273_vm7, %v5798_v45 }
0x3532   :  { %v7009_v49 = vpop.f32.mrf.mxu0 }
0x3533   :  { %v5888_v41 = vadd.f32 %v7009_v49, %v6190_v48 }
0x3534   :  { %v5882_v47 = vpop.f32.mrf.mxu0 }
0x3535   :  { %5892 = vst.msk [vmem:[#allocation13 + $0x8] sm:$0xff] %vm168_vm4, %v5888_v41  ;;  %v5883_v39 = vadd.f32 %v6190_v48, %v5882_v47 }
0x3537   :  { %5891 = vst.msk [vmem:[#allocation13] sm:$0xff] %vm168_vm4, %v5883_v39 }
0x3538   :  { %7323 = shalt.err (!%p7320_p6)
}
0x3539   :  { %5904 = dma.vmem_to_hbm [thread:$0]  %s5899_s29, 256, %s8726_s18, [#allocation4], %s7350_s25, %s7350_s25, %s7351_s26  }
0x353a   :  { %7340 = dma.done.wait [#allocation4], 256  }
0x353b   :  { %7341 = vsyncadd [#allocation4], 4294967040 }
0x353c   :  { %5908 = vsyncpa [#allocation3], 1 }
0x353d   :  { %5909 = vsyncpa [#allocation6], 1 }
0x353e   :  { %5910 = vsyncpa [#allocation9], 1 }
0x353f   :  { %5911 = vsyncpa [#allocation12], 1 }
0x3540   :  { %5912 = vsyncpa [#allocation4], 1 }

</bundles_post_ra>
